<compile_context>
chip_gen: v6e
topology: v6e:2x2x1
jax: 0.10.0
libtpu: 0.0.40
codegen_flags: <defaults>
</compile_context>

<pallas_src>
import jax
import jax.numpy as jnp
from jax.experimental import pallas as pl
from jax.experimental.pallas import tpu as pltpu

EPS = 1e-5


def _valid_row_mask(b, hp, wp, h, w):
    """(b*hp*wp, 1) f32 mask of interior (non-pad) rows of a padded NHWC grid."""
    r = jnp.arange(b * hp * wp)
    ip = (r % (hp * wp)) // wp
    jp = r % wp
    m = (ip >= 1) & (ip <= h) & (jp >= 1) & (jp <= w)
    return m.astype(jnp.float32).reshape(-1, 1)


def relation_network_forward(x_nchw, params):
    B, Cin, H, W = x_nchw.shape
    C1 = params["w1"].shape[0]        # conv1 out channels (64)
    C2 = params["w2"].shape[0]        # conv2 out channels (64)
    HID = params["fc1_w"].shape[0]    # fc1 hidden size
    H1, W1 = H // 2, W // 2           # after pool1
    H2, W2 = H // 4, W // 4           # after pool2
    Hp, Wp = H + 2, W + 2             # conv1 padded grid
    Hq, Wq = H1 + 2, W1 + 2           # conv2 padded grid
    Np1 = B * Hp * Wp                 # padded-grid rows, layer 1
    Np2 = B * Hq * Wq                 # padded-grid rows, layer 2
    Nrm1 = Np1 - Wp - 1               # rows of the pool1 window-max slab
    Nrm2 = Np2 - Wq - 1               # rows of the pool2 window-max slab
    M1 = 16                           # row margin >= max |tap shift| = Wp + 1
    M2 = 8                            # row margin >= Wq + 1
    n1 = float(B * H * W)             # BN1 elements per channel
    n2 = float(B * H1 * W1)           # BN2 elements per channel

    # ---- parameter packing (tiny, one-time XLA ops on weights) -------------
    # conv weights (Cout, Cin, 3, 3) -> fused (9*Cin, Cout), row = t*Cin + cin
    # with tap index t = dy*3 + dx (matches the lane-concat order in-kernel).
    w1 = jnp.transpose(params["w1"], (2, 3, 1, 0)).reshape(9 * Cin, C1).astype(jnp.bfloat16)
    w2 = jnp.transpose(params["w2"], (2, 3, 1, 0)).reshape(9 * C1, C2).astype(jnp.bfloat16)
    g1 = params["g1"].reshape(1, C1).astype(jnp.float32)
    be1 = params["be1"].reshape(1, C1).astype(jnp.float32)
    g2 = params["g2"].reshape(1, C2).astype(jnp.float32)
    be2 = params["be2"].reshape(1, C2).astype(jnp.float32)
    # NOTE: conv biases params["b1"]/params["b2"] are intentionally NOT used:
    # a per-channel bias added before training-mode BatchNorm is exactly
    # cancelled by the mean subtraction, so dropping it is mathematically exact.
    # fc1 weight (HID, C2*H2*W2) in PyTorch NCHW-flatten order ->
    # (H2*W2*C2, HID) in the (position-major, channel-minor) order of the
    # lane-dense pooled feature built in-kernel.
    wk = jnp.transpose(params["fc1_w"].reshape(HID, C2, H2, W2), (2, 3, 1, 0))
    wk = wk.reshape(H2 * W2 * C2, HID).astype(jnp.float32)
    b1fc = params["fc1_b"].reshape(1, HID).astype(jnp.float32)
    w2fc = params["fc2_w"].reshape(1, HID).astype(jnp.float32)
    b2fc = params["fc2_b"].reshape(1, 1).astype(jnp.float32)

    # ---- conv1 input: NCHW -> NHWC, zero-pad, flatten rows, add row margin --
    x = jnp.transpose(x_nchw, (0, 2, 3, 1)).astype(jnp.float32)
    xp = jnp.pad(x, ((0, 0), (1, 1), (1, 1), (0, 0))).reshape(Np1, Cin)
    xflat = jnp.pad(xp, ((M1, M1), (0, 0)))                   # (M1+Np1+M1, Cin) f32

    mask1 = _valid_row_mask(B, Hp, Wp, H, W)                  # (Np1, 1)
    mask2 = _valid_row_mask(B, Hq, Wq, H1, W1)                # (Np2, 1)

    def kernel(xflat_ref, w1_ref, g1_ref, be1_ref, mask1_ref,
               w2_ref, g2_ref, be2_ref, mask2_ref,
               wk_ref, b1fc_ref, w2fc_ref, b2fc_ref,
               o_ref, s1_ref, rm1_ref, xp2_ref, s2_ref, rm2_ref):
        f32 = jnp.float32
        bf16 = jnp.bfloat16

        # ---- layer 1: conv 3x3 (pad=1) as ONE wide-K MXU matmul -------------
        # The 9 tap views (each 128 lanes wide -> vreg-aligned concat) are
        # concatenated along lanes into (Np1, 9*Cin) = K of 1152.
        taps1 = [
            xflat_ref[pl.ds(M1 + (dy - 1) * Wp + (dx - 1), Np1), :].astype(bf16)
            for dy in range(3) for dx in range(3)
        ]
        x9 = jnp.concatenate(taps1, axis=1)                              # (Np1, 9*Cin)
        acc = jnp.dot(x9, w1_ref[...], preferred_element_type=f32)       # (Np1, C1)

        # BatchNorm2d (training-mode batch stats over valid rows, one pass) + ReLU
        m1 = mask1_ref[...]
        am = acc * m1
        mean1 = jnp.sum(am, axis=0, keepdims=True) * (1.0 / n1)
        ex2_1 = jnp.sum(am * acc, axis=0, keepdims=True) * (1.0 / n1)
        var1 = jnp.maximum(ex2_1 - mean1 * mean1, 0.0)
        scale1 = g1_ref[...] * jax.lax.rsqrt(var1 + EPS)
        shift1 = be1_ref[...] - mean1 * scale1
        s1_ref[...] = jnp.maximum(acc * scale1 + shift1, 0.0)

        # ---- 2x2 max-pool (stride 2): whole-slab shifted max, then gather ---
        # rm1[r] = max of the 2x2 window anchored at flat padded position r.
        rm1_ref[...] = jnp.maximum(
            jnp.maximum(s1_ref[pl.ds(0, Nrm1), :], s1_ref[pl.ds(1, Nrm1), :]),
            jnp.maximum(s1_ref[pl.ds(Wp, Nrm1), :], s1_ref[pl.ds(Wp + 1, Nrm1), :]))
        # Zero-init gives conv2 its zero padding (and zero margins).
        xp2_ref[...] = jnp.zeros(xp2_ref.shape, xp2_ref.dtype)
        for bb in range(B):                     # 8 iterations total at B=2
            for io in range(H1):
                src = bb * Hp * Wp + (2 * io + 1) * Wp + 1
                dst = M2 + bb * Hq * Wq + (io + 1) * Wq + 1
                xp2_ref[pl.ds(dst, W1), :] = rm1_ref[pl.ds(src, W1, 2), :]

        # ---- layer 2: conv 3x3 (pad=1), same single fused-tap matmul --------
        taps2 = [
            xp2_ref[pl.ds(M2 + (dy - 1) * Wq + (dx - 1), Np2), :]
            for dy in range(3) for dx in range(3)
        ]
        x9b = jnp.concatenate(taps2, axis=1).astype(bf16)                # (Np2, 9*C1)
        acc2 = jnp.dot(x9b, w2_ref[...], preferred_element_type=f32)     # (Np2, C2)

        m2 = mask2_ref[...]
        am2 = acc2 * m2
        mean2 = jnp.sum(am2, axis=0, keepdims=True) * (1.0 / n2)
        ex2_2 = jnp.sum(am2 * acc2, axis=0, keepdims=True) * (1.0 / n2)
        var2 = jnp.maximum(ex2_2 - mean2 * mean2, 0.0)
        scale2 = g2_ref[...] * jax.lax.rsqrt(var2 + EPS)
        shift2 = be2_ref[...] - mean2 * scale2
        s2_ref[...] = jnp.maximum(acc2 * scale2 + shift2, 0.0)

        # ---- 2x2 max-pool -> lane-dense (B, H2*W2*C2) feature -> fc1 --------
        rm2_ref[...] = jnp.maximum(
            jnp.maximum(s2_ref[pl.ds(0, Nrm2), :], s2_ref[pl.ds(1, Nrm2), :]),
            jnp.maximum(s2_ref[pl.ds(Wq, Nrm2), :], s2_ref[pl.ds(Wq + 1, Nrm2), :]))
        # One batch-strided (B, C2) gather per pooled position, concatenated
        # along lanes in (position-major, channel-minor) order to match wk.
        feat = jnp.concatenate(
            [rm2_ref[pl.ds((2 * io + 1) * Wq + (2 * jo + 1), B, Hq * Wq), :]
             for io in range(H2) for jo in range(W2)],
            axis=1)                                                      # (B, H2*W2*C2)

        h = jnp.maximum(
            jnp.dot(feat, wk_ref[...], preferred_element_type=f32) + b1fc_ref[...],
            0.0)                                                         # (B, HID)
        logit = jnp.sum(h * w2fc_ref[...], axis=-1, keepdims=True) + b2fc_ref[...]
        o_ref[...] = jax.nn.sigmoid(logit)

    flops = (2 * Np1 * (9 * Cin) * C1 + 2 * Np2 * (9 * C1) * C2
             + 2 * B * (H2 * W2 * C2) * HID + 2 * B * HID)
    bytes_accessed = (4 * (xflat.size + mask1.size + mask2.size + wk.size + B)
                      + 2 * (w1.size + w2.size)
                      + 4 * (2 * C1 + 2 * C2 + 2 * HID + 2))

    return pl.pallas_call(
        kernel,
        out_shape=jax.ShapeDtypeStruct((B, 1), jnp.float32),
        in_specs=[pl.BlockSpec(memory_space=pltpu.MemorySpace.VMEM) for _ in range(13)],
        out_specs=pl.BlockSpec(memory_space=pltpu.MemorySpace.VMEM),
        scratch_shapes=[
            pltpu.VMEM((Np1, C1), jnp.float32),              # layer-1 post-BN/ReLU
            pltpu.VMEM((Nrm1, C1), jnp.float32),             # pool1 window-max slab
            pltpu.VMEM((M2 + Np2 + M2, C1), jnp.float32),    # padded conv2 input slab
            pltpu.VMEM((Np2, C2), jnp.float32),              # layer-2 post-BN/ReLU
            pltpu.VMEM((Nrm2, C2), jnp.float32),             # pool2 window-max slab
        ],
        cost_estimate=pl.CostEstimate(flops=flops, transcendentals=C1 + C2 + B,
                                      bytes_accessed=bytes_accessed),
    )(xflat, w1, g1, be1, mask1, w2, g2, be2, mask2, wk, b1fc, w2fc, b2fc)


# ---------------------------------------------------------------------------
# Main
# ---------------------------------------------------------------------------
if __name__ == "__main__":
    key = jax.random.PRNGKey(0)
    B, CIN, H, W = 2, 128, 8, 8            # conv1 requires 128 input channels
    FEAT = 64 * (H // 4) * (W // 4)        # = input_size for fc1 (256)
    HIDDEN = 32

    ks = jax.random.split(key, 12)
    params = {
        "w1": jax.random.normal(ks[0], (64, 128, 3, 3), jnp.float32) * 0.05,
        "b1": jax.random.normal(ks[1], (64,), jnp.float32) * 0.05,   # no-op under BN
        "g1": 1.0 + 0.1 * jax.random.normal(ks[2], (64,), jnp.float32),
        "be1": 0.1 * jax.random.normal(ks[3], (64,), jnp.float32),
        "w2": jax.random.normal(ks[4], (64, 64, 3, 3), jnp.float32) * 0.05,
        "b2": jax.random.normal(ks[5], (64,), jnp.float32) * 0.05,   # no-op under BN
        "g2": 1.0 + 0.1 * jax.random.normal(ks[6], (64,), jnp.float32),
        "be2": 0.1 * jax.random.normal(ks[7], (64,), jnp.float32),
        "fc1_w": jax.random.normal(ks[8], (HIDDEN, FEAT), jnp.float32) * 0.05,
        "fc1_b": jax.random.normal(ks[9], (HIDDEN,), jnp.float32) * 0.05,
        "fc2_w": jax.random.normal(ks[10], (1, HIDDEN), jnp.float32) * 0.05,
        "fc2_b": jax.random.normal(ks[11], (1,), jnp.float32) * 0.05,
    }

    x = jax.random.normal(jax.random.PRNGKey(42), (B, CIN, H, W), jnp.float32)

    out = jax.jit(relation_network_forward)(x, params)
    out = jax.block_until_ready(out)
    assert out.shape == (B, 1), out.shape
    assert bool(jnp.all(jnp.isfinite(out)))
    assert bool(jnp.all((out >= 0.0) & (out <= 1.0)))
    print("KERNEL_OK")
</pallas_src>

<mosaic_0001>
module attributes {stable_mosaic.version = 11 : i64} {
  func.func @kernel(%arg0: memref<232x128xf32, #tpu.memory_space<vmem>>, %arg1: memref<1152x64xbf16, #tpu.memory_space<vmem>>, %arg2: memref<1x64xf32, #tpu.memory_space<vmem>>, %arg3: memref<1x64xf32, #tpu.memory_space<vmem>>, %arg4: memref<200x1xf32, #tpu.memory_space<vmem>>, %arg5: memref<576x64xbf16, #tpu.memory_space<vmem>>, %arg6: memref<1x64xf32, #tpu.memory_space<vmem>>, %arg7: memref<1x64xf32, #tpu.memory_space<vmem>>, %arg8: memref<72x1xf32, #tpu.memory_space<vmem>>, %arg9: memref<256x32xf32, #tpu.memory_space<vmem>>, %arg10: memref<1x32xf32, #tpu.memory_space<vmem>>, %arg11: memref<1x32xf32, #tpu.memory_space<vmem>>, %arg12: memref<1x1xf32, #tpu.memory_space<vmem>>, %arg13: memref<2x1xf32, #tpu.memory_space<vmem>>, %arg14: memref<200x64xf32, #tpu.memory_space<vmem>>, %arg15: memref<189x64xf32, #tpu.memory_space<vmem>>, %arg16: memref<88x64xf32, #tpu.memory_space<vmem>>, %arg17: memref<72x64xf32, #tpu.memory_space<vmem>>, %arg18: memref<65x64xf32, #tpu.memory_space<vmem>>) attributes {dimension_semantics = [], scalar_prefetch = 0 : i64, scratch_operands = 5 : i64, tpu.core_type = #tpu.core_type<tc>} {
    %c5 = arith.constant 5 : index
    %c0 = arith.constant 0 : index
    %0 = vector.load %arg0[%c5, %c0] : memref<232x128xf32, #tpu.memory_space<vmem>>, vector<200x128xf32>
    %1 = arith.truncf %0 : vector<200x128xf32> to vector<200x128xbf16>
    %c6 = arith.constant 6 : index
    %c0_0 = arith.constant 0 : index
    %2 = vector.load %arg0[%c6, %c0_0] : memref<232x128xf32, #tpu.memory_space<vmem>>, vector<200x128xf32>
    %3 = arith.truncf %2 : vector<200x128xf32> to vector<200x128xbf16>
    %c7 = arith.constant 7 : index
    %c0_1 = arith.constant 0 : index
    %4 = vector.load %arg0[%c7, %c0_1] : memref<232x128xf32, #tpu.memory_space<vmem>>, vector<200x128xf32>
    %5 = arith.truncf %4 : vector<200x128xf32> to vector<200x128xbf16>
    %c15 = arith.constant 15 : index
    %c0_2 = arith.constant 0 : index
    %6 = vector.load %arg0[%c15, %c0_2] : memref<232x128xf32, #tpu.memory_space<vmem>>, vector<200x128xf32>
    %7 = arith.truncf %6 : vector<200x128xf32> to vector<200x128xbf16>
    %c16 = arith.constant 16 : index
    %c0_3 = arith.constant 0 : index
    %8 = vector.load %arg0[%c16, %c0_3] : memref<232x128xf32, #tpu.memory_space<vmem>>, vector<200x128xf32>
    %9 = arith.truncf %8 : vector<200x128xf32> to vector<200x128xbf16>
    %c17 = arith.constant 17 : index
    %c0_4 = arith.constant 0 : index
    %10 = vector.load %arg0[%c17, %c0_4] : memref<232x128xf32, #tpu.memory_space<vmem>>, vector<200x128xf32>
    %11 = arith.truncf %10 : vector<200x128xf32> to vector<200x128xbf16>
    %c25 = arith.constant 25 : index
    %c0_5 = arith.constant 0 : index
    %12 = vector.load %arg0[%c25, %c0_5] : memref<232x128xf32, #tpu.memory_space<vmem>>, vector<200x128xf32>
    %13 = arith.truncf %12 : vector<200x128xf32> to vector<200x128xbf16>
    %c26 = arith.constant 26 : index
    %c0_6 = arith.constant 0 : index
    %14 = vector.load %arg0[%c26, %c0_6] : memref<232x128xf32, #tpu.memory_space<vmem>>, vector<200x128xf32>
    %15 = arith.truncf %14 : vector<200x128xf32> to vector<200x128xbf16>
    %c27 = arith.constant 27 : index
    %c0_7 = arith.constant 0 : index
    %16 = vector.load %arg0[%c27, %c0_7] : memref<232x128xf32, #tpu.memory_space<vmem>>, vector<200x128xf32>
    %17 = arith.truncf %16 : vector<200x128xf32> to vector<200x128xbf16>
    %18 = tpu.concatenate %1, %3, %5, %7, %9, %11, %13, %15, %17 in 1 : vector<200x128xbf16>, vector<200x128xbf16>, vector<200x128xbf16>, vector<200x128xbf16>, vector<200x128xbf16>, vector<200x128xbf16>, vector<200x128xbf16>, vector<200x128xbf16>, vector<200x128xbf16> -> vector<200x1152xbf16>
    %c0_8 = arith.constant 0 : index
    %c0_9 = arith.constant 0 : index
    %19 = vector.load %arg1[%c0_8, %c0_9] : memref<1152x64xbf16, #tpu.memory_space<vmem>>, vector<1152x64xbf16>
    %cst = arith.constant dense<0.000000e+00> : vector<200x64xf32>
    %20 = tpu.matmul %18, %19, %cst {dimension_numbers = #tpu.dot_dimension_numbers<[1], [0], [0], [1], [0, 0, 1, 1], [], []>} : vector<200x1152xbf16>, vector<1152x64xbf16>, vector<200x64xf32> -> vector<200x64xf32>
    %c0_10 = arith.constant 0 : index
    %c0_11 = arith.constant 0 : index
    %21 = vector.load %arg4[%c0_10, %c0_11] : memref<200x1xf32, #tpu.memory_space<vmem>>, vector<200x1xf32>
    %22 = vector.broadcast %21 : vector<200x1xf32> to vector<200x64xf32>
    %23 = arith.mulf %20, %22 : vector<200x64xf32>
    %cst_12 = arith.constant dense<0.000000e+00> : vector<64xf32>
    %24 = vector.multi_reduction <add>, %23, %cst_12 [0] : vector<200x64xf32> to vector<64xf32>
    %25 = vector.shape_cast %24 : vector<64xf32> to vector<1x64xf32>
    %cst_13 = arith.constant 7.812500e-03 : f32
    %26 = vector.broadcast %cst_13 : f32 to vector<1x64xf32>
    %27 = arith.mulf %25, %26 : vector<1x64xf32>
    %28 = arith.mulf %23, %20 : vector<200x64xf32>
    %cst_14 = arith.constant dense<0.000000e+00> : vector<64xf32>
    %29 = vector.multi_reduction <add>, %28, %cst_14 [0] : vector<200x64xf32> to vector<64xf32>
    %30 = vector.shape_cast %29 : vector<64xf32> to vector<1x64xf32>
    %cst_15 = arith.constant 7.812500e-03 : f32
    %31 = vector.broadcast %cst_15 : f32 to vector<1x64xf32>
    %32 = arith.mulf %30, %31 : vector<1x64xf32>
    %33 = arith.mulf %27, %27 : vector<1x64xf32>
    %34 = arith.subf %32, %33 : vector<1x64xf32>
    %cst_16 = arith.constant 0.000000e+00 : f32
    %35 = vector.broadcast %cst_16 : f32 to vector<1x64xf32>
    %36 = arith.maximumf %34, %35 : vector<1x64xf32>
    %c0_17 = arith.constant 0 : index
    %c0_18 = arith.constant 0 : index
    %37 = vector.load %arg2[%c0_17, %c0_18] : memref<1x64xf32, #tpu.memory_space<vmem>>, vector<1x64xf32>
    %cst_19 = arith.constant 9.99999974E-6 : f32
    %38 = vector.broadcast %cst_19 : f32 to vector<1x64xf32>
    %39 = arith.addf %36, %38 : vector<1x64xf32>
    %40 = math.rsqrt %39 : vector<1x64xf32>
    %41 = arith.mulf %37, %40 : vector<1x64xf32>
    %c0_20 = arith.constant 0 : index
    %c0_21 = arith.constant 0 : index
    %42 = vector.load %arg3[%c0_20, %c0_21] : memref<1x64xf32, #tpu.memory_space<vmem>>, vector<1x64xf32>
    %43 = arith.mulf %27, %41 : vector<1x64xf32>
    %44 = arith.subf %42, %43 : vector<1x64xf32>
    %45 = vector.broadcast %41 : vector<1x64xf32> to vector<200x64xf32>
    %46 = arith.mulf %20, %45 : vector<200x64xf32>
    %47 = vector.broadcast %44 : vector<1x64xf32> to vector<200x64xf32>
    %48 = arith.addf %46, %47 : vector<200x64xf32>
    %cst_22 = arith.constant 0.000000e+00 : f32
    %49 = vector.broadcast %cst_22 : f32 to vector<200x64xf32>
    %50 = arith.maximumf %48, %49 : vector<200x64xf32>
    %c0_23 = arith.constant 0 : index
    %c0_24 = arith.constant 0 : index
    %51 = vector.load %arg14[%c0_23, %c0_24] : memref<200x64xf32, #tpu.memory_space<vmem>>, vector<200x64xf32>
    tpu.vector_store %arg14[%c0_23, %c0_24], %50 {strides = array<i32>} : memref<200x64xf32, #tpu.memory_space<vmem>>, vector<200x64xf32>,
    %c0_25 = arith.constant 0 : index
    %c0_26 = arith.constant 0 : index
    %52 = vector.load %arg14[%c0_25, %c0_26] : memref<200x64xf32, #tpu.memory_space<vmem>>, vector<189x64xf32>
    %c1 = arith.constant 1 : index
    %c0_27 = arith.constant 0 : index
    %53 = vector.load %arg14[%c1, %c0_27] : memref<200x64xf32, #tpu.memory_space<vmem>>, vector<189x64xf32>
    %54 = arith.maximumf %52, %53 : vector<189x64xf32>
    %c10 = arith.constant 10 : index
    %c0_28 = arith.constant 0 : index
    %55 = vector.load %arg14[%c10, %c0_28] : memref<200x64xf32, #tpu.memory_space<vmem>>, vector<189x64xf32>
    %c11 = arith.constant 11 : index
    %c0_29 = arith.constant 0 : index
    %56 = vector.load %arg14[%c11, %c0_29] : memref<200x64xf32, #tpu.memory_space<vmem>>, vector<189x64xf32>
    %57 = arith.maximumf %55, %56 : vector<189x64xf32>
    %58 = arith.maximumf %54, %57 : vector<189x64xf32>
    %c0_30 = arith.constant 0 : index
    %c0_31 = arith.constant 0 : index
    %59 = vector.load %arg15[%c0_30, %c0_31] : memref<189x64xf32, #tpu.memory_space<vmem>>, vector<189x64xf32>
    tpu.vector_store %arg15[%c0_30, %c0_31], %58 {strides = array<i32>} : memref<189x64xf32, #tpu.memory_space<vmem>>, vector<189x64xf32>,
    %cst_32 = arith.constant 0.000000e+00 : f32
    %60 = vector.broadcast %cst_32 : f32 to vector<88x64xf32>
    %c0_33 = arith.constant 0 : index
    %c0_34 = arith.constant 0 : index
    %61 = vector.load %arg16[%c0_33, %c0_34] : memref<88x64xf32, #tpu.memory_space<vmem>>, vector<88x64xf32>
    tpu.vector_store %arg16[%c0_33, %c0_34], %60 {strides = array<i32>} : memref<88x64xf32, #tpu.memory_space<vmem>>, vector<88x64xf32>,
    %c11_35 = arith.constant 11 : index
    %c0_36 = arith.constant 0 : index
    %62 = tpu.strided_load %arg15[%c11_35, %c0_36] {strides = array<i32: 2, 1>} : memref<189x64xf32, #tpu.memory_space<vmem>>, vector<4x64xf32>
    %c15_37 = arith.constant 15 : index
    %c0_38 = arith.constant 0 : index
    %63 = vector.load %arg16[%c15_37, %c0_38] : memref<88x64xf32, #tpu.memory_space<vmem>>, vector<4x64xf32>
    tpu.vector_store %arg16[%c15_37, %c0_38], %62 {strides = array<i32>} : memref<88x64xf32, #tpu.memory_space<vmem>>, vector<4x64xf32>,
    %c31 = arith.constant 31 : index
    %c0_39 = arith.constant 0 : index
    %64 = tpu.strided_load %arg15[%c31, %c0_39] {strides = array<i32: 2, 1>} : memref<189x64xf32, #tpu.memory_space<vmem>>, vector<4x64xf32>
    %c21 = arith.constant 21 : index
    %c0_40 = arith.constant 0 : index
    %65 = vector.load %arg16[%c21, %c0_40] : memref<88x64xf32, #tpu.memory_space<vmem>>, vector<4x64xf32>
    tpu.vector_store %arg16[%c21, %c0_40], %64 {strides = array<i32>} : memref<88x64xf32, #tpu.memory_space<vmem>>, vector<4x64xf32>,
    %c51 = arith.constant 51 : index
    %c0_41 = arith.constant 0 : index
    %66 = tpu.strided_load %arg15[%c51, %c0_41] {strides = array<i32: 2, 1>} : memref<189x64xf32, #tpu.memory_space<vmem>>, vector<4x64xf32>
    %c27_42 = arith.constant 27 : index
    %c0_43 = arith.constant 0 : index
    %67 = vector.load %arg16[%c27_42, %c0_43] : memref<88x64xf32, #tpu.memory_space<vmem>>, vector<4x64xf32>
    tpu.vector_store %arg16[%c27_42, %c0_43], %66 {strides = array<i32>} : memref<88x64xf32, #tpu.memory_space<vmem>>, vector<4x64xf32>,
    %c71 = arith.constant 71 : index
    %c0_44 = arith.constant 0 : index
    %68 = tpu.strided_load %arg15[%c71, %c0_44] {strides = array<i32: 2, 1>} : memref<189x64xf32, #tpu.memory_space<vmem>>, vector<4x64xf32>
    %c33 = arith.constant 33 : index
    %c0_45 = arith.constant 0 : index
    %69 = vector.load %arg16[%c33, %c0_45] : memref<88x64xf32, #tpu.memory_space<vmem>>, vector<4x64xf32>
    tpu.vector_store %arg16[%c33, %c0_45], %68 {strides = array<i32>} : memref<88x64xf32, #tpu.memory_space<vmem>>, vector<4x64xf32>,
    %c111 = arith.constant 111 : index
    %c0_46 = arith.constant 0 : index
    %70 = tpu.strided_load %arg15[%c111, %c0_46] {strides = array<i32: 2, 1>} : memref<189x64xf32, #tpu.memory_space<vmem>>, vector<4x64xf32>
    %c51_47 = arith.constant 51 : index
    %c0_48 = arith.constant 0 : index
    %71 = vector.load %arg16[%c51_47, %c0_48] : memref<88x64xf32, #tpu.memory_space<vmem>>, vector<4x64xf32>
    tpu.vector_store %arg16[%c51_47, %c0_48], %70 {strides = array<i32>} : memref<88x64xf32, #tpu.memory_space<vmem>>, vector<4x64xf32>,
    %c131 = arith.constant 131 : index
    %c0_49 = arith.constant 0 : index
    %72 = tpu.strided_load %arg15[%c131, %c0_49] {strides = array<i32: 2, 1>} : memref<189x64xf32, #tpu.memory_space<vmem>>, vector<4x64xf32>
    %c57 = arith.constant 57 : index
    %c0_50 = arith.constant 0 : index
    %73 = vector.load %arg16[%c57, %c0_50] : memref<88x64xf32, #tpu.memory_space<vmem>>, vector<4x64xf32>
    tpu.vector_store %arg16[%c57, %c0_50], %72 {strides = array<i32>} : memref<88x64xf32, #tpu.memory_space<vmem>>, vector<4x64xf32>,
    %c151 = arith.constant 151 : index
    %c0_51 = arith.constant 0 : index
    %74 = tpu.strided_load %arg15[%c151, %c0_51] {strides = array<i32: 2, 1>} : memref<189x64xf32, #tpu.memory_space<vmem>>, vector<4x64xf32>
    %c63 = arith.constant 63 : index
    %c0_52 = arith.constant 0 : index
    %75 = vector.load %arg16[%c63, %c0_52] : memref<88x64xf32, #tpu.memory_space<vmem>>, vector<4x64xf32>
    tpu.vector_store %arg16[%c63, %c0_52], %74 {strides = array<i32>} : memref<88x64xf32, #tpu.memory_space<vmem>>, vector<4x64xf32>,
    %c171 = arith.constant 171 : index
    %c0_53 = arith.constant 0 : index
    %76 = tpu.strided_load %arg15[%c171, %c0_53] {strides = array<i32: 2, 1>} : memref<189x64xf32, #tpu.memory_space<vmem>>, vector<4x64xf32>
    %c69 = arith.constant 69 : index
    %c0_54 = arith.constant 0 : index
    %77 = vector.load %arg16[%c69, %c0_54] : memref<88x64xf32, #tpu.memory_space<vmem>>, vector<4x64xf32>
    tpu.vector_store %arg16[%c69, %c0_54], %76 {strides = array<i32>} : memref<88x64xf32, #tpu.memory_space<vmem>>, vector<4x64xf32>,
    %c1_55 = arith.constant 1 : index
    %c0_56 = arith.constant 0 : index
    %78 = vector.load %arg16[%c1_55, %c0_56] : memref<88x64xf32, #tpu.memory_space<vmem>>, vector<72x64xf32>
    %c2 = arith.constant 2 : index
    %c0_57 = arith.constant 0 : index
    %79 = vector.load %arg16[%c2, %c0_57] : memref<88x64xf32, #tpu.memory_space<vmem>>, vector<72x64xf32>
    %c3 = arith.constant 3 : index
    %c0_58 = arith.constant 0 : index
    %80 = vector.load %arg16[%c3, %c0_58] : memref<88x64xf32, #tpu.memory_space<vmem>>, vector<72x64xf32>
    %c7_59 = arith.constant 7 : index
    %c0_60 = arith.constant 0 : index
    %81 = vector.load %arg16[%c7_59, %c0_60] : memref<88x64xf32, #tpu.memory_space<vmem>>, vector<72x64xf32>
    %c8 = arith.constant 8 : index
    %c0_61 = arith.constant 0 : index
    %82 = vector.load %arg16[%c8, %c0_61] : memref<88x64xf32, #tpu.memory_space<vmem>>, vector<72x64xf32>
    %c9 = arith.constant 9 : index
    %c0_62 = arith.constant 0 : index
    %83 = vector.load %arg16[%c9, %c0_62] : memref<88x64xf32, #tpu.memory_space<vmem>>, vector<72x64xf32>
    %c13 = arith.constant 13 : index
    %c0_63 = arith.constant 0 : index
    %84 = vector.load %arg16[%c13, %c0_63] : memref<88x64xf32, #tpu.memory_space<vmem>>, vector<72x64xf32>
    %c14 = arith.constant 14 : index
    %c0_64 = arith.constant 0 : index
    %85 = vector.load %arg16[%c14, %c0_64] : memref<88x64xf32, #tpu.memory_space<vmem>>, vector<72x64xf32>
    %c15_65 = arith.constant 15 : index
    %c0_66 = arith.constant 0 : index
    %86 = vector.load %arg16[%c15_65, %c0_66] : memref<88x64xf32, #tpu.memory_space<vmem>>, vector<72x64xf32>
    %87 = tpu.concatenate %78, %79, %80, %81, %82, %83, %84, %85, %86 in 1 : vector<72x64xf32>, vector<72x64xf32>, vector<72x64xf32>, vector<72x64xf32>, vector<72x64xf32>, vector<72x64xf32>, vector<72x64xf32>, vector<72x64xf32>, vector<72x64xf32> -> vector<72x576xf32>
    %88 = arith.truncf %87 : vector<72x576xf32> to vector<72x576xbf16>
    %c0_67 = arith.constant 0 : index
    %c0_68 = arith.constant 0 : index
    %89 = vector.load %arg5[%c0_67, %c0_68] : memref<576x64xbf16, #tpu.memory_space<vmem>>, vector<576x64xbf16>
    %cst_69 = arith.constant dense<0.000000e+00> : vector<72x64xf32>
    %90 = tpu.matmul %88, %89, %cst_69 {dimension_numbers = #tpu.dot_dimension_numbers<[1], [0], [0], [1], [0, 0, 1, 1], [], []>} : vector<72x576xbf16>, vector<576x64xbf16>, vector<72x64xf32> -> vector<72x64xf32>
    %c0_70 = arith.constant 0 : index
    %c0_71 = arith.constant 0 : index
    %91 = vector.load %arg8[%c0_70, %c0_71] : memref<72x1xf32, #tpu.memory_space<vmem>>, vector<72x1xf32>
    %92 = vector.broadcast %91 : vector<72x1xf32> to vector<72x64xf32>
    %93 = arith.mulf %90, %92 : vector<72x64xf32>
    %cst_72 = arith.constant dense<0.000000e+00> : vector<64xf32>
    %94 = vector.multi_reduction <add>, %93, %cst_72 [0] : vector<72x64xf32> to vector<64xf32>
    %95 = vector.shape_cast %94 : vector<64xf32> to vector<1x64xf32>
    %cst_73 = arith.constant 3.125000e-02 : f32
    %96 = vector.broadcast %cst_73 : f32 to vector<1x64xf32>
    %97 = arith.mulf %95, %96 : vector<1x64xf32>
    %98 = arith.mulf %93, %90 : vector<72x64xf32>
    %cst_74 = arith.constant dense<0.000000e+00> : vector<64xf32>
    %99 = vector.multi_reduction <add>, %98, %cst_74 [0] : vector<72x64xf32> to vector<64xf32>
    %100 = vector.shape_cast %99 : vector<64xf32> to vector<1x64xf32>
    %cst_75 = arith.constant 3.125000e-02 : f32
    %101 = vector.broadcast %cst_75 : f32 to vector<1x64xf32>
    %102 = arith.mulf %100, %101 : vector<1x64xf32>
    %103 = arith.mulf %97, %97 : vector<1x64xf32>
    %104 = arith.subf %102, %103 : vector<1x64xf32>
    %cst_76 = arith.constant 0.000000e+00 : f32
    %105 = vector.broadcast %cst_76 : f32 to vector<1x64xf32>
    %106 = arith.maximumf %104, %105 : vector<1x64xf32>
    %c0_77 = arith.constant 0 : index
    %c0_78 = arith.constant 0 : index
    %107 = vector.load %arg6[%c0_77, %c0_78] : memref<1x64xf32, #tpu.memory_space<vmem>>, vector<1x64xf32>
    %cst_79 = arith.constant 9.99999974E-6 : f32
    %108 = vector.broadcast %cst_79 : f32 to vector<1x64xf32>
    %109 = arith.addf %106, %108 : vector<1x64xf32>
    %110 = math.rsqrt %109 : vector<1x64xf32>
    %111 = arith.mulf %107, %110 : vector<1x64xf32>
    %c0_80 = arith.constant 0 : index
    %c0_81 = arith.constant 0 : index
    %112 = vector.load %arg7[%c0_80, %c0_81] : memref<1x64xf32, #tpu.memory_space<vmem>>, vector<1x64xf32>
    %113 = arith.mulf %97, %111 : vector<1x64xf32>
    %114 = arith.subf %112, %113 : vector<1x64xf32>
    %115 = vector.broadcast %111 : vector<1x64xf32> to vector<72x64xf32>
    %116 = arith.mulf %90, %115 : vector<72x64xf32>
    %117 = vector.broadcast %114 : vector<1x64xf32> to vector<72x64xf32>
    %118 = arith.addf %116, %117 : vector<72x64xf32>
    %cst_82 = arith.constant 0.000000e+00 : f32
    %119 = vector.broadcast %cst_82 : f32 to vector<72x64xf32>
    %120 = arith.maximumf %118, %119 : vector<72x64xf32>
    %c0_83 = arith.constant 0 : index
    %c0_84 = arith.constant 0 : index
    %121 = vector.load %arg17[%c0_83, %c0_84] : memref<72x64xf32, #tpu.memory_space<vmem>>, vector<72x64xf32>
    tpu.vector_store %arg17[%c0_83, %c0_84], %120 {strides = array<i32>} : memref<72x64xf32, #tpu.memory_space<vmem>>, vector<72x64xf32>,
    %c0_85 = arith.constant 0 : index
    %c0_86 = arith.constant 0 : index
    %122 = vector.load %arg17[%c0_85, %c0_86] : memref<72x64xf32, #tpu.memory_space<vmem>>, vector<65x64xf32>
    %c1_87 = arith.constant 1 : index
    %c0_88 = arith.constant 0 : index
    %123 = vector.load %arg17[%c1_87, %c0_88] : memref<72x64xf32, #tpu.memory_space<vmem>>, vector<65x64xf32>
    %124 = arith.maximumf %122, %123 : vector<65x64xf32>
    %c6_89 = arith.constant 6 : index
    %c0_90 = arith.constant 0 : index
    %125 = vector.load %arg17[%c6_89, %c0_90] : memref<72x64xf32, #tpu.memory_space<vmem>>, vector<65x64xf32>
    %c7_91 = arith.constant 7 : index
    %c0_92 = arith.constant 0 : index
    %126 = vector.load %arg17[%c7_91, %c0_92] : memref<72x64xf32, #tpu.memory_space<vmem>>, vector<65x64xf32>
    %127 = arith.maximumf %125, %126 : vector<65x64xf32>
    %128 = arith.maximumf %124, %127 : vector<65x64xf32>
    %c0_93 = arith.constant 0 : index
    %c0_94 = arith.constant 0 : index
    %129 = vector.load %arg18[%c0_93, %c0_94] : memref<65x64xf32, #tpu.memory_space<vmem>>, vector<65x64xf32>
    tpu.vector_store %arg18[%c0_93, %c0_94], %128 {strides = array<i32>} : memref<65x64xf32, #tpu.memory_space<vmem>>, vector<65x64xf32>,
    %c7_95 = arith.constant 7 : index
    %c0_96 = arith.constant 0 : index
    %130 = tpu.strided_load %arg18[%c7_95, %c0_96] {strides = array<i32: 36, 1>} : memref<65x64xf32, #tpu.memory_space<vmem>>, vector<2x64xf32>
    %c9_97 = arith.constant 9 : index
    %c0_98 = arith.constant 0 : index
    %131 = tpu.strided_load %arg18[%c9_97, %c0_98] {strides = array<i32: 36, 1>} : memref<65x64xf32, #tpu.memory_space<vmem>>, vector<2x64xf32>
    %c19 = arith.constant 19 : index
    %c0_99 = arith.constant 0 : index
    %132 = tpu.strided_load %arg18[%c19, %c0_99] {strides = array<i32: 36, 1>} : memref<65x64xf32, #tpu.memory_space<vmem>>, vector<2x64xf32>
    %c21_100 = arith.constant 21 : index
    %c0_101 = arith.constant 0 : index
    %133 = tpu.strided_load %arg18[%c21_100, %c0_101] {strides = array<i32: 36, 1>} : memref<65x64xf32, #tpu.memory_space<vmem>>, vector<2x64xf32>
    %134 = tpu.concatenate %130, %131, %132, %133 in 1 : vector<2x64xf32>, vector<2x64xf32>, vector<2x64xf32>, vector<2x64xf32> -> vector<2x256xf32>
    %c0_102 = arith.constant 0 : index
    %c0_103 = arith.constant 0 : index
    %135 = vector.load %arg9[%c0_102, %c0_103] : memref<256x32xf32, #tpu.memory_space<vmem>>, vector<256x32xf32>
    %cst_104 = arith.constant dense<0.000000e+00> : vector<2x32xf32>
    %136 = tpu.matmul %134, %135, %cst_104 {dimension_numbers = #tpu.dot_dimension_numbers<[1], [0], [0], [1], [0, 0, 1, 1], [], []>} : vector<2x256xf32>, vector<256x32xf32>, vector<2x32xf32> -> vector<2x32xf32>
    %c0_105 = arith.constant 0 : index
    %c0_106 = arith.constant 0 : index
    %137 = vector.load %arg10[%c0_105, %c0_106] : memref<1x32xf32, #tpu.memory_space<vmem>>, vector<1x32xf32>
    %138 = vector.broadcast %137 : vector<1x32xf32> to vector<2x32xf32>
    %139 = arith.addf %136, %138 : vector<2x32xf32>
    %cst_107 = arith.constant 0.000000e+00 : f32
    %140 = vector.broadcast %cst_107 : f32 to vector<2x32xf32>
    %141 = arith.maximumf %139, %140 : vector<2x32xf32>
    %c0_108 = arith.constant 0 : index
    %c0_109 = arith.constant 0 : index
    %142 = vector.load %arg11[%c0_108, %c0_109] : memref<1x32xf32, #tpu.memory_space<vmem>>, vector<1x32xf32>
    %143 = vector.broadcast %142 : vector<1x32xf32> to vector<2x32xf32>
    %144 = arith.mulf %141, %143 : vector<2x32xf32>
    %cst_110 = arith.constant dense<0.000000e+00> : vector<2xf32>
    %145 = vector.multi_reduction <add>, %144, %cst_110 [1] : vector<2x32xf32> to vector<2xf32>
    %146 = vector.shape_cast %145 : vector<2xf32> to vector<2x1xf32>
    %c0_111 = arith.constant 0 : index
    %c0_112 = arith.constant 0 : index
    %147 = vector.load %arg12[%c0_111, %c0_112] : memref<1x1xf32, #tpu.memory_space<vmem>>, vector<1x1xf32>
    %148 = vector.broadcast %147 : vector<1x1xf32> to vector<2x1xf32>
    %149 = arith.addf %146, %148 : vector<2x1xf32>
    %150 = arith.negf %149 : vector<2x1xf32>
    %151 = math.exp %150 : vector<2x1xf32>
    %cst_113 = arith.constant 1.000000e+00 : f32
    %152 = vector.broadcast %cst_113 : f32 to vector<2x1xf32>
    %153 = arith.addf %152, %151 : vector<2x1xf32>
    %154 = arith.divf %152, %153 : vector<2x1xf32>
    %c0_114 = arith.constant 0 : index
    %c0_115 = arith.constant 0 : index
    %155 = vector.load %arg13[%c0_114, %c0_115] : memref<2x1xf32, #tpu.memory_space<vmem>>, vector<2x1xf32>
    tpu.vector_store %arg13[%c0_114, %c0_115], %154 {strides = array<i32>} : memref<2x1xf32, #tpu.memory_space<vmem>>, vector<2x1xf32>,
    return
  }
}

</mosaic_0001>

<bundles_post_ra>
// kernel: relation_network_forward.1
= control target key start
LH: loop header
LB: loop body
LE: loop exit
PB: predicated region body
PF: predicated region fallthrough
CT: control target
= control target key end

     0   :  { %vm4426_vm0 = vmmov 0   ;;  %vm1772_vm1 = vcmask 523264   ;;  %vm2238_vm2 = vcmask 519168   ;;  %vm3437_vm3 = vcmask 254976   ;;  %s6346_s1 = inlined_call_operand.vmem [shape: bf16[1152,64], index: 1, kind: input, shape index: {}]   ;;  %s6347_s0 = inlined_call_operand.vmem [shape: f32[232,128], index: 0, kind: input, shape index: {}]   ;;  %s6348_s4 = inlined_call_operand.vmem [shape: f32[200,1], index: 4, kind: input, shape index: {}]   ;;  %s6349_s5 = inlined_call_operand.vmem [shape: bf16[576,64], index: 5, kind: input, shape index: {}]   ;;  %s6350_s2 = inlined_call_operand.vmem [shape: f32[1,64], index: 2, kind: input, shape index: {}]   ;;  %s6351_s3 = inlined_call_operand.vmem [shape: f32[1,64], index: 3, kind: input, shape index: {}]   ;;  %s6352_s8 = inlined_call_operand.vmem [shape: f32[72,1], index: 8, kind: input, shape index: {}]   ;;  %s6353_s9 = inlined_call_operand.vmem [shape: f32[256,32], index: 9, kind: input, shape index: {}]   ;;  %s6354_s6 = inlined_call_operand.vmem [shape: f32[1,64], index: 6, kind: input, shape index: {}]   ;;  %s6355_s7 = inlined_call_operand.vmem [shape: f32[1,64], index: 7, kind: input, shape index: {}]   ;;  %s6356_s12 = inlined_call_operand.<no memory space> [shape: f32[1,1], index: 12, kind: input, shape index: {}]   ;;  %s6357_s10 = inlined_call_operand.vmem [shape: f32[1,32], index: 10, kind: input, shape index: {}]   ;;  %s6358_s11 = inlined_call_operand.vmem [shape: f32[1,32], index: 11, kind: input, shape index: {}]   ;;  %s6359_s13 = inlined_call_operand.vmem [shape: f32[2,1], index: 13, kind: output, shape index: {}]  }
   0x1   :  { %v4308_v0 = vld [vmem:[%s6346_s1 + $0x78] sm:$0xff]   ;;  %v4312_v4 = vld [vmem:[%s6346_s1 + $0x70] sm:$0xff]   ;;  %v4316_v8 = vld [vmem:[%s6346_s1 + $0x68] sm:$0xff]   ;;  %vm3455_vm4 = vcmask 1024  }
   0x2   :  { %v4309_v1 = vld [vmem:[%s6346_s1 + $0xf8] sm:$0xff]   ;;  %3578 = vmatprep.subr.bf16.mxu0 %v4308_v0  ;;  %v4313_v5 = vld [vmem:[%s6346_s1 + $0xf0] sm:$0xff]   ;;  %v4317_v9 = vld [vmem:[%s6346_s1 + $0xe8] sm:$0xff]  }
   0x3   :  { %v4310_v2 = vld [vmem:[%s6346_s1 + $0x38] sm:$0xff]   ;;  %3672 = vmatprep.subr.bf16.mxu1 %v4309_v1  ;;  %v4314_v6 = vld [vmem:[%s6346_s1 + $0x30] sm:$0xff]   ;;  %v4318_v10 = vld [vmem:[%s6346_s1 + $0x28] sm:$0xff]  }
   0x4   :  { %v4311_v3 = vld [vmem:[%s6346_s1 + $0xb8] sm:$0xff]   ;;  %3579 = vmatpush3.bf16.msra.mxu0 %v4310_v2  ;;  %v4315_v7 = vld [vmem:[%s6346_s1 + $0xb0] sm:$0xff]   ;;  %v4319_v11 = vld [vmem:[%s6346_s1 + $0xa8] sm:$0xff]  }
   0x5   :  { %3673 = vmatpush3.bf16.msra.mxu1 %v4311_v3  ;;  %3580 = vmatprep.subr.bf16.mxu0 %v4312_v4  ;;  %v4320_v12 = vld [vmem:[%s6346_s1 + $0x60] sm:$0xff]   ;;  %v4324_v16 = vld [vmem:[%s6346_s1 + $0x58] sm:$0xff]   ;;  %v4328_v20 = vld [vmem:[%s6346_s1 + $0x50] sm:$0xff]  }
   0x6   :  { %3674 = vmatprep.subr.bf16.mxu1 %v4313_v5  ;;  %v4321_v13 = vld [vmem:[%s6346_s1 + $0xe0] sm:$0xff]   ;;  %v4325_v17 = vld [vmem:[%s6346_s1 + $0xd8] sm:$0xff]   ;;  %v4329_v21 = vld [vmem:[%s6346_s1 + $0xd0] sm:$0xff]  }
   0x7   :  { %v4322_v14 = vld [vmem:[%s6346_s1 + $0x20] sm:$0xff]   ;;  %v4326_v18 = vld [vmem:[%s6346_s1 + $0x18] sm:$0xff]   ;;  %v4330_v22 = vld [vmem:[%s6346_s1 + $0x10] sm:$0xff]  }
   0x8   :  { %3581 = vmatpush3.bf16.msra.mxu0 %v4314_v6  ;;  %v4323_v15 = vld [vmem:[%s6346_s1 + $0xa0] sm:$0xff]   ;;  %v4327_v19 = vld [vmem:[%s6346_s1 + $0x98] sm:$0xff]   ;;  %v4331_v23 = vld [vmem:[%s6346_s1 + $0x90] sm:$0xff]  }
   0x9   :  { %3675 = vmatpush3.bf16.msra.mxu1 %v4315_v7  ;;  %3582 = vmatprep.subr.bf16.mxu0 %v4316_v8  ;;  %v4332_v24 = vld [vmem:[%s6346_s1 + $0x48] sm:$0xff]   ;;  %v4336_v28 = vld [vmem:[%s6346_s1 + $0x40] sm:$0xff]   ;;  %v125_v37 = vld [vmem:[%s6347_s0 + $0x17] sm:$0xff] }
   0xa   :  { %3676 = vmatprep.subr.bf16.mxu1 %v4317_v9  ;;  %v4333_v25 = vld [vmem:[%s6346_s1 + $0xc8] sm:$0xff]   ;;  %v4337_v29 = vld [vmem:[%s6346_s1 + $0xc0] sm:$0xff]   ;;  %v4340_v44 = vld [vmem:[%s6346_s1 + $0x178] sm:$0xff]  }
   0xb   :  { %v4334_v26 = vld [vmem:[%s6346_s1 + $0x8] sm:$0xff]   ;;  %v4338_v30 = vld [vmem:[%s6346_s1] sm:$0xff]   ;;  %v4341_v45 = vld [vmem:[%s6346_s1 + $0x138] sm:$0xff]  }
   0xc   :  { %3583 = vmatpush3.bf16.msra.mxu0 %v4318_v10  ;;  %v4335_v27 = vld [vmem:[%s6346_s1 + $0x88] sm:$0xff]   ;;  %v4339_v31 = vld [vmem:[%s6346_s1 + $0x80] sm:$0xff]   ;;  %v87_v46 = vld [vmem:[%s6347_s0 + $0x16] sm:$0xff] }
   0xd   :  { %3677 = vmatpush3.bf16.msra.mxu1 %v4319_v11  ;;  %3584 = vmatprep.subr.bf16.mxu0 %v4320_v12  ;;  %v85_v32 = vld [vmem:[%s6347_s0 + $0x6] sm:$0xff]  ;;  %v86_v33 = vld [vmem:[%s6347_s0 + $0xe] sm:$0xff]  ;;  %v88_v47 = vld [vmem:[%s6347_s0 + $0x1e] sm:$0xff] }
   0xe   :  { %3678 = vmatprep.subr.bf16.mxu1 %v4321_v13  ;;  %v123_v34 = vld [vmem:[%s6347_s0 + $0x7] sm:$0xff]  ;;  %v110_v35 = vpack.c.bf16 %v86_v33, %v85_v32  ;;  %v124_v36 = vld [vmem:[%s6347_s0 + $0xf] sm:$0xff]  ;;  %v126_v38 = vld [vmem:[%s6347_s0 + $0x1f] sm:$0xff]  ;;  %v111_v50 = vpack.c.bf16 %v88_v47, %v87_v46 }
   0xf   :  { %v148_v39 = vpack.c.bf16 %v124_v36, %v123_v34  ;;  %v162_v40 = vpack.c.bf16 %v125_v37, %v124_v36  ;;  %v47_v41 = vld [vmem:[%s6347_s0 + $0x5] sm:$0xff]  ;;  %v48_v42 = vld [vmem:[%s6347_s0 + $0xd] sm:$0xff]  ;;  %v49_v49 = vld [vmem:[%s6347_s0 + $0x15] sm:$0xff]  ;;  %v149_v57 = vpack.c.bf16 %v126_v38, %v125_v37 }
  0x10   :  { %3585 = vmatpush3.bf16.msra.mxu0 %v4322_v14  ;;  %949 = vmatprep.mubr.bf16.mxu0 %v110_v35  ;;  %v72_v43 = vpack.c.bf16 %v48_v42, %v47_v41  ;;  %v127_v48 = vld [vmem:[%s6347_s0 + $0x27] sm:$0xff]  ;;  %v50_v52 = vld [vmem:[%s6347_s0 + $0x1d] sm:$0xff]  ;;  %v4342_v53 = vld [vmem:[%s6346_s1 + $0x170] sm:$0xff]  }
  0x11   :  { %3679 = vmatpush3.bf16.msra.mxu1 %v4323_v15  ;;  %3586 = vmatprep.subr.bf16.mxu0 %v4324_v16  ;;  %v163_v51 = vpack.c.bf16 %v127_v48, %v126_v38  ;;  %v4343_v54 = vld [vmem:[%s6346_s1 + $0x130] sm:$0xff]   ;;  %v89_v55 = vld [vmem:[%s6347_s0 + $0x26] sm:$0xff]  ;;  %v73_v58 = vpack.c.bf16 %v50_v52, %v49_v49  ;;  %v92_v4 = vld [vmem:[%s6347_s0 + $0x3e] sm:$0xff] }
  0x12   :  { %3680 = vmatprep.subr.bf16.mxu1 %v4325_v17  ;;  %1085 = vmatprep.mubr.bf16.mxu1 %v162_v40  ;;  %v90_v56 = vld [vmem:[%s6347_s0 + $0x2e] sm:$0xff]  ;;  %v129_v60 = vld [vmem:[%s6347_s0 + $0x37] sm:$0xff]  ;;  %v51_v63 = vld [vmem:[%s6347_s0 + $0x25] sm:$0xff] }
  0x13   :  { %v128_v59 = vld [vmem:[%s6347_s0 + $0x2f] sm:$0xff]  ;;  %v112_v61 = vpack.c.bf16 %v90_v56, %v89_v55  ;;  %v130_v5 = vld [vmem:[%s6347_s0 + $0x3f] sm:$0xff]  ;;  %v131_v6 = vld [vmem:[%s6347_s0 + $0x47] sm:$0xff] }
  0x14   :  { %3587 = vmatpush3.bf16.msra.mxu0 %v4326_v18  ;;  %v164_v62 = vpack.c.bf16 %v129_v60, %v128_v59  ;;  %v4344_v0 = vld [vmem:[%s6346_s1 + $0x168] sm:$0xff]   ;;  %v91_v2 = vld [vmem:[%s6347_s0 + $0x36] sm:$0xff]  ;;  %v150_v8 = vpack.c.bf16 %v128_v59, %v127_v48  ;;  %v165_v10 = vpack.c.bf16 %v131_v6, %v130_v5  ;;  %v4346_v11 = vld [vmem:[%s6346_s1 + $0x160] sm:$0xff]  }
  0x15   :  { %3681 = vmatpush3.bf16.msra.mxu1 %v4327_v19  ;;  %3588 = vmatprep.subr.bf16.mxu0 %v4328_v20  ;;  %v52_v1 = vld [vmem:[%s6347_s0 + $0x2d] sm:$0xff]  ;;  %v113_v9 = vpack.c.bf16 %v92_v4, %v91_v2  ;;  %v53_v12 = vld [vmem:[%s6347_s0 + $0x35] sm:$0xff]  ;;  %v54_v13 = vld [vmem:[%s6347_s0 + $0x3d] sm:$0xff] }
  0x16   :  { %3682 = vmatprep.subr.bf16.mxu1 %v4329_v21  ;;  %v4345_v3 = vld [vmem:[%s6346_s1 + $0x128] sm:$0xff]   ;;  %v74_v7 = vpack.c.bf16 %v52_v1, %v51_v63  ;;  %v4347_v14 = vld [vmem:[%s6346_s1 + $0x120] sm:$0xff]   ;;  %v133_v18 = vld [vmem:[%s6347_s0 + $0x57] sm:$0xff]  ;;  %v75_v21 = vpack.c.bf16 %v54_v13, %v53_v12 }
  0x17   :  { %v93_v15 = vld [vmem:[%s6347_s0 + $0x46] sm:$0xff]  ;;  %v94_v16 = vld [vmem:[%s6347_s0 + $0x4e] sm:$0xff]  ;;  %v4348_v19 = vld [vmem:[%s6346_s1 + $0x158] sm:$0xff]  }
  0x18   :  { %3589 = vmatpush3.bf16.msra.mxu0 %v4330_v22  ;;  %v132_v17 = vld [vmem:[%s6347_s0 + $0x4f] sm:$0xff]  ;;  %v4349_v20 = vld [vmem:[%s6346_s1 + $0x118] sm:$0xff]   ;;  %v151_v22 = vpack.c.bf16 %v130_v5, %v129_v60  ;;  %v4735_v32 = vld [vmem:[%s6347_s0 + $0x67] sm:$0xff] }
  0x19   :  { %3683 = vmatpush3.bf16.msra.mxu1 %v4331_v23  ;;  %3590 = vmatprep.subr.bf16.mxu0 %v4332_v24  ;;  %v114_v23 = vpack.c.bf16 %v94_v16, %v93_v15  ;;  %v166_v24 = vpack.c.bf16 %v133_v18, %v132_v17  ;;  %v152_v34 = vpack.c.bf16 %v132_v17, %v131_v6  ;;  %v4352_v35 = vld [vmem:[%s6346_s1 + $0x1f8] sm:$0xff]   ;;  %v4355_v42 = vld [vmem:[%s6346_s1 + $0x1f0] sm:$0xff]   ;;  %v4356_v46 = vld [vmem:[%s6346_s1 + $0x108] sm:$0xff]   ;;  %v4424_v15 = vmov 0.0  }
  0x1a   :  { %3684 = vmatprep.subr.bf16.mxu1 %v4333_v25  ;;  %v55_v25 = vld [vmem:[%s6347_s0 + $0x45] sm:$0xff]  ;;  %v4353_v38 = vld [vmem:[%s6346_s1 + $0x1b8] sm:$0xff]   ;;  %v4357_v48 = vld [vmem:[%s6346_s1 + $0x1b0] sm:$0xff]   ;;  %2225 = vst.msk [vmem:[#allocation4] sm:$0xff] %vm1772_vm1, %v4424_v15 }
  0x1b   :  { %v57_v40 = vld [vmem:[%s6347_s0 + $0x55] sm:$0xff]  ;;  %v58_v41 = vld [vmem:[%s6347_s0 + $0x5d] sm:$0xff]  ;;  %v59_v55 = vld [vmem:[%s6347_s0 + $0x65] sm:$0xff]  ;;  %2226 = vst.msk [vmem:[#allocation4 + $0x8] sm:$0xff] %vm1772_vm1, %v4424_v15 }
  0x1c   :  { %3591 = vmatpush3.bf16.msra.mxu0 %v4334_v26  ;;  %v4350_v26 = vld [vmem:[%s6346_s1 + $0x150] sm:$0xff]   ;;  %v77_v49 = vpack.c.bf16 %v58_v41, %v57_v40  ;;  %v100_v59 = vld [vmem:[%s6347_s0 + $0x7e] sm:$0xff]  ;;  %v4368_v16 = vld [vmem:[%s6346_s1 + $0x1c8] sm:$0xff]   ;;  %2227 = vst.msk [vmem:[#allocation4 + $0x10] sm:$0xff] %vm1772_vm1, %v4424_v15 }
  0x1d   :  { %3685 = vmatpush3.bf16.msra.mxu1 %v4335_v27  ;;  %3592 = vmatprep.subr.bf16.mxu0 %v4336_v28  ;;  %v56_v27 = vld [vmem:[%s6347_s0 + $0x4d] sm:$0xff]  ;;  %v95_v28 = vld [vmem:[%s6347_s0 + $0x56] sm:$0xff]  ;;  %v138_v60 = vld [vmem:[%s6347_s0 + $0x7f] sm:$0xff]  ;;  %2228 = vst.msk [vmem:[#allocation4 + $0x18] sm:$0xff] %vm1772_vm1, %v4424_v15 }
  0x1e   :  { %3686 = vmatprep.subr.bf16.mxu1 %v4337_v29  ;;  %v4351_v29 = vld [vmem:[%s6346_s1 + $0x110] sm:$0xff]   ;;  %v76_v33 = vpack.c.bf16 %v56_v27, %v55_v25  ;;  %v4362_v63 = vld [vmem:[%s6346_s1 + $0x1d8] sm:$0xff]   ;;  %v4365_v5 = vld [vmem:[%s6346_s1 + $0x100] sm:$0xff]   ;;  %2229 = vst.msk [vmem:[#allocation4 + $0x20] sm:$0xff] %vm1772_vm1, %v4424_v15 }
  0x1f   :  { %v4771_v47 = vld [vmem:[%s6347_s0 + $0x77] sm:$0xff]  ;;  %v60_v56 = vld [vmem:[%s6347_s0 + $0x6d] sm:$0xff]  ;;  %v142_v27 = vld [vmem:[%s6347_s0 + $0x9f] sm:$0xff]  ;;  %2230 = vst.msk [vmem:[#allocation4 + $0x28] sm:$0xff] %vm1772_vm1, %v4424_v15 }
  0x20   :  { %3593 = vmatpush3.bf16.msra.mxu0 %v4338_v30  ;;  %v96_v30 = vld [vmem:[%s6347_s0 + $0x5e] sm:$0xff]  ;;  %v78_v1 = vpack.c.bf16 %v60_v56, %v59_v55  ;;  %v140_v12 = vld [vmem:[%s6347_s0 + $0x8f] sm:$0xff]  ;;  %v109_v56 = vld [vmem:[%s6347_s0 + $0xc6] sm:$0xff]  ;;  %2231 = vst.msk [vmem:[#allocation4 + $0x30] sm:$0xff] %vm1772_vm1, %v4424_v15 }
  0x21   :  { %3687 = vmatpush3.bf16.msra.mxu1 %v4339_v31  ;;  %3766 = vmatprep.subr.bf16.mxu0 %v4340_v44  ;;  %v134_v31 = vld [vmem:[%s6347_s0 + $0x5f] sm:$0xff]  ;;  %v115_v36 = vpack.c.bf16 %v96_v30, %v95_v28  ;;  %v98_v44 = vld [vmem:[%s6347_s0 + $0x6e] sm:$0xff]  ;;  %v141_v13 = vld [vmem:[%s6347_s0 + $0x97] sm:$0xff]  ;;  %2232 = vst.msk [vmem:[#allocation4 + $0x38] sm:$0xff] %vm1772_vm1, %v4424_v15 }
  0x22   :  { %v167_v37 = vpack.c.bf16 %v4735_v32, %v134_v31  ;;  %3860 = vmatprep.subr.bf16.mxu1 %v4352_v35  ;;  %v4364_v6 = vld [vmem:[%s6346_s1 + $0x198] sm:$0xff]   ;;  %v143_v28 = vld [vmem:[%s6347_s0 + $0xa7] sm:$0xff]  ;;  %v157_v41 = vpack.c.bf16 %v142_v27, %v141_v13  ;;  %2233 = vst.msk [vmem:[#allocation4 + $0x40] sm:$0xff] %vm1772_vm1, %v4424_v15  ;;  %2234 = vst.msk [vmem:[#allocation4 + $0x48] sm:$0xff] %vm1772_vm1, %v4424_v15 }
  0x23   :  { %950 = vmatmul.mubr.bf16.vlgmr.msra.gmra.mxu0 %v72_v43  ;;  %v97_v43 = vld [vmem:[%s6347_s0 + $0x66] sm:$0xff]  ;;  %v103_v25 = vld [vmem:[%s6347_s0 + $0x96] sm:$0xff]  ;;  %2235 = vst.msk [vmem:[#allocation4 + $0x50] sm:$0xff] %vm1772_vm1, %v4424_v15 }
  0x24   :  { %1086 = vmatmul.mubr.bf16.vlgmr.msra.gmra.mxu1 %v148_v39  ;;  %3767 = vmatpush3.bf16.msra.mxu0 %v4341_v45  ;;  %v4354_v39 = vld [vmem:[%s6346_s1 + $0x148] sm:$0xff]   ;;  %v116_v52 = vpack.c.bf16 %v98_v44, %v97_v43  ;;  %v66_v35 = vld [vmem:[%s6347_s0 + $0x9d] sm:$0xff] }
  0x25   :  { %957 = vmatprep.mubr.bf16.mxu0 %v111_v50  ;;  %1093 = vmatprep.mubr.bf16.mxu1 %v163_v51  ;;  %v136_v45 = vld [vmem:[%s6347_s0 + $0x6f] sm:$0xff]  ;;  %v153_v50 = vpack.c.bf16 %v134_v31, %v133_v18  ;;  %v155_v18 = vpack.c.bf16 %v138_v60, %v4771_v47  ;;  %v67_v44 = vld [vmem:[%s6347_s0 + $0xa5] sm:$0xff]  ;;  %v70_v55 = vld [vmem:[%s6347_s0 + $0xbd] sm:$0xff] }
  0x26   :  { %3768 = vmatprep.subr.bf16.mxu0 %v4342_v53  ;;  %3861 = vmatpush3.bf16.msra.mxu1 %v4353_v38  ;;  %v4358_v51 = vld [vmem:[%s6346_s1 + $0x1e8] sm:$0xff]   ;;  %v168_v53 = vpack.c.bf16 %v4771_v47, %v136_v45  ;;  %v154_v2 = vpack.c.bf16 %v136_v45, %v4735_v32  ;;  %v108_v47 = vld [vmem:[%s6347_s0 + $0xbe] sm:$0xff] }
  0x27   :  { %3862 = vmatprep.subr.bf16.mxu1 %v4355_v42  ;;  %v144_v38 = vld [vmem:[%s6347_s0 + $0xaf] sm:$0xff] }
  0x28   :  { %3769 = vmatpush3.bf16.msra.mxu0 %v4343_v54  ;;  %v4359_v54 = vld [vmem:[%s6346_s1 + $0x1a8] sm:$0xff]  }
  0x29   :  { %3770 = vmatprep.subr.bf16.mxu0 %v4344_v0  ;;  %v4363_v0 = vld [vmem:[%s6346_s1 + $0x140] sm:$0xff]   ;;  %v68_v45 = vld [vmem:[%s6347_s0 + $0xad] sm:$0xff] }
  0x2a   :  { %3863 = vmatpush3.bf16.msra.mxu1 %v4357_v48  ;;  %v146_v48 = vld [vmem:[%s6347_s0 + $0xbf] sm:$0xff] }
  0x2b   :  { %958 = vmatmul.mubr.bf16.gmra.mxu0 %v73_v58  ;;  %3864 = vmatprep.subr.bf16.mxu1 %v4358_v51  ;;  %v99_v58 = vld [vmem:[%s6347_s0 + $0x76] sm:$0xff]  ;;  %v158_v51 = vpack.c.bf16 %v144_v38, %v143_v28 }
  0x2c   :  { %1094 = vmatmul.mubr.bf16.gmra.mxu1 %v149_v57  ;;  %965 = vmatprep.mubr.bf16.mxu0 %v112_v61  ;;  %v4360_v57 = vld [vmem:[%s6346_s1 + $0x1e0] sm:$0xff]  }
  0x2d   :  { %1101 = vmatprep.mubr.bf16.mxu1 %v164_v62  ;;  %3771 = vmatpush3.bf16.msra.mxu0 %v4345_v3  ;;  %v139_v61 = vld [vmem:[%s6347_s0 + $0x87] sm:$0xff]  ;;  %v117_v3 = vpack.c.bf16 %v100_v59, %v99_v58 }
  0x2e   :  { %3772 = vmatprep.subr.bf16.mxu0 %v4346_v11  ;;  %v4361_v62 = vld [vmem:[%s6346_s1 + $0x1a0] sm:$0xff]   ;;  %3865 = vmatpush3.bf16.msra.mxu1 %v4359_v54  ;;  %v169_v4 = vpack.c.bf16 %v139_v61, %v138_v60  ;;  %v102_v11 = vld [vmem:[%s6347_s0 + $0x8e] sm:$0xff]  ;;  %v156_v31 = vpack.c.bf16 %v140_v12, %v139_v61  ;;  %v122_v60 = vpack.c.bf16 %v109_v56, %v109_v56  ;;  %v184_v56 = vld [vmem:[%s6347_s0 + $0x58] sm:$0xff] }
  0x2f   :  { %3866 = vmatprep.subr.bf16.mxu1 %v4360_v57  ;;  %v69_v54 = vld [vmem:[%s6347_s0 + $0xb5] sm:$0xff] }
  0x30   :  { %v161_v57 = vld [vmem:[%s6347_s0 + $0xcf] sm:$0xff]  ;;  %v83_v58 = vpack.c.bf16 %v70_v55, %v69_v54 }
  0x31   :  { %3773 = vmatpush3.bf16.msra.mxu0 %v4347_v14  ;;  %v4367_v14 = vld [vmem:[%s6346_s1 + $0x190] sm:$0xff]   ;;  %v174_v61 = vpack.c.bf16 %v161_v57, %v161_v57  ;;  %v4378_v54 = vld [vmem:[%s6346_s1 + $0x208] sm:$0xff]  }
  0x32   :  { %3774 = vmatprep.subr.bf16.mxu0 %v4348_v19  ;;  %3867 = vmatpush3.bf16.msra.mxu1 %v4361_v62  ;;  %v71_v62 = vld [vmem:[%s6347_s0 + $0xc5] sm:$0xff]  ;;  %v183_v55 = vld [vmem:[%s6347_s0 + $0x50] sm:$0xff] }
  0x33   :  { %966 = vmatmul.mubr.bf16.gmra.mxu0 %v74_v7  ;;  %v61_v7 = vld [vmem:[%s6347_s0 + $0x75] sm:$0xff]  ;;  %3868 = vmatprep.subr.bf16.mxu1 %v4362_v63  ;;  %v223_v57 = vld [vmem:[%s6347_s0 + $0x61] sm:$0xff] }
  0x34   :  { %1102 = vmatmul.mubr.bf16.gmra.mxu1 %v150_v8  ;;  %973 = vmatprep.mubr.bf16.mxu0 %v113_v9  ;;  %v62_v8 = vld [vmem:[%s6347_s0 + $0x7d] sm:$0xff]  ;;  %v4366_v9 = vld [vmem:[%s6346_s1 + $0x1d0] sm:$0xff]  }
  0x35   :  { %1109 = vmatprep.mubr.bf16.mxu1 %v165_v10  ;;  %3775 = vmatpush3.bf16.msra.mxu0 %v4349_v20  ;;  %v101_v10 = vld [vmem:[%s6347_s0 + $0x86] sm:$0xff]  ;;  %v79_v17 = vpack.c.bf16 %v62_v8, %v61_v7  ;;  %v170_v20 = vpack.c.bf16 %v141_v13, %v140_v12  ;;  %v213_v63 = vld [vmem:[%s6347_s0 + $0x11] sm:$0xff] }
  0x36   :  { %3776 = vmatprep.subr.bf16.mxu0 %v4350_v26  ;;  %3869 = vmatpush3.bf16.msra.mxu1 %v4364_v6  ;;  %v118_v19 = vpack.c.bf16 %v102_v11, %v101_v10  ;;  %v104_v26 = vld [vmem:[%s6347_s0 + $0x9e] sm:$0xff]  ;;  %v175_v8 = vld [vmem:[%s6347_s0 + $0x10] sm:$0xff] }
  0x37   :  { %3870 = vmatprep.subr.bf16.mxu1 %v4366_v9  ;;  %v119_v32 = vpack.c.bf16 %v104_v26, %v103_v25  ;;  %v215_v7 = vld [vmem:[%s6347_s0 + $0x21] sm:$0xff]  ;;  %v176_v9 = vld [vmem:[%s6347_s0 + $0x18] sm:$0xff]  ;;  %v216_v10 = vld [vmem:[%s6347_s0 + $0x29] sm:$0xff] }
  0x38   :  { %v267_v11 = vld [vmem:[%s6347_s0 + $0x2a] sm:$0xff]  ;;  %v268_v12 = vld [vmem:[%s6347_s0 + $0x32] sm:$0xff]  ;;  %v270_v25 = vld [vmem:[%s6347_s0 + $0x42] sm:$0xff] }
  0x39   :  { %3777 = vmatpush3.bf16.msra.mxu0 %v4351_v29  ;;  %v4371_v29 = vld [vmem:[%s6346_s1 + $0x180] sm:$0xff]  }
  0x3a   :  { %3778 = vmatprep.subr.bf16.mxu0 %v4354_v39  ;;  %3871 = vmatpush3.bf16.msra.mxu1 %v4367_v14  ;;  %v145_v39 = vld [vmem:[%s6347_s0 + $0xb7] sm:$0xff]  ;;  %v200_v14 = vpack.c.bf16 %v176_v9, %v175_v8 }
  0x3b   :  { %974 = vmatmul.mubr.bf16.gmra.mxu0 %v75_v21  ;;  %v4369_v21 = vld [vmem:[%s6346_s1 + $0x188] sm:$0xff]   ;;  %3872 = vmatprep.subr.bf16.mxu1 %v4368_v16  ;;  %v172_v43 = vpack.c.bf16 %v145_v39, %v144_v38  ;;  %v159_v59 = vpack.c.bf16 %v146_v48, %v145_v39  ;;  %v4372_v16 = vld [vmem:[%s6346_s1 + $0x238] sm:$0xff]  }
  0x3c   :  { %1110 = vmatmul.mubr.bf16.gmra.mxu1 %v151_v22  ;;  %981 = vmatprep.mubr.bf16.mxu0 %v114_v23  ;;  %v4370_v22 = vld [vmem:[%s6346_s1 + $0x1c0] sm:$0xff]  }
  0x3d   :  { %1117 = vmatprep.mubr.bf16.mxu1 %v166_v24  ;;  %3779 = vmatpush3.bf16.msra.mxu0 %v4356_v46  ;;  %v63_v23 = vld [vmem:[%s6347_s0 + $0x85] sm:$0xff]  ;;  %v64_v24 = vld [vmem:[%s6347_s0 + $0x8d] sm:$0xff]  ;;  %v107_v46 = vld [vmem:[%s6347_s0 + $0xb6] sm:$0xff] }
  0x3e   :  { %3780 = vmatprep.subr.bf16.mxu0 %v4363_v0  ;;  %3873 = vmatpush3.bf16.msra.mxu1 %v4369_v21  ;;  %v80_v30 = vpack.c.bf16 %v64_v24, %v63_v23  ;;  %v214_v0 = vld [vmem:[%s6347_s0 + $0x19] sm:$0xff]  ;;  %v217_v21 = vld [vmem:[%s6347_s0 + $0x31] sm:$0xff] }
  0x3f   :  { %3874 = vmatprep.subr.bf16.mxu1 %v4370_v22  ;;  %v252_v13 = vpack.c.bf16 %v215_v7, %v214_v0  ;;  %v4373_v22 = vld [vmem:[%s6346_s1 + $0x230] sm:$0xff]   ;;  %v218_v23 = vld [vmem:[%s6347_s0 + $0x39] sm:$0xff] }
  0x40   :  { %v269_v24 = vld [vmem:[%s6347_s0 + $0x3a] sm:$0xff] }
  0x41   :  { %3781 = vmatpush3.bf16.msra.mxu0 %v4365_v5  ;;  %v238_v5 = vpack.c.bf16 %v214_v0, %v213_v63 }
  0x42   :  { %4111 = vmatprep.subr.bf16.mxu0 %v4424_v15  ;;  %3875 = vmatpush3.bf16.msra.mxu1 %v4371_v29  ;;  %v292_v29 = vpack.c.bf16 %v270_v25, %v269_v24  ;;  %v1598_v25 = vld [vmem:[%s6348_s4 + $0x8] sm:$0xff] }
  0x43   :  { %982 = vmatmul.mubr.bf16.gmra.mxu0 %v76_v33  ;;  %v171_v33 = vpack.c.bf16 %v143_v28, %v142_v27  ;;  %v253_v27 = vpack.c.bf16 %v217_v21, %v216_v10  ;;  %v240_v28 = vpack.c.bf16 %v218_v23, %v217_v21  ;;  %v4425_v21 = vmov 0  }
  0x44   :  { %1118 = vmatmul.mubr.bf16.gmra.mxu1 %v152_v34  ;;  %989 = vmatprep.mubr.bf16.mxu0 %v115_v36  ;;  %v65_v34 = vld [vmem:[%s6347_s0 + $0x95] sm:$0xff]  ;;  %v105_v36 = vld [vmem:[%s6347_s0 + $0xa6] sm:$0xff] }
  0x45   :  { %1125 = vmatprep.mubr.bf16.mxu1 %v167_v37  ;;  %v106_v37 = vld [vmem:[%s6347_s0 + $0xae] sm:$0xff]  ;;  %v81_v40 = vpack.c.bf16 %v66_v35, %v65_v34  ;;  %4211 = vset.pattern.permute.xlu0 %v4425_v21 }
  0x46   :  { %v120_v42 = vpack.c.bf16 %v106_v37, %v105_v36  ;;  %v220_v34 = vld [vmem:[%s6347_s0 + $0x49] sm:$0xff]  ;;  %v272_v36 = vld [vmem:[%s6347_s0 + $0x52] sm:$0xff]  ;;  %v4375_v37 = vld [vmem:[%s6346_s1 + $0x220] sm:$0xff]   ;;  %4212 = vset.pattern.permute.xlu1 %v4425_v21 }
  0x47   :  { %v271_v35 = vld [vmem:[%s6347_s0 + $0x4a] sm:$0xff] }
  0x48   :  { %v237_v21 = vld [vmem:[%s6347_s0 + $0xd1] sm:$0xff] }
  0x4b   :  { %990 = vmatmul.mubr.bf16.gmra.mxu0 %v77_v49  ;;  %v147_v49 = vld [vmem:[%s6347_s0 + $0xc7] sm:$0xff] }
  0x4c   :  { %1126 = vmatmul.mubr.bf16.gmra.mxu1 %v153_v50  ;;  %997 = vmatprep.mubr.bf16.mxu0 %v116_v52  ;;  %v82_v50 = vpack.c.bf16 %v68_v45, %v67_v44  ;;  %v121_v52 = vpack.c.bf16 %v108_v47, %v107_v46  ;;  %v182_v44 = vld [vmem:[%s6347_s0 + $0x48] sm:$0xff]  ;;  %v221_v45 = vld [vmem:[%s6347_s0 + $0x51] sm:$0xff]  ;;  %v222_v46 = vld [vmem:[%s6347_s0 + $0x59] sm:$0xff] }
  0x4d   :  { %1133 = vmatprep.mubr.bf16.mxu1 %v168_v53  ;;  %v173_v53 = vpack.c.bf16 %v147_v49, %v146_v48  ;;  %v273_v47 = vld [vmem:[%s6347_s0 + $0x5a] sm:$0xff]  ;;  %v274_v48 = vld [vmem:[%s6347_s0 + $0x62] sm:$0xff]  ;;  %v256_v63 = vpack.c.bf16 %v223_v57, %v222_v46 }
  0x53   :  { %998 = vmatmul.mubr.bf16.gmra.mxu0 %v78_v1  ;;  %v265_v1 = vld [vmem:[%s6347_s0 + $0x1a] sm:$0xff] }
  0x54   :  { %1134 = vmatmul.mubr.bf16.gmra.mxu1 %v154_v2  ;;  %1005 = vmatprep.mubr.bf16.mxu0 %v117_v3  ;;  %v266_v2 = vld [vmem:[%s6347_s0 + $0x22] sm:$0xff]  ;;  %v84_v3 = vpack.c.bf16 %v71_v62, %v71_v62  ;;  %v204_v62 = vpack.c.bf16 %v184_v56, %v183_v55  ;;  %v233_v56 = vld [vmem:[%s6347_s0 + $0xb1] sm:$0xff] }
  0x55   :  { %1141 = vmatprep.mubr.bf16.mxu1 %v169_v4  ;;  %v160_v4 = vpack.c.bf16 %v147_v49, %v147_v49  ;;  %v290_v6 = vpack.c.bf16 %v266_v2, %v265_v1  ;;  %v4377_v49 = vld [vmem:[%s6346_s1 + $0x210] sm:$0xff]   ;;  %v185_v2 = vld [vmem:[%s6347_s0 + $0x60] sm:$0xff]  ;;  %v194_v55 = vld [vmem:[%s6347_s0 + $0xa8] sm:$0xff] }
  0x5b   :  { %1006 = vmatmul.mubr.bf16.gmra.mxu0 %v79_v17  ;;  %v239_v17 = vpack.c.bf16 %v216_v10, %v215_v7  ;;  %v278_v7 = vld [vmem:[%s6347_s0 + $0x82] sm:$0xff] }
  0x5c   :  { %1142 = vmatmul.mubr.bf16.gmra.mxu1 %v155_v18  ;;  %1013 = vmatprep.mubr.bf16.mxu0 %v118_v19  ;;  %v291_v18 = vpack.c.bf16 %v268_v12, %v267_v11  ;;  %v177_v19 = vld [vmem:[%s6347_s0 + $0x20] sm:$0xff]  ;;  %v187_v12 = vld [vmem:[%s6347_s0 + $0x70] sm:$0xff] }
  0x5d   :  { %1149 = vmatprep.mubr.bf16.mxu1 %v170_v20  ;;  %v178_v20 = vld [vmem:[%s6347_s0 + $0x28] sm:$0xff] }
  0x5e   :  { %v201_v26 = vpack.c.bf16 %v178_v20, %v177_v19 }
  0x63   :  { %1014 = vmatmul.mubr.bf16.gmra.mxu0 %v80_v30  ;;  %v4374_v30 = vld [vmem:[%s6346_s1 + $0x228] sm:$0xff]  }
  0x64   :  { %1150 = vmatmul.mubr.bf16.gmra.mxu1 %v156_v31  ;;  %1021 = vmatprep.mubr.bf16.mxu0 %v119_v32  ;;  %v179_v31 = vld [vmem:[%s6347_s0 + $0x30] sm:$0xff]  ;;  %v180_v32 = vld [vmem:[%s6347_s0 + $0x38] sm:$0xff] }
  0x65   :  { %1157 = vmatprep.mubr.bf16.mxu1 %v171_v33  ;;  %v219_v33 = vld [vmem:[%s6347_s0 + $0x41] sm:$0xff]  ;;  %v202_v38 = vpack.c.bf16 %v180_v32, %v179_v31 }
  0x66   :  { %v254_v39 = vpack.c.bf16 %v219_v33, %v218_v23  ;;  %v282_v31 = vld [vmem:[%s6347_s0 + $0xa2] sm:$0xff] }
  0x6b   :  { %1022 = vmatmul.mubr.bf16.gmra.mxu0 %v81_v40  ;;  %v241_v40 = vpack.c.bf16 %v220_v34, %v219_v33 }
  0x6c   :  { %1158 = vmatmul.mubr.bf16.gmra.mxu1 %v157_v41  ;;  %1029 = vmatprep.mubr.bf16.mxu0 %v120_v42  ;;  %v293_v41 = vpack.c.bf16 %v272_v36, %v271_v35  ;;  %v4376_v42 = vld [vmem:[%s6346_s1 + $0x218] sm:$0xff]   ;;  %v1601_v35 = vld [vmem:[%s6348_s4 + $0x20] sm:$0xff] }
  0x6d   :  { %1165 = vmatprep.mubr.bf16.mxu1 %v172_v43  ;;  %v181_v43 = vld [vmem:[%s6347_s0 + $0x40] sm:$0xff] }
  0x73   :  { %1030 = vmatmul.mubr.bf16.gmra.mxu0 %v82_v50  ;;  %v203_v50 = vpack.c.bf16 %v182_v44, %v181_v43  ;;  %v232_v43 = vld [vmem:[%s6347_s0 + $0xa9] sm:$0xff] }
  0x74   :  { %1166 = vmatmul.mubr.bf16.gmra.mxu1 %v158_v51  ;;  %1037 = vmatprep.mubr.bf16.mxu0 %v121_v52  ;;  %v255_v51 = vpack.c.bf16 %v221_v45, %v220_v34  ;;  %v242_v52 = vpack.c.bf16 %v222_v46, %v221_v45  ;;  %v1599_v34 = vld [vmem:[%s6348_s4 + $0x10] sm:$0xff] }
  0x75   :  { %1173 = vmatprep.mubr.bf16.mxu1 %v173_v53  ;;  %v294_v53 = vpack.c.bf16 %v274_v48, %v273_v47  ;;  %1634 = vperm.xlu1 %4212, %v1599_v34   ;;  %v283_v44 = vld [vmem:[%s6347_s0 + $0xaa] sm:$0xff]  ;;  %v284_v45 = vld [vmem:[%s6347_s0 + $0xb2] sm:$0xff] }
  0x76   :  { %v1602_v48 = vld [vmem:[%s6348_s4 + $0x28] sm:$0xff]  ;;  %v251_v34 = vld [vmem:[%s6347_s0 + $0xd9] sm:$0xff] }
  0x7b   :  { %1038 = vmatmul.mubr.bf16.gmra.mxu0 %v83_v58  ;;  %v224_v58 = vld [vmem:[%s6347_s0 + $0x69] sm:$0xff] }
  0x7c   :  { %1174 = vmatmul.mubr.bf16.gmra.mxu1 %v159_v59  ;;  %1045 = vmatprep.mubr.bf16.mxu0 %v122_v60  ;;  %v275_v59 = vld [vmem:[%s6347_s0 + $0x6a] sm:$0xff]  ;;  %v276_v60 = vld [vmem:[%s6347_s0 + $0x72] sm:$0xff]  ;;  %v243_v0 = vpack.c.bf16 %v224_v58, %v223_v57 }
  0x7d   :  { %1181 = vmatprep.mubr.bf16.mxu1 %v174_v61  ;;  %v4379_v61 = vld [vmem:[%s6346_s1 + $0x200] sm:$0xff]   ;;  %v295_v1 = vpack.c.bf16 %v276_v60, %v275_v59 }
  0x7e   :  { %v234_v57 = vld [vmem:[%s6347_s0 + $0xb9] sm:$0xff]  ;;  %v286_v59 = vld [vmem:[%s6347_s0 + $0xc2] sm:$0xff] }
  0x83   :  { %1046 = vmatmul.mubr.bf16.gmra.mxu0 %v84_v3  ;;  %v186_v3 = vld [vmem:[%s6347_s0 + $0x68] sm:$0xff] }
  0x84   :  { %1182 = vmatmul.mubr.bf16.gmra.mxu1 %v160_v4  ;;  %1221 = vmatprep.mubr.bf16.mxu0 %v238_v5  ;;  %v225_v4 = vld [vmem:[%s6347_s0 + $0x71] sm:$0xff]  ;;  %v226_v5 = vld [vmem:[%s6347_s0 + $0x79] sm:$0xff]  ;;  %v205_v8 = vpack.c.bf16 %v186_v3, %v185_v2 }
  0x85   :  { %1357 = vmatprep.mubr.bf16.mxu1 %v290_v6  ;;  %v277_v6 = vld [vmem:[%s6347_s0 + $0x7a] sm:$0xff]  ;;  %v257_v9 = vpack.c.bf16 %v225_v4, %v224_v58  ;;  %v244_v10 = vpack.c.bf16 %v226_v5, %v225_v4  ;;  %v1611_v3 = vld [vmem:[%s6348_s4 + $0x70] sm:$0xff] }
  0x86   :  { %v296_v11 = vpack.c.bf16 %v278_v7, %v277_v6  ;;  %v285_v58 = vld [vmem:[%s6347_s0 + $0xba] sm:$0xff]  ;;  %v195_v4 = vld [vmem:[%s6347_s0 + $0xb0] sm:$0xff] }
  0x87   :  { %v1608_v2 = vld [vmem:[%s6348_s4 + $0x58] sm:$0xff]  ;;  %v235_v6 = vld [vmem:[%s6347_s0 + $0xc1] sm:$0xff]  ;;  %v236_v7 = vld [vmem:[%s6347_s0 + $0xc9] sm:$0xff] }
  0x8b   :  { %1222 = vmatmul.mubr.bf16.vlgmr.msra.gmra.mxu0 %v200_v14  ;;  %v227_v14 = vld [vmem:[%s6347_s0 + $0x81] sm:$0xff] }
  0x8c   :  { %1358 = vmatmul.mubr.bf16.vlgmr.msra.gmra.mxu1 %v252_v13  ;;  %4112 = vmatpush3.bf16.msra.mxu0 %v4372_v16  ;;  %v188_v13 = vld [vmem:[%s6347_s0 + $0x78] sm:$0xff]  ;;  %v228_v16 = vld [vmem:[%s6347_s0 + $0x89] sm:$0xff]  ;;  %v258_v20 = vpack.c.bf16 %v227_v14, %v226_v5 }
  0x8d   :  { %1229 = vmatprep.mubr.bf16.mxu0 %v239_v17  ;;  %1365 = vmatprep.mubr.bf16.mxu1 %v291_v18  ;;  %v279_v17 = vld [vmem:[%s6347_s0 + $0x8a] sm:$0xff]  ;;  %v280_v18 = vld [vmem:[%s6347_s0 + $0x92] sm:$0xff]  ;;  %v206_v19 = vpack.c.bf16 %v188_v13, %v187_v12  ;;  %v245_v23 = vpack.c.bf16 %v228_v16, %v227_v14  ;;  %v1613_v13 = vld [vmem:[%s6348_s4 + $0x80] sm:$0xff]  ;;  %v249_v14 = vpack.c.bf16 %v236_v7, %v235_v6 }
  0x8e   :  { %4113 = vmatprep.subr.bf16.mxu0 %v4424_v15  ;;  %v297_v24 = vpack.c.bf16 %v280_v18, %v279_v17  ;;  %v196_v5 = vld [vmem:[%s6347_s0 + $0xb8] sm:$0xff]  ;;  %v1610_v12 = vld [vmem:[%s6348_s4 + $0x68] sm:$0xff]  ;;  %v1615_v18 = vld [vmem:[%s6348_s4 + $0x90] sm:$0xff] }
  0x8f   :  { %v1612_v17 = vld [vmem:[%s6348_s4 + $0x78] sm:$0xff] }
  0x90   :  { %4114 = vmatpush3.bf16.msra.mxu0 %v4373_v22  ;;  %v1597_v22 = vld [vmem:[%s6348_s4] sm:$0xff] }
  0x91   :  { %4115 = vmatprep.subr.bf16.mxu0 %v4424_v15  ;;  %1624 = vperm.xlu0 %4211, %v1597_v22   ;;  %v289_v22 = vld [vmem:[%s6347_s0 + $0xda] sm:$0xff] }
  0x93   :  { %1230 = vmatmul.mubr.bf16.gmra.mxu0 %v201_v26  ;;  %v189_v26 = vld [vmem:[%s6347_s0 + $0x80] sm:$0xff] }
  0x94   :  { %1366 = vmatmul.mubr.bf16.gmra.mxu1 %v253_v27  ;;  %1237 = vmatprep.mubr.bf16.mxu0 %v240_v28  ;;  %v190_v27 = vld [vmem:[%s6347_s0 + $0x88] sm:$0xff]  ;;  %v229_v28 = vld [vmem:[%s6347_s0 + $0x91] sm:$0xff] }
  0x95   :  { %1373 = vmatprep.mubr.bf16.mxu1 %v292_v29  ;;  %4116 = vmatpush3.bf16.msra.mxu0 %v4374_v30  ;;  %v230_v29 = vld [vmem:[%s6347_s0 + $0x99] sm:$0xff]  ;;  %v207_v32 = vpack.c.bf16 %v190_v27, %v189_v26  ;;  %v259_v33 = vpack.c.bf16 %v229_v28, %v228_v16  ;;  %v250_v27 = vpack.c.bf16 %v237_v21, %v237_v21 }
  0x96   :  { %4117 = vmatprep.subr.bf16.mxu0 %v4424_v15  ;;  %v281_v30 = vld [vmem:[%s6347_s0 + $0x9a] sm:$0xff]  ;;  %1629 = vperm.xlu0 %4211, %v1598_v25   ;;  %v246_v36 = vpack.c.bf16 %v230_v29, %v229_v28  ;;  %v1614_v25 = vld [vmem:[%s6348_s4 + $0x88] sm:$0xff]  ;;  %v302_v28 = vpack.c.bf16 %v289_v22, %v289_v22 }
  0x97   :  { %v1617_v26 = vld [vmem:[%s6348_s4 + $0xa0] sm:$0xff] }
  0x99   :  { %4118 = vmatpush3.bf16.msra.mxu0 %v4375_v37  ;;  %v298_v37 = vpack.c.bf16 %v282_v31, %v281_v30  ;;  %v1616_v31 = vld [vmem:[%s6348_s4 + $0x98] sm:$0xff] }
  0x9a   :  { %4119 = vmatprep.subr.bf16.mxu0 %v4424_v15  ;;  %1644 = vperm.xlu0 %4211, %v1601_v35  }
  0x9b   :  { %1238 = vmatmul.mubr.bf16.gmra.mxu0 %v202_v38  ;;  %v1600_v38 = vld [vmem:[%s6348_s4 + $0x18] sm:$0xff] }
  0x9c   :  { %1374 = vmatmul.mubr.bf16.gmra.mxu1 %v254_v39  ;;  %1245 = vmatprep.mubr.bf16.mxu0 %v241_v40  ;;  %v1603_v39 = vld [vmem:[%s6348_s4 + $0x30] sm:$0xff] }
  0x9d   :  { %1381 = vmatprep.mubr.bf16.mxu1 %v293_v41  ;;  %4120 = vmatpush3.bf16.msra.mxu0 %v4376_v42  ;;  %v191_v40 = vld [vmem:[%s6347_s0 + $0x90] sm:$0xff]  ;;  %v192_v41 = vld [vmem:[%s6347_s0 + $0x98] sm:$0xff]  ;;  %v231_v42 = vld [vmem:[%s6347_s0 + $0xa1] sm:$0xff] }
  0x9e   :  { %4121 = vmatprep.subr.bf16.mxu0 %v4424_v15  ;;  %1639 = vperm.xlu1 %4212, %v1600_v38   ;;  %v208_v46 = vpack.c.bf16 %v192_v41, %v191_v40  ;;  %v260_v47 = vpack.c.bf16 %v231_v42, %v230_v29 }
  0x9f   :  { %1654 = vperm.xlu0 %4211, %v1603_v39  }
  0xa1   :  { %4122 = vmatpush3.bf16.msra.mxu0 %v4377_v49  ;;  %v1605_v49 = vld [vmem:[%s6348_s4 + $0x40] sm:$0xff] }
  0xa2   :  { %4123 = vmatprep.subr.bf16.mxu0 %v4424_v15  ;;  %1649 = vperm.xlu1 %4212, %v1602_v48  }
  0xa3   :  { %1246 = vmatmul.mubr.bf16.gmra.mxu0 %v203_v50  ;;  %v247_v50 = vpack.c.bf16 %v232_v43, %v231_v42  ;;  %1664 = vperm.xlu0 %4211, %v1605_v49   ;;  %v264_v42 = vpack.c.bf16 %v251_v34, %v251_v34 }
  0xa4   :  { %1382 = vmatmul.mubr.bf16.gmra.mxu1 %v255_v51  ;;  %1253 = vmatprep.mubr.bf16.mxu0 %v242_v52  ;;  %v299_v51 = vpack.c.bf16 %v284_v45, %v283_v44  ;;  %v1604_v52 = vld [vmem:[%s6348_s4 + $0x38] sm:$0xff]  ;;  %v1621_v44 = vld [vmem:[%s6348_s4 + $0xc0] sm:$0xff] }
  0xa5   :  { %1389 = vmatprep.mubr.bf16.mxu1 %v294_v53  ;;  %4124 = vmatpush3.bf16.msra.mxu0 %v4378_v54  ;;  %v1607_v53 = vld [vmem:[%s6348_s4 + $0x50] sm:$0xff]  ;;  %v193_v54 = vld [vmem:[%s6347_s0 + $0xa0] sm:$0xff] }
  0xa6   :  { %4125 = vmatprep.subr.bf16.mxu0 %v4424_v15  ;;  %1659 = vperm.xlu1 %4212, %v1604_v52   ;;  %v209_v60 = vpack.c.bf16 %v194_v55, %v193_v54  ;;  %v1620_v52 = vld [vmem:[%s6348_s4 + $0xb8] sm:$0xff]  ;;  %v304_v55 = vld [vmem:[%s6347_s0 + $0x23] sm:$0xff] }
  0xa7   :  { %1674 = vperm.xlu0 %4211, %v1607_v53   ;;  %v303_v54 = vld [vmem:[%s6347_s0 + $0x1b] sm:$0xff] }
  0xa9   :  { %4126 = vmatpush3.bf16.msra.mxu0 %v4379_v61  ;;  %v261_v61 = vpack.c.bf16 %v233_v56, %v232_v43  ;;  %v1618_v43 = vld [vmem:[%s6348_s4 + $0xa8] sm:$0xff] }
  0xab   :  { %1254 = vmatmul.mubr.bf16.gmra.mxu0 %v204_v62  ;;  %v1606_v62 = vld [vmem:[%s6348_s4 + $0x48] sm:$0xff] }
  0xac   :  { %1390 = vmatmul.mubr.bf16.gmra.mxu1 %v256_v63  ;;  %1261 = vmatprep.mubr.bf16.mxu0 %v243_v0  ;;  %v1609_v63 = vld [vmem:[%s6348_s4 + $0x60] sm:$0xff]  ;;  %v248_v0 = vpack.c.bf16 %v234_v57, %v233_v56 }
  0xad   :  { %1397 = vmatprep.mubr.bf16.mxu1 %v295_v1  ;;  %v300_v1 = vpack.c.bf16 %v286_v59, %v285_v58  ;;  %1669 = vperm.xlu1 %4212, %v1606_v62   ;;  %v328_v62 = vpack.c.bf16 %v304_v55, %v303_v54 }
  0xae   :  { %1684 = vperm.xlu0 %4211, %v1609_v63  }
  0xb1   :  { %1679 = vperm.xlu1 %4212, %v1608_v2  }
  0xb2   :  { %1694 = vperm.xlu0 %4211, %v1611_v3  }
  0xb3   :  { %1262 = vmatmul.mubr.bf16.gmra.mxu0 %v205_v8  ;;  %v287_v8 = vld [vmem:[%s6347_s0 + $0xca] sm:$0xff] }
  0xb4   :  { %1398 = vmatmul.mubr.bf16.gmra.mxu1 %v257_v9  ;;  %1269 = vmatprep.mubr.bf16.mxu0 %v244_v10  ;;  %v288_v9 = vld [vmem:[%s6347_s0 + $0xd2] sm:$0xff]  ;;  %v210_v10 = vpack.c.bf16 %v196_v5, %v195_v4 }
  0xb5   :  { %1405 = vmatprep.mubr.bf16.mxu1 %v296_v11  ;;  %v262_v11 = vpack.c.bf16 %v235_v6, %v234_v57  ;;  %v301_v16 = vpack.c.bf16 %v288_v9, %v287_v8  ;;  %1689 = vperm.xlu1 %4212, %v1610_v12   ;;  %v306_v8 = vld [vmem:[%s6347_s0 + $0x33] sm:$0xff] }
  0xb6   :  { %1704 = vperm.xlu0 %4211, %v1613_v13  }
  0xb9   :  { %1699 = vperm.xlu1 %4212, %v1612_v17  }
  0xba   :  { %1714 = vperm.xlu0 %4211, %v1615_v18  }
  0xbb   :  { %1270 = vmatmul.mubr.bf16.gmra.mxu0 %v206_v19  ;;  %v197_v19 = vld [vmem:[%s6347_s0 + $0xc0] sm:$0xff] }
  0xbc   :  { %1406 = vmatmul.mubr.bf16.gmra.mxu1 %v258_v20  ;;  %1277 = vmatprep.mubr.bf16.mxu0 %v245_v23  ;;  %v198_v20 = vld [vmem:[%s6347_s0 + $0xc8] sm:$0xff] }
  0xbd   :  { %1413 = vmatprep.mubr.bf16.mxu1 %v297_v24  ;;  %v211_v23 = vpack.c.bf16 %v198_v20, %v197_v19  ;;  %v263_v24 = vpack.c.bf16 %v237_v21, %v236_v7  ;;  %1709 = vperm.xlu1 %4212, %v1614_v25   ;;  %v305_v7 = vld [vmem:[%s6347_s0 + $0x2b] sm:$0xff]  ;;  %v307_v25 = vld [vmem:[%s6347_s0 + $0x3b] sm:$0xff] }
  0xbe   :  { %1724 = vperm.xlu0 %4211, %v1617_v26   ;;  %v308_v26 = vld [vmem:[%s6347_s0 + $0x43] sm:$0xff] }
  0xc1   :  { %1719 = vperm.xlu1 %4212, %v1616_v31  }
  0xc3   :  { %1278 = vmatmul.mubr.bf16.gmra.mxu0 %v207_v32  ;;  %v1619_v32 = vld [vmem:[%s6348_s4 + $0xb0] sm:$0xff] }
  0xc4   :  { %1414 = vmatmul.mubr.bf16.gmra.mxu1 %v259_v33  ;;  %1285 = vmatprep.mubr.bf16.mxu0 %v246_v36  ;;  %v199_v33 = vld [vmem:[%s6347_s0 + $0xd0] sm:$0xff] }
  0xc5   :  { %1421 = vmatprep.mubr.bf16.mxu1 %v298_v37  ;;  %1734 = vperm.xlu0 %4211, %v1619_v32   ;;  %v212_v41 = vpack.c.bf16 %v199_v33, %v199_v33  ;;  %v330_v33 = vpack.c.bf16 %v308_v26, %v307_v25 }
  0xc6   :  { %1729 = vperm.xlu1 %4212, %v1618_v43   ;;  %v310_v43 = vld [vmem:[%s6347_s0 + $0x53] sm:$0xff] }
  0xc9   :  { %1744 = vperm.xlu0 %4211, %v1621_v44  }
  0xca   :  { %1739 = vperm.xlu1 %4212, %v1620_v52  }
  0xcb   :  { %1286 = vmatmul.mubr.bf16.gmra.mxu0 %v208_v46 }
  0xcc   :  { %1422 = vmatmul.mubr.bf16.gmra.mxu1 %v260_v47  ;;  %1293 = vmatprep.mubr.bf16.mxu0 %v247_v50 }
  0xcd   :  { %1429 = vmatprep.mubr.bf16.mxu1 %v299_v51 }
  0xd3   :  { %1294 = vmatmul.mubr.bf16.gmra.mxu0 %v209_v60 }
  0xd4   :  { %1430 = vmatmul.mubr.bf16.gmra.mxu1 %v261_v61  ;;  %1301 = vmatprep.mubr.bf16.mxu0 %v248_v0 }
  0xd5   :  { %1437 = vmatprep.mubr.bf16.mxu1 %v300_v1 }
  0xdb   :  { %1302 = vmatmul.mubr.bf16.gmra.mxu0 %v210_v10 }
  0xdc   :  { %1438 = vmatmul.mubr.bf16.gmra.mxu1 %v262_v11  ;;  %1309 = vmatprep.mubr.bf16.mxu0 %v249_v14 }
  0xdd   :  { %1445 = vmatprep.mubr.bf16.mxu1 %v301_v16  ;;  %v329_v16 = vpack.c.bf16 %v306_v8, %v305_v7 }
  0xe3   :  { %v3594_v29 = vpop.f32.mrf.mxu0  ;;  %1310 = vmatmul.mubr.bf16.gmra.mxu0 %v211_v23 }
  0xe4   :  { %v3688_v30 = vpop.f32.mrf.mxu1  ;;  %1446 = vmatmul.mubr.bf16.gmra.mxu1 %v263_v24  ;;  %1317 = vmatprep.mubr.bf16.mxu0 %v250_v27 }
  0xe5   :  { %1453 = vmatprep.mubr.bf16.mxu1 %v302_v28  ;;  %v3595_v35 = vpop.f32.mrf.mxu0 }
  0xe6   :  { %v3689_v36 = vpop.f32.mrf.mxu1  ;;  %v3596_v37 = vadd.f32 %v3595_v35, %v3594_v29 }
  0xe7   :  { %v3690_v38 = vadd.f32 %v3689_v36, %v3688_v30  ;;  %v3597_v39 = vpop.f32.mrf.mxu0 }
  0xe8   :  { %v3691_v40 = vpop.f32.mrf.mxu1 }
  0xe9   :  { %v5258_v45 = vadd.f32 %v3690_v38, %v3596_v37  ;;  %v3598_v46 = vpop.f32.mrf.mxu0 }
  0xea   :  { %v3692_v47 = vpop.f32.mrf.mxu1  ;;  %v3599_v48 = vadd.f32 %v3598_v46, %v3597_v39 }
  0xeb   :  { %v3693_v49 = vadd.f32 %v3692_v47, %v3691_v40  ;;  %v3600_v50 = vpop.f32.mrf.mxu0  ;;  %1318 = vmatmul.mubr.bf16.gmra.mxu0 %v212_v41 }
  0xec   :  { %v3694_v51 = vpop.f32.mrf.mxu1  ;;  %1454 = vmatmul.mubr.bf16.gmra.mxu1 %v264_v42  ;;  %4127 = vmatprep.mubr.msk.bf16.mxu0 %vm4426_vm0, %v4424_v15  ;;  %v309_v42 = vld [vmem:[%s6347_s0 + $0x4b] sm:$0xff] }
  0xed   :  { %v5263_v53 = vadd.f32 %v3693_v49, %v3599_v48  ;;  %v3601_v56 = vpop.f32.mrf.mxu0 }
  0xee   :  { %v3695_v57 = vpop.f32.mrf.mxu1  ;;  %v3602_v58 = vadd.f32 %v3601_v56, %v3600_v50 }
  0xef   :  { %v3696_v59 = vadd.f32 %v3695_v57, %v3694_v51  ;;  %v3603_v60 = vpop.f32.mrf.mxu0  ;;  %v331_v51 = vpack.c.bf16 %v310_v43, %v309_v42 }
  0xf0   :  { %v3697_v61 = vpop.f32.mrf.mxu1 }
  0xf1   :  { %v5273_v63 = vadd.f32 %v3696_v59, %v3602_v58  ;;  %v3604_v0 = vpop.f32.mrf.mxu0 }
  0xf2   :  { %v3698_v1 = vpop.f32.mrf.mxu1  ;;  %v3605_v2 = vadd.f32 %v3604_v0, %v3603_v60 }
  0xf3   :  { %v3699_v3 = vadd.f32 %v3698_v1, %v3697_v61  ;;  %v3606_v4 = vpop.f32.mrf.mxu0  ;;  %4128 = vmatmul.mubr.bf16.vlgmr.msra.gmra.mxu0 %v328_v62  ;;  %v311_v61 = vld [vmem:[%s6347_s0 + $0x5b] sm:$0xff]  ;;  %v312_v62 = vld [vmem:[%s6347_s0 + $0x63] sm:$0xff] }
  0xf4   :  { %v3700_v5 = vpop.f32.mrf.mxu1  ;;  %4131 = vmatprep.mubr.msk.bf16.mxu0 %vm4426_vm0, %v4424_v15  ;;  %v332_v7 = vpack.c.bf16 %v312_v62, %v311_v61 }
  0xf5   :  { %v5275_v6 = vadd.f32 %v3699_v3, %v3605_v2  ;;  %v3607_v9 = vpop.f32.mrf.mxu0 }
  0xf6   :  { %v3701_v10 = vpop.f32.mrf.mxu1  ;;  %v3608_v11 = vadd.f32 %v3607_v9, %v3606_v4 }
  0xf7   :  { %v3702_v12 = vadd.f32 %v3701_v10, %v3700_v5  ;;  %v3609_v13 = vpop.f32.mrf.mxu0 }
  0xf8   :  { %v3703_v14 = vpop.f32.mrf.mxu1 }
  0xf9   :  { %v5285_v17 = vadd.f32 %v3702_v12, %v3608_v11  ;;  %v3610_v18 = vpop.f32.mrf.mxu0 }
  0xfa   :  { %v3704_v19 = vpop.f32.mrf.mxu1  ;;  %v3611_v20 = vadd.f32 %v3610_v18, %v3609_v13  ;;  %v313_v18 = vld [vmem:[%s6347_s0 + $0x6b] sm:$0xff] }
  0xfb   :  { %v3705_v21 = vadd.f32 %v3704_v19, %v3703_v14  ;;  %v3612_v22 = vpop.f32.mrf.mxu0  ;;  %4132 = vmatmul.mubr.bf16.gmra.mxu0 %v329_v16  ;;  %v314_v19 = vld [vmem:[%s6347_s0 + $0x73] sm:$0xff] }
  0xfc   :  { %v3706_v23 = vpop.f32.mrf.mxu1  ;;  %4135 = vmatprep.mubr.msk.bf16.mxu0 %vm4426_vm0, %v4424_v15 }
  0xfd   :  { %v5287_v24 = vadd.f32 %v3705_v21, %v3611_v20  ;;  %v3613_v27 = vpop.f32.mrf.mxu0 }
  0xfe   :  { %v3707_v28 = vpop.f32.mrf.mxu1  ;;  %v3614_v29 = vadd.f32 %v3613_v27, %v3612_v22  ;;  %v333_v27 = vpack.c.bf16 %v314_v19, %v313_v18  ;;  %v319_v18 = vld [vmem:[%s6347_s0 + $0x9b] sm:$0xff]  ;;  %v320_v19 = vld [vmem:[%s6347_s0 + $0xa3] sm:$0xff] }
  0xff   :  { %v3708_v30 = vadd.f32 %v3707_v28, %v3706_v23  ;;  %v3615_v31 = vpop.f32.mrf.mxu0 }
 0x100   :  { %v3709_v32 = vpop.f32.mrf.mxu1 }
 0x101   :  { %v5297_v34 = vadd.f32 %v3708_v30, %v3614_v29  ;;  %v3616_v35 = vpop.f32.mrf.mxu0 }
 0x102   :  { %v3710_v36 = vpop.f32.mrf.mxu1  ;;  %v3617_v37 = vadd.f32 %v3616_v35, %v3615_v31 }
 0x103   :  { %v3711_v38 = vadd.f32 %v3710_v36, %v3709_v32  ;;  %v3618_v39 = vpop.f32.mrf.mxu0  ;;  %4136 = vmatmul.mubr.bf16.gmra.mxu0 %v330_v33 }
 0x104   :  { %v3712_v40 = vpop.f32.mrf.mxu1  ;;  %4139 = vmatprep.mubr.msk.bf16.mxu0 %vm4426_vm0, %v4424_v15 }
 0x105   :  { %v5299_v41 = vadd.f32 %v3711_v38, %v3617_v37  ;;  %v3619_v44 = vpop.f32.mrf.mxu0  ;;  %v315_v37 = vld [vmem:[%s6347_s0 + $0x7b] sm:$0xff]  ;;  %v316_v38 = vld [vmem:[%s6347_s0 + $0x83] sm:$0xff] }
 0x106   :  { %v3713_v46 = vpop.f32.mrf.mxu1  ;;  %v3620_v47 = vadd.f32 %v3619_v44, %v3618_v39 }
 0x107   :  { %v3714_v48 = vadd.f32 %v3713_v46, %v3712_v40  ;;  %v3621_v49 = vpop.f32.mrf.mxu0 }
 0x108   :  { %v3715_v50 = vpop.f32.mrf.mxu1 }
 0x109   :  { %v5309_v52 = vadd.f32 %v3714_v48, %v3620_v47  ;;  %v3622_v54 = vpop.f32.mrf.mxu0  ;;  %v334_v47 = vpack.c.bf16 %v316_v38, %v315_v37 }
 0x10a   :  { %v3716_v55 = vpop.f32.mrf.mxu1  ;;  %v3623_v56 = vadd.f32 %v3622_v54, %v3621_v49 }
 0x10b   :  { %v3717_v57 = vadd.f32 %v3716_v55, %v3715_v50  ;;  %v3624_v58 = vpop.f32.mrf.mxu0  ;;  %4140 = vmatmul.mubr.bf16.gmra.mxu0 %v331_v51 }
 0x10c   :  { %v3718_v59 = vpop.f32.mrf.mxu1  ;;  %4143 = vmatprep.mubr.msk.bf16.mxu0 %vm4426_vm0, %v4424_v15 }
 0x10d   :  { %v5311_v60 = vadd.f32 %v3717_v57, %v3623_v56  ;;  %v3625_v0 = vpop.f32.mrf.mxu0 }
 0x10e   :  { %v3719_v1 = vpop.f32.mrf.mxu1  ;;  %v3626_v2 = vadd.f32 %v3625_v0, %v3624_v58  ;;  %v317_v58 = vld [vmem:[%s6347_s0 + $0x8b] sm:$0xff] }
 0x10f   :  { %v3720_v3 = vadd.f32 %v3719_v1, %v3718_v59  ;;  %v3627_v4 = vpop.f32.mrf.mxu0  ;;  %v318_v59 = vld [vmem:[%s6347_s0 + $0x93] sm:$0xff] }
 0x110   :  { %v3721_v5 = vpop.f32.mrf.mxu1 }
 0x111   :  { %v5321_v8 = vadd.f32 %v3720_v3, %v3626_v2  ;;  %v3628_v9 = vpop.f32.mrf.mxu0 }
 0x112   :  { %v3722_v10 = vpop.f32.mrf.mxu1  ;;  %v3629_v11 = vadd.f32 %v3628_v9, %v3627_v4  ;;  %v335_v4 = vpack.c.bf16 %v318_v59, %v317_v58 }
 0x113   :  { %v3723_v12 = vadd.f32 %v3722_v10, %v3721_v5  ;;  %v3630_v13 = vpop.f32.mrf.mxu0  ;;  %4144 = vmatmul.mubr.bf16.gmra.mxu0 %v332_v7 }
 0x114   :  { %v3724_v14 = vpop.f32.mrf.mxu1  ;;  %4147 = vmatprep.mubr.msk.bf16.mxu0 %vm4426_vm0, %v4424_v15 }
 0x115   :  { %v5323_v16 = vadd.f32 %v3723_v12, %v3629_v11  ;;  %v3631_v20 = vpop.f32.mrf.mxu0 }
 0x116   :  { %v3725_v21 = vpop.f32.mrf.mxu1  ;;  %v3632_v22 = vadd.f32 %v3631_v20, %v3630_v13 }
 0x117   :  { %v3726_v23 = vadd.f32 %v3725_v21, %v3724_v14  ;;  %v3633_v25 = vpop.f32.mrf.mxu0 }
 0x118   :  { %v3727_v26 = vpop.f32.mrf.mxu1 }
 0x119   :  { %v5333_v28 = vadd.f32 %v3726_v23, %v3632_v22  ;;  %v3634_v29 = vpop.f32.mrf.mxu0 }
 0x11a   :  { %v3728_v30 = vpop.f32.mrf.mxu1  ;;  %v3635_v31 = vadd.f32 %v3634_v29, %v3633_v25 }
 0x11b   :  { %v3729_v32 = vadd.f32 %v3728_v30, %v3727_v26  ;;  %v3636_v33 = vpop.f32.mrf.mxu0  ;;  %4148 = vmatmul.mubr.bf16.gmra.mxu0 %v333_v27  ;;  %v336_v27 = vpack.c.bf16 %v320_v19, %v319_v18 }
 0x11c   :  { %v3730_v35 = vpop.f32.mrf.mxu1  ;;  %4151 = vmatprep.mubr.msk.bf16.mxu0 %vm4426_vm0, %v4424_v15 }
 0x11d   :  { %v5335_v36 = vadd.f32 %v3729_v32, %v3635_v31  ;;  %v3637_v39 = vpop.f32.mrf.mxu0 }
 0x11e   :  { %v3731_v40 = vpop.f32.mrf.mxu1  ;;  %v3638_v42 = vadd.f32 %v3637_v39, %v3636_v33  ;;  %v321_v39 = vld [vmem:[%s6347_s0 + $0xab] sm:$0xff] }
 0x11f   :  { %v3732_v43 = vadd.f32 %v3731_v40, %v3730_v35  ;;  %v3639_v44 = vpop.f32.mrf.mxu0  ;;  %v322_v40 = vld [vmem:[%s6347_s0 + $0xb3] sm:$0xff] }
 0x120   :  { %v3733_v46 = vpop.f32.mrf.mxu1 }
 0x121   :  { %v5345_v48 = vadd.f32 %v3732_v43, %v3638_v42  ;;  %v3640_v49 = vpop.f32.mrf.mxu0 }
 0x122   :  { %v3734_v50 = vpop.f32.mrf.mxu1  ;;  %v3641_v51 = vadd.f32 %v3640_v49, %v3639_v44 }
 0x123   :  { %v3735_v54 = vadd.f32 %v3734_v50, %v3733_v46  ;;  %v3642_v55 = vpop.f32.mrf.mxu0  ;;  %4152 = vmatmul.mubr.bf16.gmra.mxu0 %v334_v47  ;;  %v337_v50 = vpack.c.bf16 %v322_v40, %v321_v39 }
 0x124   :  { %v3736_v56 = vpop.f32.mrf.mxu1  ;;  %4155 = vmatprep.mubr.msk.bf16.mxu0 %vm4426_vm0, %v4424_v15 }
 0x125   :  { %v5347_v57 = vadd.f32 %v3735_v54, %v3641_v51  ;;  %v3643_v61 = vpop.f32.mrf.mxu0 }
 0x126   :  { %v3737_v62 = vpop.f32.mrf.mxu1  ;;  %v3644_v0 = vadd.f32 %v3643_v61, %v3642_v55 }
 0x127   :  { %v3738_v1 = vadd.f32 %v3737_v62, %v3736_v56  ;;  %v3645_v2 = vpop.f32.mrf.mxu0 }
 0x128   :  { %v3739_v3 = vpop.f32.mrf.mxu1 }
 0x129   :  { %v5357_v5 = vadd.f32 %v3738_v1, %v3644_v0  ;;  %v3646_v7 = vpop.f32.mrf.mxu0  ;;  %v323_v0 = vld [vmem:[%s6347_s0 + $0xbb] sm:$0xff]  ;;  %v324_v1 = vld [vmem:[%s6347_s0 + $0xc3] sm:$0xff] }
 0x12a   :  { %v3740_v9 = vpop.f32.mrf.mxu1  ;;  %v3647_v10 = vadd.f32 %v3646_v7, %v3645_v2 }
 0x12b   :  { %v3741_v11 = vadd.f32 %v3740_v9, %v3739_v3  ;;  %v3648_v12 = vpop.f32.mrf.mxu0  ;;  %4156 = vmatmul.mubr.bf16.gmra.mxu0 %v335_v4 }
 0x12c   :  { %v3742_v13 = vpop.f32.mrf.mxu1  ;;  %4159 = vmatprep.mubr.msk.bf16.mxu0 %vm4426_vm0, %v4424_v15 }
 0x12d   :  { %v5359_v14 = vadd.f32 %v3741_v11, %v3647_v10  ;;  %v3649_v20 = vpop.f32.mrf.mxu0  ;;  %v338_v11 = vpack.c.bf16 %v324_v1, %v323_v0 }
 0x12e   :  { %v3743_v21 = vpop.f32.mrf.mxu1  ;;  %v3650_v22 = vadd.f32 %v3649_v20, %v3648_v12 }
 0x12f   :  { %v3744_v23 = vadd.f32 %v3743_v21, %v3742_v13  ;;  %v3651_v25 = vpop.f32.mrf.mxu0 }
 0x130   :  { %v3745_v26 = vpop.f32.mrf.mxu1 }
 0x131   :  { %v5369_v29 = vadd.f32 %v3744_v23, %v3650_v22  ;;  %v3652_v30 = vpop.f32.mrf.mxu0 }
 0x132   :  { %v3746_v31 = vpop.f32.mrf.mxu1  ;;  %v3653_v32 = vadd.f32 %v3652_v30, %v3651_v25  ;;  %v325_v25 = vld [vmem:[%s6347_s0 + $0xcb] sm:$0xff] }
 0x133   :  { %v3747_v33 = vadd.f32 %v3746_v31, %v3745_v26  ;;  %v3654_v35 = vpop.f32.mrf.mxu0  ;;  %4160 = vmatmul.mubr.bf16.gmra.mxu0 %v336_v27  ;;  %v326_v26 = vld [vmem:[%s6347_s0 + $0xd3] sm:$0xff] }
 0x134   :  { %v3748_v37 = vpop.f32.mrf.mxu1  ;;  %4163 = vmatprep.mubr.msk.bf16.mxu0 %vm4426_vm0, %v4424_v15 }
 0x135   :  { %v5371_v38 = vadd.f32 %v3747_v33, %v3653_v32  ;;  %v3655_v42 = vpop.f32.mrf.mxu0 }
 0x136   :  { %v3749_v43 = vpop.f32.mrf.mxu1  ;;  %v3656_v44 = vadd.f32 %v3655_v42, %v3654_v35 }
 0x137   :  { %v3750_v46 = vadd.f32 %v3749_v43, %v3748_v37  ;;  %v3657_v47 = vpop.f32.mrf.mxu0  ;;  %v339_v37 = vpack.c.bf16 %v326_v26, %v325_v25 }
 0x138   :  { %v3751_v49 = vpop.f32.mrf.mxu1 }
 0x139   :  { %v5403_v51 = vadd.f32 %v3750_v46, %v3656_v44  ;;  %v3658_v54 = vpop.f32.mrf.mxu0  ;;  %v327_v46 = vld [vmem:[%s6347_s0 + $0xdb] sm:$0xff] }
 0x13a   :  { %v3752_v55 = vpop.f32.mrf.mxu1  ;;  %v3659_v56 = vadd.f32 %v3658_v54, %v3657_v47 }
 0x13b   :  { %v3753_v58 = vadd.f32 %v3752_v55, %v3751_v49  ;;  %v3660_v59 = vpop.f32.mrf.mxu0  ;;  %4164 = vmatmul.mubr.bf16.gmra.mxu0 %v337_v50 }
 0x13c   :  { %v3754_v61 = vpop.f32.mrf.mxu1  ;;  %4167 = vmatprep.mubr.msk.bf16.mxu0 %vm4426_vm0, %v4424_v15 }
 0x13d   :  { %v5405_v62 = vadd.f32 %v3753_v58, %v3659_v56  ;;  %v3661_v2 = vpop.f32.mrf.mxu0  ;;  %v340_v58 = vpack.c.bf16 %v327_v46, %v327_v46 }
 0x13e   :  { %v3755_v3 = vpop.f32.mrf.mxu1  ;;  %v3662_v4 = vadd.f32 %v3661_v2, %v3660_v59 }
 0x13f   :  { %v3756_v7 = vadd.f32 %v3755_v3, %v3754_v61  ;;  %v3663_v9 = vpop.f32.mrf.mxu0 }
 0x140   :  { %v3757_v10 = vpop.f32.mrf.mxu1 }
 0x141   :  { %v5415_v12 = vadd.f32 %v3756_v7, %v3662_v4  ;;  %v3664_v13 = vpop.f32.mrf.mxu0 }
 0x142   :  { %v3758_v18 = vpop.f32.mrf.mxu1  ;;  %v3665_v19 = vadd.f32 %v3664_v13, %v3663_v9 }
 0x143   :  { %v3759_v20 = vadd.f32 %v3758_v18, %v3757_v10  ;;  %v3666_v21 = vpop.f32.mrf.mxu0  ;;  %4168 = vmatmul.mubr.bf16.gmra.mxu0 %v338_v11 }
 0x144   :  { %v3760_v22 = vpop.f32.mrf.mxu1  ;;  %4171 = vmatprep.mubr.msk.bf16.mxu0 %vm4426_vm0, %v4424_v15 }
 0x145   :  { %v5417_v23 = vadd.f32 %v3759_v20, %v3665_v19  ;;  %v3667_v27 = vpop.f32.mrf.mxu0 }
 0x146   :  { %v3761_v30 = vpop.f32.mrf.mxu1  ;;  %v3668_v31 = vadd.f32 %v3667_v27, %v3666_v21 }
 0x147   :  { %v3762_v32 = vadd.f32 %v3761_v30, %v3760_v22  ;;  %v3669_v33 = vpop.f32.mrf.mxu0 }
 0x148   :  { %v3763_v35 = vpop.f32.mrf.mxu1 }
 0x149   :  { %v5427_v39 = vadd.f32 %v3762_v32, %v3668_v31  ;;  %v3670_v40 = vpop.f32.mrf.mxu0 }
 0x14a   :  { %v3764_v42 = vpop.f32.mrf.mxu1 }
 0x14b   :  { %v3782_v43 = vpop.f32.mrf.mxu0  ;;  %4172 = vmatmul.mubr.bf16.gmra.mxu0 %v339_v37 }
 0x14c   :  { %v3876_v44 = vpop.f32.mrf.mxu1  ;;  %4175 = vmatprep.mubr.msk.bf16.mxu0 %vm4426_vm0, %v4424_v15 }
 0x14d   :  { %v3783_v47 = vpop.f32.mrf.mxu0 }
 0x14e   :  { %v3877_v49 = vpop.f32.mrf.mxu1  ;;  %v3784_v50 = vadd.f32 %v3783_v47, %v3782_v43 }
 0x14f   :  { %v3878_v54 = vadd.f32 %v3877_v49, %v3876_v44  ;;  %v3785_v55 = vpop.f32.mrf.mxu0 }
 0x150   :  { %v3879_v56 = vpop.f32.mrf.mxu1  ;;  %v1224_v59 = vadd.f32 %v3784_v50, %v5258_v45 }
 0x151   :  { %v3786_v61 = vpop.f32.mrf.mxu0 }
 0x152   :  { %v3880_v0 = vpop.f32.mrf.mxu1  ;;  %v3787_v1 = vadd.f32 %v3786_v61, %v3785_v55  ;;  %v5435_v3 = vadd.f32 %v3878_v54, %v1224_v59 }
 0x153   :  { %v3881_v2 = vadd.f32 %v3880_v0, %v3879_v56  ;;  %v3788_v4 = vpop.f32.mrf.mxu0  ;;  %4176 = vmatmul.mubr.bf16.gmra.mxu0 %v340_v58 }
 0x154   :  { %v3882_v7 = vpop.f32.mrf.mxu1  ;;  %v1227_v9 = vadd.f32 %v3787_v1, %v5263_v53 }
 0x155   :  { %v3789_v10 = vpop.f32.mrf.mxu0 }
 0x156   :  { %v3883_v11 = vpop.f32.mrf.mxu1  ;;  %v3790_v13 = vadd.f32 %v3789_v10, %v3788_v4  ;;  %v5438_v19 = vadd.f32 %v3881_v2, %v1227_v9 }
 0x157   :  { %v3884_v18 = vadd.f32 %v3883_v11, %v3882_v7  ;;  %v3791_v20 = vpop.f32.mrf.mxu0 }
 0x158   :  { %v3885_v21 = vpop.f32.mrf.mxu1  ;;  %v1232_v45 = vadd.f32 %v3790_v13, %v5273_v63 }
 0x159   :  { %v3792_v22 = vpop.f32.mrf.mxu0 }
 0x15a   :  { %v3886_v25 = vpop.f32.mrf.mxu1  ;;  %v3793_v26 = vadd.f32 %v3792_v22, %v3791_v20  ;;  %v5441_v30 = vadd.f32 %v3884_v18, %v1232_v45 }
 0x15b   :  { %v3887_v27 = vadd.f32 %v3886_v25, %v3885_v21  ;;  %v3794_v31 = vpop.f32.mrf.mxu0 }
 0x15c   :  { %v3888_v32 = vpop.f32.mrf.mxu1  ;;  %v1235_v53 = vadd.f32 %v3793_v26, %v5275_v6 }
 0x15d   :  { %v3795_v33 = vpop.f32.mrf.mxu0 }
 0x15e   :  { %v3889_v35 = vpop.f32.mrf.mxu1  ;;  %v3796_v37 = vadd.f32 %v3795_v33, %v3794_v31  ;;  %v5444_v42 = vadd.f32 %v3887_v27, %v1235_v53 }
 0x15f   :  { %v3890_v40 = vadd.f32 %v3889_v35, %v3888_v32  ;;  %v3797_v43 = vpop.f32.mrf.mxu0 }
 0x160   :  { %v3891_v44 = vpop.f32.mrf.mxu1  ;;  %v1240_v63 = vadd.f32 %v3796_v37, %v5285_v17 }
 0x161   :  { %v3798_v46 = vpop.f32.mrf.mxu0 }
 0x162   :  { %v3892_v47 = vpop.f32.mrf.mxu1  ;;  %v3799_v49 = vadd.f32 %v3798_v46, %v3797_v43  ;;  %v5447_v54 = vadd.f32 %v3890_v40, %v1240_v63 }
 0x163   :  { %v3893_v50 = vadd.f32 %v3892_v47, %v3891_v44  ;;  %v3800_v55 = vpop.f32.mrf.mxu0 }
 0x164   :  { %v3894_v56 = vpop.f32.mrf.mxu1  ;;  %v1243_v6 = vadd.f32 %v3799_v49, %v5287_v24 }
 0x165   :  { %v3801_v58 = vpop.f32.mrf.mxu0 }
 0x166   :  { %v3895_v59 = vpop.f32.mrf.mxu1  ;;  %v3802_v61 = vadd.f32 %v3801_v58, %v3800_v55  ;;  %v5450_v1 = vadd.f32 %v3893_v50, %v1243_v6 }
 0x167   :  { %v3896_v0 = vadd.f32 %v3895_v59, %v3894_v56  ;;  %v3803_v2 = vpop.f32.mrf.mxu0 }
 0x168   :  { %v3897_v4 = vpop.f32.mrf.mxu1  ;;  %v1248_v17 = vadd.f32 %v3802_v61, %v5297_v34 }
 0x169   :  { %v3804_v7 = vpop.f32.mrf.mxu0 }
 0x16a   :  { %v3898_v9 = vpop.f32.mrf.mxu1  ;;  %v3805_v10 = vadd.f32 %v3804_v7, %v3803_v2  ;;  %v5453_v13 = vadd.f32 %v3896_v0, %v1248_v17 }
 0x16b   :  { %v3899_v11 = vadd.f32 %v3898_v9, %v3897_v4  ;;  %v3806_v18 = vpop.f32.mrf.mxu0 }
 0x16c   :  { %v3900_v20 = vpop.f32.mrf.mxu1  ;;  %v1251_v24 = vadd.f32 %v3805_v10, %v5299_v41 }
 0x16d   :  { %v3807_v21 = vpop.f32.mrf.mxu0 }
 0x16e   :  { %v3901_v45 = vpop.f32.mrf.mxu1  ;;  %v3808_v22 = vadd.f32 %v3807_v21, %v3806_v18  ;;  %v5456_v26 = vadd.f32 %v3899_v11, %v1251_v24 }
 0x16f   :  { %v3902_v25 = vadd.f32 %v3901_v45, %v3900_v20  ;;  %v3809_v27 = vpop.f32.mrf.mxu0 }
 0x170   :  { %v3903_v31 = vpop.f32.mrf.mxu1  ;;  %v1256_v34 = vadd.f32 %v3808_v22, %v5309_v52 }
 0x171   :  { %v3810_v32 = vpop.f32.mrf.mxu0 }
 0x172   :  { %v3904_v53 = vpop.f32.mrf.mxu1  ;;  %v3811_v33 = vadd.f32 %v3810_v32, %v3809_v27  ;;  %v5459_v37 = vadd.f32 %v3902_v25, %v1256_v34 }
 0x173   :  { %v3905_v35 = vadd.f32 %v3904_v53, %v3903_v31  ;;  %v3812_v40 = vpop.f32.mrf.mxu0 }
 0x174   :  { %v3906_v43 = vpop.f32.mrf.mxu1  ;;  %v1259_v41 = vadd.f32 %v3811_v33, %v5311_v60 }
 0x175   :  { %v3813_v44 = vpop.f32.mrf.mxu0 }
 0x176   :  { %v3907_v63 = vpop.f32.mrf.mxu1  ;;  %v3814_v46 = vadd.f32 %v3813_v44, %v3812_v40  ;;  %v5462_v49 = vadd.f32 %v3905_v35, %v1259_v41 }
 0x177   :  { %v3908_v47 = vadd.f32 %v3907_v63, %v3906_v43  ;;  %v3815_v50 = vpop.f32.mrf.mxu0 }
 0x178   :  { %v3909_v55 = vpop.f32.mrf.mxu1  ;;  %v1264_v52 = vadd.f32 %v3814_v46, %v5321_v8 }
 0x179   :  { %v3816_v56 = vpop.f32.mrf.mxu0 }
 0x17a   :  { %v3910_v6 = vpop.f32.mrf.mxu1  ;;  %v3817_v58 = vadd.f32 %v3816_v56, %v3815_v50  ;;  %v5465_v61 = vadd.f32 %v3908_v47, %v1264_v52 }
 0x17b   :  { %v3911_v59 = vadd.f32 %v3910_v6, %v3909_v55  ;;  %v3818_v0 = vpop.f32.mrf.mxu0 }
 0x17c   :  { %v3912_v2 = vpop.f32.mrf.mxu1  ;;  %v1267_v60 = vadd.f32 %v3817_v58, %v5323_v16 }
 0x17d   :  { %v3819_v4 = vpop.f32.mrf.mxu0 }
 0x17e   :  { %v3913_v17 = vpop.f32.mrf.mxu1  ;;  %v3820_v7 = vadd.f32 %v3819_v4, %v3818_v0  ;;  %v5468_v10 = vadd.f32 %v3911_v59, %v1267_v60 }
 0x17f   :  { %v3914_v9 = vadd.f32 %v3913_v17, %v3912_v2  ;;  %v3821_v11 = vpop.f32.mrf.mxu0 }
 0x180   :  { %v3915_v18 = vpop.f32.mrf.mxu1  ;;  %v1272_v8 = vadd.f32 %v3820_v7, %v5333_v28 }
 0x181   :  { %v3822_v20 = vpop.f32.mrf.mxu0 }
 0x182   :  { %v3916_v24 = vpop.f32.mrf.mxu1  ;;  %v3823_v21 = vadd.f32 %v3822_v20, %v3821_v11  ;;  %v5471_v22 = vadd.f32 %v3914_v9, %v1272_v8 }
 0x183   :  { %v3917_v45 = vadd.f32 %v3916_v24, %v3915_v18  ;;  %v3824_v25 = vpop.f32.mrf.mxu0 }
 0x184   :  { %v3918_v27 = vpop.f32.mrf.mxu1  ;;  %v1275_v16 = vadd.f32 %v3823_v21, %v5335_v36 }
 0x185   :  { %v3825_v31 = vpop.f32.mrf.mxu0 }
 0x186   :  { %v3919_v34 = vpop.f32.mrf.mxu1  ;;  %v3826_v32 = vadd.f32 %v3825_v31, %v3824_v25  ;;  %v5474_v33 = vadd.f32 %v3917_v45, %v1275_v16 }
 0x187   :  { %v3920_v53 = vadd.f32 %v3919_v34, %v3918_v27  ;;  %v3827_v35 = vpop.f32.mrf.mxu0 }
 0x188   :  { %v3921_v40 = vpop.f32.mrf.mxu1  ;;  %v1280_v28 = vadd.f32 %v3826_v32, %v5345_v48 }
 0x189   :  { %v3828_v43 = vpop.f32.mrf.mxu0 }
 0x18a   :  { %v3922_v41 = vpop.f32.mrf.mxu1  ;;  %v3829_v44 = vadd.f32 %v3828_v43, %v3827_v35  ;;  %v5477_v46 = vadd.f32 %v3920_v53, %v1280_v28 }
 0x18b   :  { %v3923_v63 = vadd.f32 %v3922_v41, %v3921_v40  ;;  %v3830_v47 = vpop.f32.mrf.mxu0 }
 0x18c   :  { %v3924_v50 = vpop.f32.mrf.mxu1  ;;  %v1283_v36 = vadd.f32 %v3829_v44, %v5347_v57 }
 0x18d   :  { %v3831_v55 = vpop.f32.mrf.mxu0 }
 0x18e   :  { %v3925_v52 = vpop.f32.mrf.mxu1  ;;  %v3832_v56 = vadd.f32 %v3831_v55, %v3830_v47  ;;  %v5480_v58 = vadd.f32 %v3923_v63, %v1283_v36 }
 0x18f   :  { %v3926_v6 = vadd.f32 %v3925_v52, %v3924_v50  ;;  %v3833_v59 = vpop.f32.mrf.mxu0 }
 0x190   :  { %v3927_v0 = vpop.f32.mrf.mxu1  ;;  %v1288_v48 = vadd.f32 %v3832_v56, %v5357_v5 }
 0x191   :  { %v3834_v2 = vpop.f32.mrf.mxu0 }
 0x192   :  { %v3928_v60 = vpop.f32.mrf.mxu1  ;;  %v3835_v4 = vadd.f32 %v3834_v2, %v3833_v59  ;;  %v5483_v7 = vadd.f32 %v3926_v6, %v1288_v48 }
 0x193   :  { %v3929_v17 = vadd.f32 %v3928_v60, %v3927_v0  ;;  %v3836_v9 = vpop.f32.mrf.mxu0 }
 0x194   :  { %v3930_v11 = vpop.f32.mrf.mxu1  ;;  %v1291_v57 = vadd.f32 %v3835_v4, %v5359_v14 }
 0x195   :  { %v3837_v18 = vpop.f32.mrf.mxu0 }
 0x196   :  { %v3931_v8 = vpop.f32.mrf.mxu1  ;;  %v3838_v20 = vadd.f32 %v3837_v18, %v3836_v9  ;;  %v5486_v21 = vadd.f32 %v3929_v17, %v1291_v57 }
 0x197   :  { %v3932_v24 = vadd.f32 %v3931_v8, %v3930_v11  ;;  %v3839_v45 = vpop.f32.mrf.mxu0 }
 0x198   :  { %v3933_v25 = vpop.f32.mrf.mxu1  ;;  %v1296_v5 = vadd.f32 %v3838_v20, %v5369_v29 }
 0x199   :  { %v3840_v27 = vpop.f32.mrf.mxu0 }
 0x19a   :  { %v3934_v16 = vpop.f32.mrf.mxu1  ;;  %v3841_v31 = vadd.f32 %v3840_v27, %v3839_v45  ;;  %v5489_v32 = vadd.f32 %v3932_v24, %v1296_v5 }
 0x19b   :  { %v3935_v34 = vadd.f32 %v3934_v16, %v3933_v25  ;;  %v3842_v53 = vpop.f32.mrf.mxu0 }
 0x19c   :  { %v3936_v35 = vpop.f32.mrf.mxu1  ;;  %v1299_v14 = vadd.f32 %v3841_v31, %v5371_v38 }
 0x19d   :  { %v3843_v40 = vpop.f32.mrf.mxu0 }
 0x19e   :  { %v3937_v28 = vpop.f32.mrf.mxu1  ;;  %v3844_v43 = vadd.f32 %v3843_v40, %v3842_v53  ;;  %v5492_v44 = vadd.f32 %v3935_v34, %v1299_v14 }
 0x19f   :  { %v3938_v41 = vadd.f32 %v3937_v28, %v3936_v35  ;;  %v3845_v63 = vpop.f32.mrf.mxu0 }
 0x1a0   :  { %v3939_v47 = vpop.f32.mrf.mxu1  ;;  %v1304_v29 = vadd.f32 %v3844_v43, %v5403_v51 }
 0x1a1   :  { %v3846_v50 = vpop.f32.mrf.mxu0 }
 0x1a2   :  { %v3940_v36 = vpop.f32.mrf.mxu1  ;;  %v3847_v55 = vadd.f32 %v3846_v50, %v3845_v63  ;;  %v5495_v56 = vadd.f32 %v3938_v41, %v1304_v29 }
 0x1a3   :  { %v3941_v52 = vadd.f32 %v3940_v36, %v3939_v47  ;;  %v3848_v6 = vpop.f32.mrf.mxu0 }
 0x1a4   :  { %v3942_v59 = vpop.f32.mrf.mxu1  ;;  %v1307_v38 = vadd.f32 %v3847_v55, %v5405_v62 }
 0x1a5   :  { %v3849_v0 = vpop.f32.mrf.mxu0 }
 0x1a6   :  { %v3943_v48 = vpop.f32.mrf.mxu1  ;;  %v3850_v2 = vadd.f32 %v3849_v0, %v3848_v6  ;;  %v5498_v4 = vadd.f32 %v3941_v52, %v1307_v38  ;;  %v1625_v6 = vpop.permute.xlu0 %1624 }
 0x1a7   :  { %v3944_v60 = vadd.f32 %v3943_v48, %v3942_v59  ;;  %v3851_v17 = vpop.f32.mrf.mxu0  ;;  %v1635_v0 = vpop.permute.xlu1 %1634 }
 0x1a8   :  { %v3945_v9 = vpop.f32.mrf.mxu1  ;;  %v1312_v51 = vadd.f32 %v3850_v2, %v5415_v12 }
 0x1a9   :  { %v3852_v11 = vpop.f32.mrf.mxu0 }
 0x1aa   :  { %v3946_v57 = vpop.f32.mrf.mxu1  ;;  %v3853_v18 = vadd.f32 %v3852_v11, %v3851_v17  ;;  %v5501_v20 = vadd.f32 %v3944_v60, %v1312_v51  ;;  %v1630_v48 = vpop.permute.xlu0 %1629 }
 0x1ab   :  { %v3947_v8 = vadd.f32 %v3946_v57, %v3945_v9  ;;  %v3854_v24 = vpop.f32.mrf.mxu0  ;;  %v1640_v17 = vpop.permute.xlu1 %1639 }
 0x1ac   :  { %v3948_v45 = vpop.f32.mrf.mxu1  ;;  %v1315_v62 = vadd.f32 %v3853_v18, %v5417_v23 }
 0x1ad   :  { %v3855_v25 = vpop.f32.mrf.mxu0 }
 0x1ae   :  { %v3949_v5 = vpop.f32.mrf.mxu1  ;;  %v3856_v27 = vadd.f32 %v3855_v25, %v3854_v24  ;;  %v5504_v31 = vadd.f32 %v3947_v8, %v1315_v62  ;;  %v1645_v51 = vpop.permute.xlu0 %1644 }
 0x1af   :  { %v3950_v16 = vadd.f32 %v3949_v5, %v3948_v45  ;;  %v3857_v34 = vpop.f32.mrf.mxu0  ;;  %v1650_v18 = vpop.permute.xlu1 %1649 }
 0x1b0   :  { %v3951_v53 = vpop.f32.mrf.mxu1  ;;  %v1320_v12 = vadd.f32 %v3856_v27, %v5427_v39 }
 0x1b1   :  { %v3858_v35 = vpop.f32.mrf.mxu0 }
 0x1b2   :  { %v3952_v14 = vpop.f32.mrf.mxu1  ;;  %v5507_v40 = vadd.f32 %v3950_v16, %v1320_v12  ;;  %v1655_v24 = vpop.permute.xlu0 %1654 }
 0x1b3   :  { %v1495_v28 = vpop.f32.mrf.mxu0  ;;  %v1660_v16 = vpop.permute.xlu1 %1659 }
 0x1b4   :  { %v5513_v25 = vadd.f32 %v1495_v28, %v5435_v3 }
 0x1b5   :  { %v4129_v43 = vpop.f32.mrf.mxu0 }
 0x1b6   :  { %v1747_v35 = vmul.f32 %v1625_v6, %v5513_v25 }
 0x1b7   :  { %v1498_v41 = vpop.f32.mrf.mxu0 }
 0x1b8   :  { %v5510_v62 = vadd.f32 %v1498_v41, %v5438_v19  ;;  %v1665_v19 = vpop.permute.xlu0 %1664 }
 0x1b9   :  { %v4130_v63 = vpop.f32.mrf.mxu0 }
 0x1ba   :  { %v1748_v53 = vmul.f32 %v1630_v48, %v5510_v62 }
 0x1bb   :  { %v1503_v47 = vpop.f32.mrf.mxu0 }
 0x1bc   :  { %v5516_v27 = vadd.f32 %v1503_v47, %v5441_v30  ;;  %v1830_v30 = vmul.f32 %v1748_v53, %v5510_v62  ;;  %v1675_v6 = vpop.permute.xlu0 %1674 }
 0x1bd   :  { %v4133_v23 = vpop.f32.mrf.mxu0 }
 0x1be   :  { %v1749_v3 = vmul.f32 %v1635_v0, %v5516_v27  ;;  %v1670_v23 = vpop.permute.xlu1 %1669 }
 0x1bf   :  { %v1506_v29 = vpop.f32.mrf.mxu0 }
 0x1c0   :  { %v5520_v12 = vadd.f32 %v1506_v29, %v5444_v42  ;;  %v1829_v42 = vmul.f32 %v1747_v35, %v5513_v25  ;;  %v1776_v0 = vsel %vm1772_vm1, %v1749_v3, 0.0 }
 0x1c1   :  { %v4134_v50 = vpop.f32.mrf.mxu0 }
 0x1c2   :  { %v1750_v41 = vmul.f32 %v1640_v17, %v5520_v12  ;;  %v1831_v50 = vmul.f32 %v1749_v3, %v5516_v27 }
 0x1c3   :  { %v1511_v36 = vpop.f32.mrf.mxu0 }
 0x1c4   :  { %v5524_v14 = vadd.f32 %v1511_v36, %v5447_v54  ;;  %v1774_v54 = vsel %vm1772_vm1, %v1748_v53, 0.0 }
 0x1c5   :  { %v4137_v55 = vpop.f32.mrf.mxu0 }
 0x1c6   :  { %v1751_v47 = vmul.f32 %v1645_v51, %v5524_v14  ;;  %v1773_v55 = vsel %vm1772_vm1, %v1747_v35, 0.0  ;;  %v1857_v51 = vsel %vm1772_vm1, %v1831_v50, 0.0 }
 0x1c7   :  { %v1514_v52 = vpop.f32.mrf.mxu0  ;;  %v1775_v17 = vadd.f32 %v1774_v54, %v1773_v55 }
 0x1c8   :  { %v5530_v63 = vadd.f32 %v1514_v52, %v5450_v1  ;;  %v1855_v52 = vsel %vm1772_vm1, %v1830_v30, 0.0  ;;  %v1780_v3 = vsel %vm1772_vm1, %v1751_v47, 0.0 }
 0x1c9   :  { %v4138_v59 = vpop.f32.mrf.mxu0 }
 0x1ca   :  { %v1752_v48 = vmul.f32 %v1650_v18, %v5530_v63  ;;  %v1680_v18 = vpop.permute.xlu1 %1679 }
 0x1cb   :  { %v1519_v38 = vpop.f32.mrf.mxu0 }
 0x1cc   :  { %v5537_v36 = vadd.f32 %v1519_v38, %v5453_v13  ;;  %v1833_v13 = vmul.f32 %v1751_v47, %v5524_v14  ;;  %v1834_v30 = vmul.f32 %v1752_v48, %v5530_v63  ;;  %v1782_v54 = vsel %vm1772_vm1, %v1752_v48, 0.0 }
 0x1cd   :  { %v4141_v39 = vpop.f32.mrf.mxu0 }
 0x1ce   :  { %v1832_v39 = vmul.f32 %v1750_v41, %v5520_v12 }
 0x1cf   :  { %v1522_v2 = vpop.f32.mrf.mxu0 }
 0x1d0   :  { %v5541_v59 = vadd.f32 %v1522_v2, %v5456_v26  ;;  %v1778_v26 = vsel %vm1772_vm1, %v1750_v41, 0.0  ;;  %v1753_v2 = vmul.f32 %v1655_v24, %v5537_v36 }
 0x1d1   :  { %v4142_v60 = vpop.f32.mrf.mxu0 }
 0x1d2   :  { %v1854_v60 = vsel %vm1772_vm1, %v1829_v42, 0.0  ;;  %v1754_v53 = vmul.f32 %v1660_v16, %v5541_v59  ;;  %v1835_v16 = vmul.f32 %v1753_v2, %v5537_v36 }
 0x1d3   :  { %v1527_v9 = vpop.f32.mrf.mxu0 }
 0x1d5   :  { %v4145_v11 = vpop.f32.mrf.mxu0 }
 0x1d6   :  { %v5553_v11 = vadd.f32 %v1527_v9, %v5459_v37  ;;  %v1861_v37 = vsel %vm1772_vm1, %v1833_v13, 0.0  ;;  %v1685_v9 = vpop.permute.xlu0 %1684 }
 0x1d7   :  { %v1530_v57 = vpop.f32.mrf.mxu0 }
 0x1d8   :  { %v5560_v42 = vadd.f32 %v1530_v57, %v5462_v49  ;;  %v1755_v50 = vmul.f32 %v1665_v19, %v5553_v11  ;;  %v1836_v49 = vmul.f32 %v1754_v53, %v5541_v59  ;;  %v1690_v19 = vpop.permute.xlu1 %1689 }
 0x1d9   :  { %v4146_v8 = vpop.f32.mrf.mxu0 }
 0x1da   :  { %v1856_v8 = vadd.f32 %v1855_v52, %v1854_v60  ;;  %v1756_v60 = vmul.f32 %v1670_v23, %v5560_v42 }
 0x1db   :  { %v1535_v45 = vpop.f32.mrf.mxu0 }
 0x1dc   :  { %v1858_v41 = vadd.f32 %v1857_v51, %v1856_v8  ;;  %v5567_v55 = vadd.f32 %v1535_v45, %v5465_v61  ;;  %v1786_v51 = vsel %vm1772_vm1, %v1754_v53, 0.0 }
 0x1dd   :  { %v4149_v5 = vpop.f32.mrf.mxu0 }
 0x1de   :  { %v1777_v5 = vadd.f32 %v1776_v0, %v1775_v17  ;;  %v1863_v0 = vsel %vm1772_vm1, %v1834_v30, 0.0 }
 0x1df   :  { %v1538_v34 = vpop.f32.mrf.mxu0 }
 0x1e0   :  { %v1779_v24 = vadd.f32 %v1778_v26, %v1777_v5  ;;  %v5574_v48 = vadd.f32 %v1538_v34, %v5468_v10  ;;  %v1837_v26 = vmul.f32 %v1755_v50, %v5553_v11  ;;  %v1867_v10 = vsel %vm1772_vm1, %v1836_v49, 0.0  ;;  %v1695_v34 = vpop.permute.xlu0 %1694 }
 0x1e1   :  { %v4150_v43 = vpop.f32.mrf.mxu0 }
 0x1e2   :  { %v1859_v43 = vsel %vm1772_vm1, %v1832_v39, 0.0  ;;  %v1781_v52 = vadd.f32 %v1780_v3, %v1779_v24  ;;  %v1784_v39 = vsel %vm1772_vm1, %v1753_v2, 0.0  ;;  %v1757_v2 = vmul.f32 %v1675_v6, %v5567_v55 }
 0x1e3   :  { %v1543_v28 = vpop.f32.mrf.mxu0  ;;  %v1860_v47 = vadd.f32 %v1859_v43, %v1858_v41  ;;  %v1788_v43 = vsel %vm1772_vm1, %v1755_v50, 0.0  ;;  %v1869_v24 = vsel %vm1772_vm1, %v1837_v26, 0.0 }
 0x1e4   :  { %v1783_v13 = vadd.f32 %v1782_v54, %v1781_v52  ;;  %v5577_v61 = vadd.f32 %v1543_v28, %v5471_v22  ;;  %v1838_v22 = vmul.f32 %v1756_v60, %v5560_v42  ;;  %v1758_v28 = vmul.f32 %v1680_v18, %v5574_v48  ;;  %v1700_v18 = vpop.permute.xlu1 %1699 }
 0x1e5   :  { %v4153_v29 = vpop.f32.mrf.mxu0  ;;  %v1862_v17 = vadd.f32 %v1861_v37, %v1860_v47  ;;  %v1790_v37 = vsel %vm1772_vm1, %v1756_v60, 0.0 }
 0x1e6   :  { %v1785_v23 = vadd.f32 %v1784_v39, %v1783_v13  ;;  %v1759_v41 = vmul.f32 %v1685_v9, %v5577_v61  ;;  %v1871_v47 = vsel %vm1772_vm1, %v1838_v22, 0.0  ;;  %v1792_v9 = vsel %vm1772_vm1, %v1757_v2, 0.0  ;;  %v1705_v39 = vpop.permute.xlu0 %1704 }
 0x1e7   :  { %v1546_v1 = vpop.f32.mrf.mxu0  ;;  %v1864_v8 = vadd.f32 %v1863_v0, %v1862_v17  ;;  %v1840_v52 = vmul.f32 %v1758_v28, %v5574_v48 }
 0x1e8   :  { %v5588_v3 = vadd.f32 %v1546_v1, %v5474_v33  ;;  %v1787_v30 = vadd.f32 %v1786_v51, %v1785_v23 }
 0x1e9   :  { %v4154_v38 = vpop.f32.mrf.mxu0  ;;  %v1875_v26 = vsel %vm1772_vm1, %v1840_v52, 0.0 }
 0x1ea   :  { %v1865_v38 = vsel %vm1772_vm1, %v1835_v16, 0.0  ;;  %v1789_v50 = vadd.f32 %v1788_v43, %v1787_v30  ;;  %v1760_v49 = vmul.f32 %v1690_v19, %v5588_v3  ;;  %v1710_v43 = vpop.permute.xlu1 %1709 }
 0x1eb   :  { %v1551_v35 = vpop.f32.mrf.mxu0  ;;  %v1866_v53 = vadd.f32 %v1865_v38, %v1864_v8 }
 0x1ec   :  { %v5595_v54 = vadd.f32 %v1551_v35, %v5477_v46  ;;  %v1791_v60 = vadd.f32 %v1790_v37, %v1789_v50  ;;  %v1841_v46 = vmul.f32 %v1759_v41, %v5577_v61  ;;  %v1842_v8 = vmul.f32 %v1760_v49, %v5588_v3 }
 0x1ed   :  { %v4157_v29 = vpop.f32.mrf.mxu0  ;;  %v1868_v16 = vadd.f32 %v1867_v10, %v1866_v53  ;;  %v1798_v22 = vsel %vm1772_vm1, %v1760_v49, 0.0 }
 0x1ee   :  { %v1839_v29 = vmul.f32 %v1757_v2, %v5567_v55  ;;  %v1793_v38 = vadd.f32 %v1792_v9, %v1791_v60  ;;  %v1796_v2 = vsel %vm1772_vm1, %v1759_v41, 0.0  ;;  %v1715_v41 = vpop.permute.xlu0 %1714 }
 0x1ef   :  { %v1554_v57 = vpop.f32.mrf.mxu0  ;;  %v1870_v0 = vadd.f32 %v1869_v24, %v1868_v16 }
 0x1f0   :  { %v5598_v33 = vadd.f32 %v1554_v57, %v5480_v58  ;;  %v1873_v17 = vsel %vm1772_vm1, %v1839_v29, 0.0  ;;  %v1794_v58 = vsel %vm1772_vm1, %v1758_v28, 0.0  ;;  %v1761_v57 = vmul.f32 %v1695_v34, %v5595_v54 }
 0x1f1   :  { %v4158_v45 = vpop.f32.mrf.mxu0  ;;  %v1795_v34 = vadd.f32 %v1794_v58, %v1793_v38  ;;  %v1879_v29 = vsel %vm1772_vm1, %v1842_v8, 0.0 }
 0x1f2   :  { %v1872_v45 = vadd.f32 %v1871_v47, %v1870_v0  ;;  %v1762_v51 = vmul.f32 %v1700_v18, %v5598_v33  ;;  %v1843_v28 = vmul.f32 %v1761_v57, %v5595_v54  ;;  %v1800_v16 = vsel %vm1772_vm1, %v1761_v57, 0.0  ;;  %v1725_v38 = vpop.permute.xlu0 %1724 }
 0x1f3   :  { %v1559_v5 = vpop.f32.mrf.mxu0  ;;  %v1797_v24 = vadd.f32 %v1796_v2, %v1795_v34 }
 0x1f4   :  { %v5609_v13 = vadd.f32 %v1559_v5, %v5483_v7  ;;  %v1874_v10 = vadd.f32 %v1873_v17, %v1872_v45  ;;  %v1877_v7 = vsel %vm1772_vm1, %v1841_v46, 0.0  ;;  %v1802_v52 = vsel %vm1772_vm1, %v1762_v51, 0.0 }
 0x1f5   :  { %v4161_v6 = vpop.f32.mrf.mxu0  ;;  %v1799_v47 = vadd.f32 %v1798_v22, %v1797_v24 }
 0x1f6   :  { %v1763_v53 = vmul.f32 %v1705_v39, %v5609_v13  ;;  %v1876_v6 = vadd.f32 %v1875_v26, %v1874_v10  ;;  %v1720_v39 = vpop.permute.xlu1 %1719 }
 0x1f7   :  { %v1562_v1 = vpop.f32.mrf.mxu0  ;;  %v1801_v46 = vadd.f32 %v1800_v16, %v1799_v47 }
 0x1f8   :  { %v5616_v23 = vadd.f32 %v1562_v1, %v5486_v21  ;;  %v1844_v21 = vmul.f32 %v1762_v51, %v5598_v33  ;;  %v1878_v1 = vadd.f32 %v1877_v7, %v1876_v6  ;;  %v1845_v49 = vmul.f32 %v1763_v53, %v5609_v13 }
 0x1f9   :  { %v4162_v35 = vpop.f32.mrf.mxu0 }
 0x1fa   :  { %v1764_v50 = vmul.f32 %v1710_v43, %v5616_v23  ;;  %v1880_v60 = vadd.f32 %v1879_v29, %v1878_v1  ;;  %v1883_v35 = vsel %vm1772_vm1, %v1844_v21, 0.0  ;;  %v1885_v2 = vsel %vm1772_vm1, %v1845_v49, 0.0 }
 0x1fb   :  { %v1567_v19 = vpop.f32.mrf.mxu0 }
 0x1fc   :  { %v5623_v30 = vadd.f32 %v1567_v19, %v5489_v32  ;;  %v1881_v32 = vsel %vm1772_vm1, %v1843_v28, 0.0  ;;  %v1846_v58 = vmul.f32 %v1764_v50, %v5616_v23  ;;  %v1803_v19 = vadd.f32 %v1802_v52, %v1801_v46 }
 0x1fd   :  { %v4165_v5 = vpop.f32.mrf.mxu0  ;;  %v1882_v51 = vadd.f32 %v1881_v32, %v1880_v60  ;;  %v1806_v8 = vsel %vm1772_vm1, %v1764_v50, 0.0 }
 0x1fe   :  { %v1765_v0 = vmul.f32 %v1715_v41, %v5623_v30  ;;  %v1887_v22 = vsel %vm1772_vm1, %v1846_v58, 0.0  ;;  %v1730_v41 = vpop.permute.xlu1 %1729 }
 0x1ff   :  { %v1570_v37 = vpop.f32.mrf.mxu0  ;;  %v1884_v34 = vadd.f32 %v1883_v35, %v1882_v51 }
 0x200   :  { %v5630_v18 = vadd.f32 %v1570_v37, %v5492_v44  ;;  %v1804_v44 = vsel %vm1772_vm1, %v1763_v53, 0.0  ;;  %v1847_v10 = vmul.f32 %v1765_v0, %v5623_v30 }
 0x201   :  { %v4166_v9 = vpop.f32.mrf.mxu0  ;;  %v1805_v7 = vadd.f32 %v1804_v44, %v1803_v19  ;;  %v1886_v6 = vadd.f32 %v1885_v2, %v1884_v34  ;;  %v4380_v2 = vld [vmem:[%s6349_s5 + $0x78] sm:$0xff]  }
 0x202   :  { %v1766_v57 = vmul.f32 %v1720_v39, %v5630_v18  ;;  %v1889_v37 = vsel %vm1772_vm1, %v1847_v10, 0.0  ;;  %3975 = vmatprep.subr.bf16.mxu1 %v4380_v2 }
 0x203   :  { %v1575_v17 = vpop.f32.mrf.mxu0  ;;  %v1807_v24 = vadd.f32 %v1806_v8, %v1805_v7  ;;  %v1888_v1 = vadd.f32 %v1887_v22, %v1886_v6  ;;  %v1740_v8 = vpop.permute.xlu1 %1739  ;;  %v4381_v7 = vld [vmem:[%s6349_s5 + $0x38] sm:$0xff]  }
 0x204   :  { %v5641_v45 = vadd.f32 %v1575_v17, %v5495_v56  ;;  %v1808_v56 = vsel %vm1772_vm1, %v1765_v0, 0.0  ;;  %v1848_v28 = vmul.f32 %v1766_v57, %v5630_v18  ;;  %v1810_v29 = vsel %vm1772_vm1, %v1766_v57, 0.0  ;;  %v1735_v0 = vpop.permute.xlu0 %1734  ;;  %3976 = vmatpush3.bf16.msra.mxu1 %v4381_v7  ;;  %v4385_v7 = vld [vmem:[%s6349_s5 + $0x28] sm:$0xff]  }
 0x205   :  { %v4169_v26 = vpop.f32.mrf.mxu0  ;;  %v1809_v47 = vadd.f32 %v1808_v56, %v1807_v24  ;;  %v1890_v39 = vadd.f32 %v1889_v37, %v1888_v1 }
 0x206   :  { %v1767_v43 = vmul.f32 %v1725_v38, %v5641_v45  ;;  %v1891_v32 = vsel %vm1772_vm1, %v1848_v28, 0.0 }
 0x207   :  { %v1578_v5 = vpop.f32.mrf.mxu0  ;;  %v1811_v60 = vadd.f32 %v1810_v29, %v1809_v47  ;;  %v1892_v58 = vadd.f32 %v1891_v32, %v1890_v39 }
 0x208   :  { %v5651_v53 = vadd.f32 %v1578_v5, %v5498_v4  ;;  %v1849_v16 = vmul.f32 %v1767_v43, %v5641_v45  ;;  %v1812_v4 = vsel %vm1772_vm1, %v1767_v43, 0.0 }
 0x209   :  { %v4170_v21 = vpop.f32.mrf.mxu0  ;;  %v1813_v57 = vadd.f32 %v1812_v4, %v1811_v60 }
 0x20a   :  { %v1768_v50 = vmul.f32 %v1730_v41, %v5651_v53  ;;  %v1893_v35 = vsel %vm1772_vm1, %v1849_v16, 0.0  ;;  %v1745_v21 = vpop.permute.xlu0 %1744 }
 0x20b   :  { %v1583_v9 = vpop.f32.mrf.mxu0  ;;  %v1894_v10 = vadd.f32 %v1893_v35, %v1892_v58  ;;  %v4383_v35 = vld [vmem:[%s6349_s5 + $0x30] sm:$0xff]  }
 0x20c   :  { %v1850_v52 = vmul.f32 %v1768_v50, %v5651_v53  ;;  %v5661_v49 = vadd.f32 %v1583_v9, %v5501_v20  ;;  %v1814_v17 = vsel %vm1772_vm1, %v1768_v50, 0.0 }
 0x20d   :  { %v4173_v46 = vpop.f32.mrf.mxu0  ;;  %v1815_v43 = vadd.f32 %v1814_v17, %v1813_v57 }
 0x20e   :  { %v1769_v44 = vmul.f32 %v1735_v0, %v5661_v49  ;;  %v1895_v38 = vsel %vm1772_vm1, %v1850_v52, 0.0  ;;  %v4382_v46 = vld [vmem:[%s6349_s5 + $0x70] sm:$0xff]  }
 0x20f   :  { %v1586_v51 = vpop.f32.mrf.mxu0  ;;  %v1896_v56 = vadd.f32 %v1895_v38, %v1894_v10  ;;  %3977 = vmatprep.subr.bf16.mxu1 %v4382_v46 }
 0x210   :  { %v1816_v19 = vsel %vm1772_vm1, %v1769_v44, 0.0  ;;  %v1851_v20 = vmul.f32 %v1769_v44, %v5661_v49  ;;  %v5670_v26 = vadd.f32 %v1586_v51, %v5504_v31  ;;  %3978 = vmatpush3.bf16.msra.mxu1 %v4383_v35  ;;  %v4395_v35 = vld [vmem:[%s6349_s5] sm:$0xff]  }
 0x211   :  { %v4174_v34 = vpop.f32.mrf.mxu0  ;;  %v1817_v31 = vadd.f32 %v1816_v19, %v1815_v43 }
 0x212   :  { %v1897_v5 = vsel %vm1772_vm1, %v1851_v20, 0.0  ;;  %v1770_v22 = vmul.f32 %v1740_v8, %v5670_v26  ;;  %v4384_v34 = vld [vmem:[%s6349_s5 + $0x68] sm:$0xff]  }
 0x213   :  { %v1591_v28 = vpop.f32.mrf.mxu0  ;;  %v1898_v37 = vadd.f32 %v1897_v5, %v1896_v56  ;;  %3979 = vmatprep.subr.bf16.mxu1 %v4384_v34 }
 0x214   :  { %v1818_v41 = vsel %vm1772_vm1, %v1770_v22, 0.0  ;;  %v1852_v6 = vmul.f32 %v1770_v22, %v5670_v26  ;;  %v5683_v24 = vadd.f32 %v1591_v28, %v5507_v40  ;;  %3980 = vmatpush3.bf16.msra.mxu1 %v4385_v7 }
 0x215   :  { %v1819_v29 = vadd.f32 %v1818_v41, %v1817_v31  ;;  %v4177_v16 = vpop.f32.mrf.mxu0  ;;  %v4386_v41 = vld [vmem:[%s6349_s5 + $0x60] sm:$0xff]  }
 0x216   :  { %v1899_v50 = vsel %vm1772_vm1, %v1852_v6, 0.0  ;;  %v1771_v1 = vmul.f32 %v1745_v21, %v5683_v24  ;;  %v4387_v6 = vld [vmem:[%s6349_s5 + $0x20] sm:$0xff]   ;;  %v4388_v21 = vld [vmem:[%s6349_s5 + $0x58] sm:$0xff]   ;;  %3981 = vmatprep.subr.bf16.mxu1 %v4386_v41  ;;  %v4390_v16 = vld [vmem:[%s6349_s5 + $0x50] sm:$0xff]  }
 0x217   :  { %v1900_v47 = vadd.f32 %v1899_v50, %v1898_v37  ;;  %v1594_v9 = vpop.f32.mrf.mxu0  ;;  %v1921_v37 = vlaneseq }
 0x218   :  { %v1820_v32 = vsel %vm1772_vm1, %v1771_v1, 0.0  ;;  %v1853_v4 = vmul.f32 %v1771_v1, %v5683_v24  ;;  %3982 = vmatpush3.bf16.msra.mxu1 %v4387_v6  ;;  %v4391_v1 = vld [vmem:[%s6349_s5 + $0x10] sm:$0xff]   ;;  %v1913_v9 = vld [vmem:[%s6350_s2] sm:$0x1] }
 0x219   :  { %v1821_v52 = vadd.f32 %v1820_v32, %v1819_v29  ;;  %v4178_v0 = vpop.f32.mrf.mxu0  ;;  %v4389_v29 = vld [vmem:[%s6349_s5 + $0x18] sm:$0xff]   ;;  %3983 = vmatprep.subr.bf16.mxu1 %v4388_v21  ;;  %v1922_v50 = vshrl.u32 %v1921_v37, 7 }
 0x21a   :  { %v1901_v39 = vsel %vm1772_vm1, %v1853_v4, 0.0 }
 0x21b   :  { %v1822_v40 = vrot.slane %v1821_v52, 4  ;;  %v1902_v60 = vadd.f32 %v1901_v39, %v1900_v47  ;;  %v4392_v47 = vld [vmem:[%s6349_s5 + $0x48] sm:$0xff]   ;;  %v5726_v32 = vsub.s32 0, %v1922_v50  ;;  %v4394_v39 = vld [vmem:[%s6349_s5 + $0x40] sm:$0xff]  }
 0x21c   :  { %3984 = vmatpush3.bf16.msra.mxu1 %v4389_v29 }
 0x21d   :  { %v1823_v17 = vadd.f32 %v1822_v40, %v1821_v52  ;;  %v1903_v44 = vrot.slane %v1902_v60, 4  ;;  %3985 = vmatprep.subr.bf16.mxu1 %v4390_v16  ;;  %v4393_v52 = vld [vmem:[%s6349_s5 + $0x8] sm:$0xff]   ;;  %v1917_v40 = vld [vmem:[%s6351_s3] sm:$0x1]  ;;  %s4427_s3 = smov 64  }
 0x21f   :  { %v1824_v58 = vrot.slane %v1823_v17, 2  ;;  %v1904_v57 = vadd.f32 %v1903_v44, %v1902_v60 }
 0x220   :  { %3986 = vmatpush3.bf16.msra.mxu1 %v4391_v1 }
 0x221   :  { %v1825_v38 = vadd.f32 %v1824_v58, %v1823_v17  ;;  %v1905_v51 = vrot.slane %v1904_v57, 2  ;;  %3987 = vmatprep.subr.bf16.mxu1 %v4392_v47 }
 0x223   :  { %v1826_v19 = vrot.slane %v1825_v38, 1  ;;  %v1906_v20 = vadd.f32 %v1905_v51, %v1904_v57 }
 0x224   :  { %3988 = vmatpush3.bf16.msra.mxu1 %v4393_v52 }
 0x225   :  { %v1827_v2 = vadd.f32 %v1826_v19, %v1825_v38  ;;  %v1907_v8 = vrot.slane %v1906_v20, 1  ;;  %3989 = vmatprep.subr.bf16.mxu1 %v4394_v39 }
 0x227   :  { %v1828_v10 = vmul.f32 0.0078125, %v1827_v2  ;;  %v1908_v43 = vadd.f32 %v1907_v8, %v1906_v20 }
 0x228   :  { %3990 = vmatpush3.bf16.msra.mxu1 %v4395_v35 }
 0x229   :  { %v1909_v5 = vmul.f32 0.0078125, %v1908_v43  ;;  %v1910_v22 = vmul.f32 %v1828_v10, %v1828_v10 }
 0x22b   :  { %v1911_v56 = vsub.f32 %v1909_v5, %v1910_v22 }
 0x22d   :  { %v1912_v31 = vmax.f32 %v1911_v56, 0.0 }
 0x22f   :  { %v1914_v28 = vadd.f32 1e-05, %v1912_v31 }
 0x231   :  { %4416 = vrsqrt.f32 %v1914_v28 }
 0x23e   :  { %v4417_v4 = vpop.eup %4416 }
 0x23f   :  { %v1916_v0 = vmul.f32 %v4417_v4, %v1913_v9 }
 0x241   :  { %v1918_v60 = vmul.f32 %v1916_v0, %v1828_v10  ;;  %v5738_v46 = vrot.slane %v1916_v0, %v5726_v32 }
 0x243   :  { %v1919_v17 = vsub.f32 %v1917_v40, %v1918_v60  ;;  %v1948_v44 = vmul.f32 %v5738_v46, %v5661_v49  ;;  %v1949_v58 = vmul.f32 %v5738_v46, %v5670_v26  ;;  %v1950_v57 = vmul.f32 %v5738_v46, %v5683_v24 }
 0x244   :  { %v1926_v38 = vmul.f32 %v5738_v46, %v5513_v25  ;;  %v1927_v51 = vmul.f32 %v5738_v46, %v5510_v62  ;;  %v1928_v19 = vmul.f32 %v5738_v46, %v5516_v27  ;;  %v1929_v20 = vmul.f32 %v5738_v46, %v5520_v12 }
 0x245   :  { %v5758_v49 = vrot.slane %v1919_v17, %v5726_v32  ;;  %v1930_v26 = vmul.f32 %v5738_v46, %v5524_v14  ;;  %v1931_v24 = vmul.f32 %v5738_v46, %v5530_v63  ;;  %v1932_v25 = vmul.f32 %v5738_v46, %v5537_v36 }
 0x246   :  { %v1933_v62 = vmul.f32 %v5738_v46, %v5541_v59  ;;  %v1934_v27 = vmul.f32 %v5738_v46, %v5553_v11  ;;  %v1935_v12 = vmul.f32 %v5738_v46, %v5560_v42  ;;  %v1936_v2 = vmul.f32 %v5738_v46, %v5567_v55 }
 0x247   :  { %v1979_v14 = vadd.f32 %v5758_v49, %v1948_v44  ;;  %v1980_v63 = vadd.f32 %v5758_v49, %v1949_v58  ;;  %v1981_v8 = vadd.f32 %v5758_v49, %v1950_v57  ;;  %v1958_v36 = vadd.f32 %v5758_v49, %v1927_v51 }
 0x248   :  { %v1959_v59 = vadd.f32 %v5758_v49, %v1928_v19  ;;  %v1960_v10 = vadd.f32 %v5758_v49, %v1929_v20  ;;  %v1961_v11 = vadd.f32 %v5758_v49, %v1930_v26  ;;  %v1962_v42 = vadd.f32 %v5758_v49, %v1931_v24 }
 0x249   :  { %v2004_v43 = vmax.f32 %v1979_v14, 0.0  ;;  %v2005_v34 = vmax.f32 %v1980_v63, 0.0  ;;  %v2006_v55 = vmax.f32 %v1981_v8, 0.0  ;;  %v1963_v7 = vadd.f32 %v5758_v49, %v1932_v25 }
 0x24a   :  { %v1983_v5 = vmax.f32 %v1958_v36, 0.0  ;;  %v1984_v22 = vmax.f32 %v1959_v59, 0.0  ;;  %v1985_v56 = vmax.f32 %v1960_v10, 0.0  ;;  %v1986_v31 = vmax.f32 %v1961_v11, 0.0 }
 0x24b   :  { %2029 = vst.msk [vmem:[#allocation2 + $0xb0] sm:$0xff] %vm1772_vm1, %v2004_v43  ;;  %2030 = vst.msk [vmem:[#allocation2 + $0xb8] sm:$0xff] %vm1772_vm1, %v2005_v34  ;;  %v1987_v28 = vmax.f32 %v1962_v42, 0.0  ;;  %v1988_v41 = vmax.f32 %v1963_v7, 0.0  ;;  %v1957_v6 = vadd.f32 %v5758_v49, %v1926_v38  ;;  %v1937_v21 = vmul.f32 %v5738_v46, %v5574_v48 }
 0x24c   :  { %2031 = vst.msk [vmem:[#allocation2 + $0xc0] sm:$0xff] %vm1772_vm1, %v2006_v55  ;;  %2008 = vst.msk [vmem:[#allocation2 + $0x8] sm:$0xff] %vm1772_vm1, %v1983_v5  ;;  %v1938_v37 = vmul.f32 %v5738_v46, %v5577_v61  ;;  %v1964_v29 = vadd.f32 %v5758_v49, %v1933_v62  ;;  %v1965_v16 = vadd.f32 %v5758_v49, %v1934_v27 }
 0x24d   :  { %2009 = vst.msk [vmem:[#allocation2 + $0x10] sm:$0xff] %vm1772_vm1, %v1984_v22  ;;  %2010 = vst.msk [vmem:[#allocation2 + $0x18] sm:$0xff] %vm1772_vm1, %v1985_v56  ;;  %v1966_v50 = vadd.f32 %v5758_v49, %v1935_v12  ;;  %v1982_v48 = vmax.f32 %v1957_v6, 0.0  ;;  %v1967_v1 = vadd.f32 %v5758_v49, %v1936_v2  ;;  %v1968_v47 = vadd.f32 %v5758_v49, %v1937_v21 }
 0x24e   :  { %2011 = vst.msk [vmem:[#allocation2 + $0x20] sm:$0xff] %vm1772_vm1, %v1986_v31  ;;  %2012 = vst.msk [vmem:[#allocation2 + $0x28] sm:$0xff] %vm1772_vm1, %v1987_v28  ;;  %v1939_v9 = vmul.f32 %v5738_v46, %v5588_v3  ;;  %v1969_v61 = vadd.f32 %v5758_v49, %v1938_v37  ;;  %v1989_v4 = vmax.f32 %v1964_v29, 0.0  ;;  %v1990_v52 = vmax.f32 %v1965_v16, 0.0 }
 0x24f   :  { %2013 = vst.msk [vmem:[#allocation2 + $0x30] sm:$0xff] %vm1772_vm1, %v1988_v41  ;;  %v1991_v0 = vmax.f32 %v1966_v50, 0.0  ;;  %2007 = vst.msk [vmem:[#allocation2] sm:$0xff] %vm1772_vm1, %v1982_v48  ;;  %v1992_v39 = vmax.f32 %v1967_v1, 0.0  ;;  %v1993_v40 = vmax.f32 %v1968_v47, 0.0  ;;  %v1940_v60 = vmul.f32 %v5738_v46, %v5595_v54 }
 0x250   :  { %v1941_v35 = vmul.f32 %v5738_v46, %v5598_v33  ;;  %v1994_v17 = vmax.f32 %v1969_v61, 0.0  ;;  %2014 = vst.msk [vmem:[#allocation2 + $0x38] sm:$0xff] %vm1772_vm1, %v1989_v4  ;;  %2015 = vst.msk [vmem:[#allocation2 + $0x40] sm:$0xff] %vm1772_vm1, %v1990_v52  ;;  %v1942_v3 = vmul.f32 %v5738_v46, %v5609_v13  ;;  %v1970_v44 = vadd.f32 %v5758_v49, %v1939_v9 }
 0x251   :  { %2016 = vst.msk [vmem:[#allocation2 + $0x48] sm:$0xff] %vm1772_vm1, %v1991_v0  ;;  %v1943_v58 = vmul.f32 %v5738_v46, %v5616_v23  ;;  %2017 = vst.msk [vmem:[#allocation2 + $0x50] sm:$0xff] %vm1772_vm1, %v1992_v39  ;;  %v1971_v54 = vadd.f32 %v5758_v49, %v1940_v60  ;;  %v1944_v57 = vmul.f32 %v5738_v46, %v5623_v30 }
 0x252   :  { %2018 = vst.msk [vmem:[#allocation2 + $0x58] sm:$0xff] %vm1772_vm1, %v1993_v40  ;;  %v1972_v33 = vadd.f32 %v5758_v49, %v1941_v35  ;;  %v1945_v38 = vmul.f32 %v5738_v46, %v5630_v18  ;;  %v2054_v13 = vld [vmem:[#allocation2 + $0xb0] sm:$0xff]  ;;  %2019 = vst.msk [vmem:[#allocation2 + $0x60] sm:$0xff] %vm1772_vm1, %v1994_v17  ;;  %v1973_v23 = vadd.f32 %v5758_v49, %v1942_v3  ;;  %v1995_v19 = vmax.f32 %v1970_v44, 0.0 }
 0x253   :  { %v2078_v51 = vld [vmem:[#allocation2 + $0xb1] sm:$0xff]  ;;  %v1946_v20 = vmul.f32 %v5738_v46, %v5641_v45  ;;  %v1947_v26 = vmul.f32 %v5738_v46, %v5651_v53  ;;  %v2126_v25 = vld [vmem:[#allocation2 + $0xba] sm:$0xff]  ;;  %v1996_v62 = vmax.f32 %v1971_v54, 0.0  ;;  %v1974_v30 = vadd.f32 %v5758_v49, %v1943_v58  ;;  %v2033_v8 = vld [vmem:[#allocation2 + $0x8] sm:$0xff] }
 0x254   :  { %v2102_v24 = vmax.f32 %v2054_v13, %v2078_v51  ;;  %v1975_v18 = vadd.f32 %v5758_v49, %v1944_v57  ;;  %v2150_v27 = vld [vmem:[#allocation2 + $0xbb] sm:$0xff]  ;;  %v1997_v12 = vmax.f32 %v1972_v33, 0.0  ;;  %v1998_v2 = vmax.f32 %v1973_v23, 0.0  ;;  %2020 = vst.msk [vmem:[#allocation2 + $0x68] sm:$0xff] %vm1772_vm1, %v1995_v19  ;;  %v2034_v45 = vld [vmem:[#allocation2 + $0x10] sm:$0xff] }
 0x255   :  { %v1976_v14 = vadd.f32 %v5758_v49, %v1945_v38  ;;  %v2174_v63 = vmax.f32 %v2126_v25, %v2150_v27  ;;  %2021 = vst.msk [vmem:[#allocation2 + $0x70] sm:$0xff] %vm1772_vm1, %v1996_v62  ;;  %v1977_v53 = vadd.f32 %v5758_v49, %v1946_v20  ;;  %v1978_v46 = vadd.f32 %v5758_v49, %v1947_v26  ;;  %v2035_v36 = vld [vmem:[#allocation2 + $0x18] sm:$0xff]  ;;  %v2057_v59 = vld [vmem:[#allocation2 + $0x9] sm:$0xff]  ;;  %v2036_v55 = vld [vmem:[#allocation2 + $0x20] sm:$0xff] }
 0x256   :  { %v2058_v10 = vld [vmem:[#allocation2 + $0x11] sm:$0xff]  ;;  %2022 = vst.msk [vmem:[#allocation2 + $0x78] sm:$0xff] %vm1772_vm1, %v1997_v12  ;;  %2023 = vst.msk [vmem:[#allocation2 + $0x80] sm:$0xff] %vm1772_vm1, %v1998_v2  ;;  %v1999_v11 = vmax.f32 %v1974_v30, 0.0  ;;  %v2000_v42 = vmax.f32 %v1975_v18, 0.0  ;;  %v2059_v7 = vld [vmem:[#allocation2 + $0x19] sm:$0xff]  ;;  %v2081_v49 = vmax.f32 %v2033_v8, %v2057_v59 }
 0x257   :  { %v2001_v43 = vmax.f32 %v1976_v14, 0.0  ;;  %v2198_v34 = vmax.f32 %v2102_v24, %v2174_v63  ;;  %v2060_v5 = vld [vmem:[#allocation2 + $0x21] sm:$0xff]  ;;  %v2105_v22 = vld [vmem:[#allocation2 + $0x12] sm:$0xff]  ;;  %v2002_v31 = vmax.f32 %v1977_v53, 0.0  ;;  %v2082_v28 = vmax.f32 %v2034_v45, %v2058_v10  ;;  %v2108_v21 = vld [vmem:[#allocation2 + $0x2a] sm:$0xff] }
 0x258   :  { %v2106_v56 = vld [vmem:[#allocation2 + $0x1a] sm:$0xff]  ;;  %2024 = vst.msk [vmem:[#allocation2 + $0x88] sm:$0xff] %vm1772_vm1, %v1999_v11  ;;  %2025 = vst.msk [vmem:[#allocation2 + $0x90] sm:$0xff] %vm1772_vm1, %v2000_v42  ;;  %v2083_v41 = vmax.f32 %v2035_v36, %v2059_v7  ;;  %v2107_v6 = vld [vmem:[#allocation2 + $0x22] sm:$0xff]  ;;  %v2003_v37 = vmax.f32 %v1978_v46, 0.0  ;;  %v2084_v29 = vmax.f32 %v2036_v55, %v2060_v5 }
 0x259   :  { %2026 = vst.msk [vmem:[#allocation2 + $0x98] sm:$0xff] %vm1772_vm1, %v2001_v43  ;;  %2222 = vst.msk [vmem:[#allocation3 + $0xb0] sm:$0xff] %vm1772_vm1, %v2198_v34  ;;  %v2129_v16 = vld [vmem:[#allocation2 + $0x13] sm:$0xff]  ;;  %v2130_v50 = vld [vmem:[#allocation2 + $0x1b] sm:$0xff] }
 0x25a   :  { %v2131_v48 = vld [vmem:[#allocation2 + $0x23] sm:$0xff]  ;;  %2027 = vst.msk [vmem:[#allocation2 + $0xa0] sm:$0xff] %vm1772_vm1, %v2002_v31  ;;  %v2132_v1 = vld [vmem:[#allocation2 + $0x2b] sm:$0xff]  ;;  %v2153_v47 = vmax.f32 %v2105_v22, %v2129_v16  ;;  %v2154_v9 = vmax.f32 %v2106_v56, %v2130_v50  ;;  %2028 = vst.msk [vmem:[#allocation2 + $0xa8] sm:$0xff] %vm1772_vm1, %v2003_v37 }
 0x25b   :  { %v2155_v61 = vmax.f32 %v2107_v6, %v2131_v48  ;;  %v2156_v4 = vmax.f32 %v2108_v21, %v2132_v1  ;;  %v2038_v52 = vld [vmem:[#allocation2 + $0x30] sm:$0xff]  ;;  %v2039_v60 = vld [vmem:[#allocation2 + $0x38] sm:$0xff]  ;;  %v2040_v35 = vld [vmem:[#allocation2 + $0x40] sm:$0xff] }
 0x25c   :  { %v2177_v0 = vmax.f32 %v2081_v49, %v2153_v47  ;;  %v2178_v39 = vmax.f32 %v2082_v28, %v2154_v9  ;;  %v2041_v17 = vld [vmem:[#allocation2 + $0x48] sm:$0xff]  ;;  %v2062_v44 = vld [vmem:[#allocation2 + $0x31] sm:$0xff]  ;;  %v2063_v58 = vld [vmem:[#allocation2 + $0x39] sm:$0xff] }
 0x25d   :  { %v2179_v40 = vmax.f32 %v2083_v41, %v2155_v61  ;;  %v2180_v3 = vmax.f32 %v2084_v29, %v2156_v4  ;;  %v2064_v54 = vld [vmem:[#allocation2 + $0x41] sm:$0xff]  ;;  %v2065_v33 = vld [vmem:[#allocation2 + $0x49] sm:$0xff]  ;;  %v2086_v13 = vmax.f32 %v2038_v52, %v2062_v44  ;;  %v2087_v51 = vmax.f32 %v2039_v60, %v2063_v58  ;;  %v2113_v19 = vld [vmem:[#allocation2 + $0x52] sm:$0xff] }
 0x25e   :  { %2201 = vst.msk [vmem:[#allocation3 + $0x8] sm:$0xff] %vm1772_vm1, %v2177_v0  ;;  %2202 = vst.msk [vmem:[#allocation3 + $0x10] sm:$0xff] %vm1772_vm1, %v2178_v39  ;;  %v2110_v57 = vld [vmem:[#allocation2 + $0x3a] sm:$0xff]  ;;  %v2111_v38 = vld [vmem:[#allocation2 + $0x42] sm:$0xff]  ;;  %v2088_v20 = vmax.f32 %v2040_v35, %v2064_v54  ;;  %v2089_v26 = vmax.f32 %v2041_v17, %v2065_v33 }
 0x25f   :  { %2203 = vst.msk [vmem:[#allocation3 + $0x18] sm:$0xff] %vm1772_vm1, %v2179_v40  ;;  %2204 = vst.msk [vmem:[#allocation3 + $0x20] sm:$0xff] %vm1772_vm1, %v2180_v3  ;;  %v2112_v23 = vld [vmem:[#allocation2 + $0x4a] sm:$0xff]  ;;  %v2134_v24 = vld [vmem:[#allocation2 + $0x3b] sm:$0xff] }
 0x260   :  { %v2135_v25 = vld [vmem:[#allocation2 + $0x43] sm:$0xff]  ;;  %v2136_v62 = vld [vmem:[#allocation2 + $0x4b] sm:$0xff]  ;;  %v2137_v30 = vld [vmem:[#allocation2 + $0x53] sm:$0xff]  ;;  %v2158_v18 = vmax.f32 %v2110_v57, %v2134_v24 }
 0x261   :  { %v2159_v27 = vmax.f32 %v2111_v38, %v2135_v25  ;;  %v2160_v12 = vmax.f32 %v2112_v23, %v2136_v62  ;;  %v2161_v2 = vmax.f32 %v2113_v19, %v2137_v30  ;;  %v2045_v14 = vld [vmem:[#allocation2 + $0x68] sm:$0xff]  ;;  %v2046_v63 = vld [vmem:[#allocation2 + $0x70] sm:$0xff]  ;;  %v2118_v55 = vld [vmem:[#allocation2 + $0x7a] sm:$0xff] }
 0x262   :  { %v2182_v8 = vmax.f32 %v2086_v13, %v2158_v18  ;;  %v2069_v53 = vld [vmem:[#allocation2 + $0x69] sm:$0xff]  ;;  %v2070_v46 = vld [vmem:[#allocation2 + $0x71] sm:$0xff]  ;;  %v2142_v5 = vld [vmem:[#allocation2 + $0x7b] sm:$0xff] }
 0x263   :  { %v2183_v45 = vmax.f32 %v2087_v51, %v2159_v27  ;;  %v2184_v59 = vmax.f32 %v2088_v20, %v2160_v12  ;;  %v2185_v10 = vmax.f32 %v2089_v26, %v2161_v2  ;;  %v2117_v11 = vld [vmem:[#allocation2 + $0x72] sm:$0xff]  ;;  %v2093_v43 = vmax.f32 %v2045_v14, %v2069_v53  ;;  %v2270_v49 = vld [vmem:[#allocation4 + $0x2] sm:$0xff]  ;;  %v2048_v6 = vld [vmem:[#allocation2 + $0x80] sm:$0xff] }
 0x264   :  { %2206 = vst.msk [vmem:[#allocation3 + $0x30] sm:$0xff] %vm1772_vm1, %v2182_v8  ;;  %v2094_v34 = vmax.f32 %v2046_v63, %v2070_v46  ;;  %v2141_v7 = vld [vmem:[#allocation2 + $0x73] sm:$0xff]  ;;  %v2166_v56 = vmax.f32 %v2118_v55, %v2142_v5  ;;  %v2049_v21 = vld [vmem:[#allocation2 + $0x88] sm:$0xff]  ;;  %v2146_v23 = vld [vmem:[#allocation2 + $0x9b] sm:$0xff] }
 0x265   :  { %v2237_v36 = vld [vmem:[#allocation3 + $0xb] ss:$2 sm:$0xf]  ;;  %2207 = vst.msk [vmem:[#allocation3 + $0x38] sm:$0xff] %vm1772_vm1, %v2183_v45  ;;  %2208 = vst.msk [vmem:[#allocation3 + $0x40] sm:$0xff] %vm1772_vm1, %v2184_v59  ;;  %v2165_v22 = vmax.f32 %v2117_v11, %v2141_v7  ;;  %v2072_v37 = vld [vmem:[#allocation2 + $0x81] sm:$0xff] }
 0x266   :  { %2239 = vst.msk [vmem:[#allocation4 + $0xf] sm:$0xf] %vm2238_vm2, %v2237_v36  ;;  %v2241_v42 = vld [vmem:[#allocation3 + $0x1f] ss:$2 sm:$0xf]  ;;  %v2288_v31 = vld [vmem:[#allocation4 + $0x7] sm:$0xff]  ;;  %v2190_v41 = vmax.f32 %v2094_v34, %v2166_v56  ;;  %v2096_v3 = vmax.f32 %v2048_v6, %v2072_v37 }
 0x267   :  { %2242 = vst.msk [vmem:[#allocation4 + $0x15] sm:$0xf] %vm2238_vm2, %v2241_v42  ;;  %v2189_v28 = vmax.f32 %v2093_v43, %v2165_v22  ;;  %v2073_v29 = vld [vmem:[#allocation2 + $0x89] sm:$0xff]  ;;  %v2051_v50 = vld [vmem:[#allocation2 + $0x98] sm:$0xff] }
 0x268   :  { %2209 = vst.msk [vmem:[#allocation3 + $0x48] sm:$0xff] %vm1772_vm1, %v2185_v10  ;;  %2214 = vst.msk [vmem:[#allocation3 + $0x70] sm:$0xff] %vm1772_vm1, %v2190_v41  ;;  %v2050_v16 = vld [vmem:[#allocation2 + $0x90] sm:$0xff]  ;;  %v2075_v1 = vld [vmem:[#allocation2 + $0x99] sm:$0xff]  ;;  %v2097_v44 = vmax.f32 %v2049_v21, %v2073_v29 }
 0x269   :  { %2213 = vst.msk [vmem:[#allocation3 + $0x68] sm:$0xff] %vm1772_vm1, %v2189_v28  ;;  %v2074_v48 = vld [vmem:[#allocation2 + $0x91] sm:$0xff]  ;;  %v2053_v61 = vld [vmem:[#allocation2 + $0xa8] sm:$0xff]  ;;  %v2122_v17 = vld [vmem:[#allocation2 + $0x9a] sm:$0xff]  ;;  %v2099_v57 = vmax.f32 %v2051_v50, %v2075_v1 }
 0x26a   :  { %v2077_v4 = vld [vmem:[#allocation2 + $0xa9] sm:$0xff]  ;;  %v2121_v35 = vld [vmem:[#allocation2 + $0x92] sm:$0xff]  ;;  %v2098_v33 = vmax.f32 %v2050_v16, %v2074_v48  ;;  %v2170_v62 = vmax.f32 %v2122_v17, %v2146_v23 }
 0x26b   :  { %v2120_v60 = vld [vmem:[#allocation2 + $0x8a] sm:$0xff]  ;;  %v2123_v58 = vld [vmem:[#allocation2 + $0xa2] sm:$0xff]  ;;  %v2125_v54 = vld [vmem:[#allocation2 + $0xb2] sm:$0xff]  ;;  %v2101_v51 = vmax.f32 %v2053_v61, %v2077_v4 }
 0x26c   :  { %v2244_v9 = vld [vmem:[#allocation3 + $0x33] ss:$2 sm:$0xf]  ;;  %v2144_v38 = vld [vmem:[#allocation2 + $0x8b] sm:$0xff]  ;;  %v2145_v13 = vld [vmem:[#allocation2 + $0x93] sm:$0xff]  ;;  %v2194_v8 = vmax.f32 %v2098_v33, %v2170_v62 }
 0x26d   :  { %v2271_v47 = vld [vmem:[#allocation4 + $0xa] sm:$0xff]  ;;  %2245 = vst.msk [vmem:[#allocation4 + $0x1b] sm:$0xf] %vm2238_vm2, %v2244_v9  ;;  %v2147_v19 = vld [vmem:[#allocation2 + $0xa3] sm:$0xff]  ;;  %v2168_v20 = vmax.f32 %v2120_v60, %v2144_v38  ;;  %v2169_v26 = vmax.f32 %v2121_v35, %v2145_v13 }
 0x26e   :  { %v5859_v52 = vld [vmem:[#allocation4 + $0xf] sm:$0xff]  ;;  %v4218_v0 = vpack.i.bf16 %v2271_v47, %v2270_v49  ;;  %v2171_v30 = vmax.f32 %v2123_v58, %v2147_v19  ;;  %v5867_v27 = vld [vmem:[#allocation4 + $0x27] sm:$0xff]  ;;  %2218 = vst.msk [vmem:[#allocation3 + $0x90] sm:$0xff] %vm1772_vm1, %v2194_v8 }
 0x26f   :  { %v2247_v39 = vld [vmem:[#allocation3 + $0x47] ss:$2 sm:$0xf]  ;;  %v4213_v40 = vpack.i.bf16 %v5859_v52, %v2288_v31  ;;  %v2272_v18 = vld [vmem:[#allocation4 + $0x12] sm:$0xff]  ;;  %v2192_v2 = vmax.f32 %v2096_v3, %v2168_v20  ;;  %v2193_v14 = vmax.f32 %v2097_v44, %v2169_v26 }
 0x270   :  { %2248 = vst.msk [vmem:[#allocation4 + $0x21] sm:$0xf] %vm2238_vm2, %v2247_v39  ;;  %4219 = vrot.lane.b32.xlu0 %v4218_v0, %s4427_s3  ;;  %v2250_v24 = vld [vmem:[#allocation3 + $0x6f] ss:$2 sm:$0xf]  ;;  %v2195_v45 = vmax.f32 %v2099_v57, %v2171_v30  ;;  %v2319_v39 = vld [vmem:[#allocation4 + $0x26] sm:$0xff] }
 0x271   :  { %4214 = vrot.lane.b32.xlu1 %v4213_v40, %s4427_s3  ;;  %v2149_v25 = vld [vmem:[#allocation2 + $0xb3] sm:$0xff]  ;;  %2251 = vst.msk [vmem:[#allocation4 + $0x33] sm:$0xf] %vm2238_vm2, %v2250_v24 }
 0x272   :  { %v2173_v12 = vmax.f32 %v2125_v54, %v2149_v25  ;;  %2216 = vst.msk [vmem:[#allocation3 + $0x80] sm:$0xff] %vm1772_vm1, %v2192_v2  ;;  %2217 = vst.msk [vmem:[#allocation3 + $0x88] sm:$0xff] %vm1772_vm1, %v2193_v14  ;;  %v2275_v34 = vld [vmem:[#allocation4 + $0x2a] sm:$0xff]  ;;  %v3050_v2 = vld [vmem:[%s6352_s8] sm:$0xff] }
 0x273   :  { %2219 = vst.msk [vmem:[#allocation3 + $0x98] sm:$0xff] %vm1772_vm1, %v2195_v45  ;;  %v4396_v55 = vld [vmem:[%s6349_s5 + $0xf8] sm:$0xff]   ;;  %v3052_v8 = vld [vmem:[%s6352_s8 + $0x10] sm:$0xff]  ;;  %v3055_v45 = vld [vmem:[%s6352_s8 + $0x28] sm:$0xff] }
 0x274   :  { %v5869_v63 = vld [vmem:[#allocation4 + $0x17] sm:$0xff]  ;;  %v2197_v59 = vmax.f32 %v2101_v51, %v2173_v12  ;;  %4021 = vmatprep.subr.bf16.mxu1 %v4396_v55  ;;  %v2316_v1 = vld [vmem:[#allocation4 + $0xe] sm:$0xff]  ;;  %v3051_v12 = vld [vmem:[%s6352_s8 + $0x8] sm:$0xff] }
 0x275   :  { %v2510_v46 = vpack.c.bf16 %v5869_v63, %v5859_v52  ;;  %v2317_v47 = vld [vmem:[#allocation4 + $0x16] sm:$0xff]  ;;  %v2262_v40 = vld [vmem:[#allocation4 + $0x9] sm:$0xff] }
 0x276   :  { %2221 = vst.msk [vmem:[#allocation3 + $0xa8] sm:$0xff] %vm1772_vm1, %v2197_v59  ;;  %v4258_v61 = vpack.i.bf16 %v2317_v47, %v2316_v1  ;;  %v5914_v60 = vld [vmem:[#allocation4 + $0x11] sm:$0xff]  ;;  %v5919_v58 = vld [vmem:[#allocation4 + $0x19] sm:$0xff]  ;;  %v5927_v51 = vld [vmem:[#allocation4 + $0x29] sm:$0xff] }
 0x277   :  { %v5871_v53 = vld [vmem:[#allocation4 + $0x1f] sm:$0xff]  ;;  %v4263_v17 = vpack.i.bf16 %v5914_v60, %v2262_v40  ;;  %v2306_v19 = vld [vmem:[#allocation4 + $0x49] sm:$0xff] }
 0x278   :  { %v2273_v36 = vld [vmem:[#allocation4 + $0x1a] sm:$0xff]  ;;  %v4223_v10 = vpack.i.bf16 %v5871_v53, %v5869_v63  ;;  %v2515_v42 = vpack.c.bf16 %v5867_v27, %v5871_v53  ;;  %v2274_v43 = vld [vmem:[#allocation4 + $0x22] sm:$0xff]  ;;  %v5889_v7 = vld [vmem:[#allocation4 + $0x2f] sm:$0xff] }
 0x279   :  { %v4228_v11 = vpack.i.bf16 %v2273_v36, %v2272_v18  ;;  %v4238_v5 = vpack.i.bf16 %v2275_v34, %v2274_v43  ;;  %v4233_v22 = vpack.i.bf16 %v5889_v7, %v5867_v27  ;;  %v2253_v56 = vld [vmem:[#allocation3 + $0x83] ss:$2 sm:$0xf]  ;;  %v2320_v3 = vld [vmem:[#allocation4 + $0x2e] sm:$0xff]  ;;  %v3054_v36 = vld [vmem:[%s6352_s8 + $0x20] sm:$0xff] }
 0x27a   :  { %4224 = vrot.lane.b32.xlu1 %v4223_v10, %s4427_s3  ;;  %2254 = vst.msk [vmem:[#allocation4 + $0x39] sm:$0xf] %vm2238_vm2, %v2253_v56  ;;  %v2256_v31 = vld [vmem:[#allocation3 + $0x97] ss:$2 sm:$0xf]  ;;  %v2318_v0 = vld [vmem:[#allocation4 + $0x1e] sm:$0xff] }
 0x27b   :  { %4229 = vrot.lane.b32.xlu0 %v4228_v11, %s4427_s3  ;;  %2257 = vst.msk [vmem:[#allocation4 + $0x3f] sm:$0xf] %vm2238_vm2, %v2256_v31  ;;  %v4268_v35 = vpack.i.bf16 %v2319_v39, %v2318_v0  ;;  %v5921_v54 = vld [vmem:[#allocation4 + $0x21] sm:$0xff]  ;;  %v5929_v23 = vld [vmem:[#allocation4 + $0x31] sm:$0xff] }
 0x27c   :  { %v4273_v57 = vpack.i.bf16 %v5921_v54, %v5919_v58  ;;  %v2324_v20 = vld [vmem:[#allocation4 + $0x4e] sm:$0xff]  ;;  %v4283_v24 = vpack.i.bf16 %v5929_v23, %v5927_v51  ;;  %v3058_v11 = vld [vmem:[%s6352_s8 + $0x40] sm:$0xff]  ;;  %v2261_v43 = vld [vmem:[#allocation4 + $0x1] sm:$0xff] }
 0x27d   :  { %v2259_v49 = vld [vmem:[#allocation3 + $0xab] ss:$2 sm:$0xf]  ;;  %v4298_v25 = vpack.i.bf16 %v2306_v19, %v2324_v20  ;;  %v2279_v56 = vld [vmem:[#allocation4 + $0x3] sm:$0xff] }
 0x27e   :  { %4234 = vrot.lane.b32.xlu1 %v4233_v22, %s4427_s3  ;;  %2260 = vst.msk [vmem:[#allocation4 + $0x45] sm:$0xf] %vm2238_vm2, %v2259_v49  ;;  %v3053_v14 = vld [vmem:[%s6352_s8 + $0x18] sm:$0xff]  ;;  %v3056_v10 = vld [vmem:[%s6352_s8 + $0x30] sm:$0xff] }
 0x27f   :  { %4239 = vrot.lane.b32.xlu0 %v4238_v5, %s4427_s3  ;;  %v3057_v59 = vld [vmem:[%s6352_s8 + $0x38] sm:$0xff] }
 0x280   :  { %v2325_v52 = vld [vmem:[#allocation4 + $0x4f] sm:$0xff] }
 0x281   :  { %v5898_v28 = vld [vmem:[#allocation4 + $0x37] sm:$0xff]  ;;  %v2530_v27 = vpack.c.bf16 %v2325_v52, %v2325_v52 }
 0x282   :  { %v2276_v41 = vld [vmem:[#allocation4 + $0x32] sm:$0xff]  ;;  %v2520_v6 = vpack.c.bf16 %v5898_v28, %v5889_v7  ;;  %v2277_v21 = vld [vmem:[#allocation4 + $0x3a] sm:$0xff] }
 0x283   :  { %v4248_v29 = vpack.i.bf16 %v2277_v21, %v2276_v41  ;;  %v2321_v44 = vld [vmem:[#allocation4 + $0x36] sm:$0xff] }
 0x284   :  { %v4278_v33 = vpack.i.bf16 %v2321_v44, %v2320_v3  ;;  %v5935_v62 = vld [vmem:[#allocation4 + $0x39] sm:$0xff]  ;;  %v3330_v52 = vld [vmem:[%s6353_s9 + $0x58] sm:$0xff] }
 0x285   :  { %v5902_v37 = vld [vmem:[#allocation4 + $0x3f] sm:$0xff]  ;;  %v5904_v16 = vld [vmem:[#allocation4 + $0x47] sm:$0xff]  ;;  %4249 = vrot.lane.b32.xlu0 %v4248_v29, %s4427_s3 }
 0x286   :  { %v4243_v50 = vpack.i.bf16 %v5902_v37, %v5898_v28  ;;  %v2525_v48 = vpack.c.bf16 %v5904_v16, %v5902_v37  ;;  %v2278_v9 = vld [vmem:[#allocation4 + $0x42] sm:$0xff]  ;;  %v2280_v29 = vld [vmem:[#allocation4 + $0xb] sm:$0xff] }
 0x287   :  { %v4253_v4 = vpack.i.bf16 %v2278_v9, %v5904_v16  ;;  %v2322_v38 = vld [vmem:[#allocation4 + $0x3e] sm:$0xff]  ;;  %v2323_v13 = vld [vmem:[#allocation4 + $0x46] sm:$0xff] }
 0x288   :  { %4244 = vrot.lane.b32.xlu1 %v4243_v50, %s4427_s3  ;;  %v4288_v26 = vpack.i.bf16 %v2323_v13, %v2322_v38  ;;  %v5937_v30 = vld [vmem:[#allocation4 + $0x41] sm:$0xff] }
 0x289   :  { %4259 = vrot.lane.b32.xlu0 %v4258_v61, %s4427_s3  ;;  %v4293_v18 = vpack.i.bf16 %v5937_v30, %v5935_v62  ;;  %v4397_v61 = vld [vmem:[%s6349_s5 + $0xb8] sm:$0xff]   ;;  %v2282_v38 = vld [vmem:[#allocation4 + $0x1b] sm:$0xff] }
 0x28c   :  { %4254 = vrot.lane.b32.xlu1 %v4253_v4, %s4427_s3  ;;  %v4398_v4 = vld [vmem:[%s6349_s5 + $0xf0] sm:$0xff]  }
 0x28d   :  { %4269 = vrot.lane.b32.xlu0 %v4268_v35, %s4427_s3 }
 0x290   :  { %4264 = vrot.lane.b32.xlu1 %v4263_v17, %s4427_s3 }
 0x291   :  { %4279 = vrot.lane.b32.xlu0 %v4278_v33, %s4427_s3  ;;  %v4400_v33 = vld [vmem:[%s6349_s5 + $0xe8] sm:$0xff]  }
 0x294   :  { %4274 = vrot.lane.b32.xlu1 %v4273_v57, %s4427_s3  ;;  %v2281_v57 = vld [vmem:[#allocation4 + $0x13] sm:$0xff] }
 0x295   :  { %4289 = vrot.lane.b32.xlu0 %v4288_v26, %s4427_s3 }
 0x298   :  { %4284 = vrot.lane.b32.xlu1 %v4283_v24, %s4427_s3 }
 0x299   :  { %4299 = vrot.lane.b32.xlu0 %v4298_v25, %s4427_s3 }
 0x29c   :  { %4294 = vrot.lane.b32.xlu1 %v4293_v18, %s4427_s3  ;;  %v4401_v18 = vld [vmem:[%s6349_s5 + $0xa8] sm:$0xff]  }
 0x29d   :  { %3066 = vperm.xlu0 %4211, %v3051_v12  }
 0x2a0   :  { %3061 = vperm.xlu1 %4212, %v3050_v2  }
 0x2a1   :  { %3076 = vperm.xlu0 %4211, %v3053_v14   ;;  %v2284_v14 = vld [vmem:[#allocation4 + $0x2b] sm:$0xff] }
 0x2a4   :  { %3071 = vperm.xlu1 %4212, %v3052_v8   ;;  %v4402_v8 = vld [vmem:[%s6349_s5 + $0xe0] sm:$0xff]  }
 0x2a5   :  { %3086 = vperm.xlu0 %4211, %v3055_v45  }
 0x2a8   :  { %3081 = vperm.xlu1 %4212, %v3054_v36  }
 0x2a9   :  { %3096 = vperm.xlu0 %4211, %v3057_v59  }
 0x2ac   :  { %3091 = vperm.xlu1 %4212, %v3056_v10  }
 0x2b0   :  { %3101 = vperm.xlu1 %4212, %v3058_v11  }
 0x2e2   :  { %v4220_v34 = vpop.permute.xlu0 %4219 }
 0x2e3   :  { %v4215_v55 = vpop.permute.xlu1 %4214  ;;  %v4222_v5 = vunpack.i.h.bf16 %v4220_v34  ;;  %v4221_v22 = vunpack.i.l.bf16 %v4220_v34 }
 0x2e4   :  { %v4217_v31 = vunpack.i.h.bf16 %v4215_v55  ;;  %v4216_v49 = vunpack.i.l.bf16 %v4215_v55  ;;  %v4404_v55 = vld [vmem:[%s6349_s5 + $0xd8] sm:$0xff]  }
 0x2e5   :  { %v2470_v41 = vsel %vm1772_vm1, %v2261_v43, %v4221_v22  ;;  %v2471_v21 = vsel %vm1772_vm1, %v2262_v40, %v4222_v5  ;;  %v4399_v40 = vld [vmem:[%s6349_s5 + $0xb0] sm:$0xff]   ;;  %v4403_v43 = vld [vmem:[%s6349_s5 + $0xa0] sm:$0xff]  }
 0x2e6   :  { %v2506_v50 = vpack.c.bf16 %v2471_v21, %v2470_v41  ;;  %v2479_v1 = vsel %vm1772_vm1, %v2279_v56, %v4216_v49  ;;  %v2480_v47 = vsel %vm1772_vm1, %v2280_v29, %v4217_v31  ;;  %v4405_v56 = vld [vmem:[%s6349_s5 + $0x98] sm:$0xff]   ;;  %v4406_v49 = vld [vmem:[%s6349_s5 + $0xd0] sm:$0xff]  }
 0x2e7   :  { %v2507_v9 = vpack.c.bf16 %v2480_v47, %v2479_v1 }
 0x2e9   :  { %2866 = vmatprep.mubr.bf16.mxu1 %v2507_v9 }
 0x2ea   :  { %2867 = vmatmul.mubr.bf16.vlgmr.msra.gmra.mxu1 %v2506_v50  ;;  %v4408_v50 = vld [vmem:[%s6349_s5 + $0xc8] sm:$0xff]  }
 0x2eb   :  { %4022 = vmatpush3.bf16.msra.mxu1 %v4397_v61 }
 0x2ec   :  { %v4225_v0 = vpop.permute.xlu1 %4224  ;;  %4023 = vmatprep.subr.bf16.mxu1 %v4398_v4  ;;  %v2285_v4 = vld [vmem:[#allocation4 + $0x33] sm:$0xff] }
 0x2ed   :  { %v4230_v39 = vpop.permute.xlu0 %4229  ;;  %v4227_v35 = vunpack.i.h.bf16 %v4225_v0  ;;  %v4226_v17 = vunpack.i.l.bf16 %v4225_v0  ;;  %v2286_v0 = vld [vmem:[#allocation4 + $0x3b] sm:$0xff] }
 0x2ee   :  { %v4232_v3 = vunpack.i.h.bf16 %v4230_v39  ;;  %v4231_v44 = vunpack.i.l.bf16 %v4230_v39 }
 0x2ef   :  { %v2481_v13 = vsel %vm1772_vm1, %v2281_v57, %v4226_v17  ;;  %v2482_v19 = vsel %vm1772_vm1, %v2282_v38, %v4227_v35  ;;  %4024 = vmatpush3.bf16.msra.mxu1 %v4399_v40  ;;  %v2287_v38 = vld [vmem:[#allocation4 + $0x43] sm:$0xff] }
 0x2f0   :  { %v2472_v20 = vsel %vm1772_vm1, %v5914_v60, %v4231_v44  ;;  %v2473_v26 = vsel %vm1772_vm1, %v5919_v58, %v4232_v3  ;;  %v2512_v25 = vpack.c.bf16 %v2482_v19, %v2481_v13  ;;  %v4235_v12 = vpop.permute.xlu1 %4234  ;;  %4025 = vmatprep.subr.bf16.mxu1 %v4400_v33  ;;  %v2283_v58 = vld [vmem:[#allocation4 + $0x23] sm:$0xff] }
 0x2f1   :  { %v4240_v24 = vpop.permute.xlu0 %4239  ;;  %v2511_v2 = vpack.c.bf16 %v2473_v26, %v2472_v20  ;;  %v4237_v45 = vunpack.i.h.bf16 %v4235_v12  ;;  %v4236_v60 = vunpack.i.l.bf16 %v4235_v12  ;;  %v4409_v44 = vld [vmem:[%s6349_s5 + $0x88] sm:$0xff]   ;;  %v2308_v12 = vld [vmem:[#allocation4 + $0x15] sm:$0xff] }
 0x2f2   :  { %v4242_v36 = vunpack.i.h.bf16 %v4240_v24  ;;  %v4241_v59 = vunpack.i.l.bf16 %v4240_v24  ;;  %2874 = vmatprep.mubr.bf16.mxu1 %v2512_v25  ;;  %v4411_v24 = vld [vmem:[%s6349_s5 + $0x80] sm:$0xff]  }
 0x2f3   :  { %2875 = vmatmul.mubr.bf16.gmra.mxu1 %v2511_v2  ;;  %v2483_v10 = vsel %vm1772_vm1, %v2283_v58, %v4236_v60  ;;  %v2484_v11 = vsel %vm1772_vm1, %v2284_v14, %v4237_v45 }
 0x2f4   :  { %4026 = vmatpush3.bf16.msra.mxu1 %v4401_v18  ;;  %v2517_v34 = vpack.c.bf16 %v2484_v11, %v2483_v10  ;;  %v2475_v5 = vsel %vm1772_vm1, %v5927_v51, %v4242_v36  ;;  %v2474_v22 = vsel %vm1772_vm1, %v5921_v54, %v4241_v59  ;;  %v4407_v51 = vld [vmem:[%s6349_s5 + $0x90] sm:$0xff]  }
 0x2f5   :  { %4027 = vmatprep.subr.bf16.mxu1 %v4402_v8  ;;  %v2516_v31 = vpack.c.bf16 %v2475_v5, %v2474_v22  ;;  %v2307_v18 = vld [vmem:[#allocation4 + $0xd] sm:$0xff]  ;;  %v2309_v22 = vld [vmem:[#allocation4 + $0x1d] sm:$0xff] }
 0x2f6   :  { %2882 = vmatprep.mubr.bf16.mxu1 %v2517_v34  ;;  %v2298_v34 = vld [vmem:[#allocation4 + $0x10] sm:$0xff] }
 0x2f7   :  { %v4250_v41 = vpop.permute.xlu0 %4249 }
 0x2f8   :  { %4028 = vmatpush3.bf16.msra.mxu1 %v4403_v43  ;;  %v4252_v21 = vunpack.i.h.bf16 %v4250_v41  ;;  %v4251_v29 = vunpack.i.l.bf16 %v4250_v41  ;;  %v2297_v43 = vld [vmem:[#allocation4 + $0x8] sm:$0xff] }
 0x2f9   :  { %4029 = vmatprep.subr.bf16.mxu1 %v4404_v55 }
 0x2fa   :  { %v4245_v54 = vpop.permute.xlu1 %4244  ;;  %v2477_v9 = vsel %vm1772_vm1, %v5935_v62, %v4252_v21  ;;  %v2476_v61 = vsel %vm1772_vm1, %v5929_v23, %v4251_v29  ;;  %v4410_v23 = vld [vmem:[%s6349_s5 + $0xc0] sm:$0xff]  }
 0x2fb   :  { %2883 = vmatmul.mubr.bf16.gmra.mxu1 %v2516_v31  ;;  %v4247_v1 = vunpack.i.h.bf16 %v4245_v54  ;;  %v4246_v47 = vunpack.i.l.bf16 %v4245_v54  ;;  %v4260_v17 = vpop.permute.xlu0 %4259  ;;  %v2521_v33 = vpack.c.bf16 %v2477_v9, %v2476_v61  ;;  %v4413_v9 = vld [vmem:[%s6349_s5 + $0x110] sm:$0xff]   ;;  %v2299_v61 = vld [vmem:[#allocation4 + $0x18] sm:$0xff] }
 0x2fc   :  { %4030 = vmatpush3.bf16.msra.mxu1 %v4405_v56  ;;  %v4262_v13 = vunpack.i.h.bf16 %v4260_v17  ;;  %v4261_v19 = vunpack.i.l.bf16 %v4260_v17 }
 0x2fd   :  { %4031 = vmatprep.subr.bf16.mxu1 %v4406_v49  ;;  %v2485_v39 = vsel %vm1772_vm1, %v2285_v4, %v4246_v47  ;;  %v2486_v40 = vsel %vm1772_vm1, %v2286_v0, %v4247_v1  ;;  %v2300_v4 = vld [vmem:[#allocation4 + $0x20] sm:$0xff] }
 0x2fe   :  { %v4255_v35 = vpop.permute.xlu1 %4254  ;;  %v2522_v3 = vpack.c.bf16 %v2486_v40, %v2485_v39  ;;  %v2497_v14 = vsel %vm1772_vm1, %v2307_v18, %v4261_v19  ;;  %v2498_v8 = vsel %vm1772_vm1, %v2308_v12, %v4262_v13  ;;  %v2311_v40 = vld [vmem:[#allocation4 + $0x2d] sm:$0xff] }
 0x2ff   :  { %v4256_v62 = vunpack.i.l.bf16 %v4255_v35  ;;  %v4257_v57 = vunpack.i.h.bf16 %v4255_v35  ;;  %v4270_v45 = vpop.permute.xlu0 %4269  ;;  %v2509_v58 = vpack.c.bf16 %v2498_v8, %v2497_v14  ;;  %v2312_v35 = vld [vmem:[#allocation4 + $0x35] sm:$0xff]  ;;  %v2314_v14 = vld [vmem:[#allocation4 + $0x45] sm:$0xff] }
 0x300   :  { %4032 = vmatpush3.bf16.msra.mxu1 %v4407_v51  ;;  %2890 = vmatprep.mubr.bf16.mxu1 %v2522_v3  ;;  %v4272_v10 = vunpack.i.h.bf16 %v4270_v45  ;;  %v4271_v11 = vunpack.i.l.bf16 %v4270_v45  ;;  %v4412_v51 = vld [vmem:[%s6349_s5 + $0x118] sm:$0xff]  }
 0x301   :  { %4033 = vmatprep.subr.bf16.mxu1 %v4408_v50  ;;  %v2487_v20 = vsel %vm1772_vm1, %v2287_v38, %v4256_v62  ;;  %v2478_v25 = vsel %vm1772_vm1, %v5937_v30, %v4257_v57  ;;  %v2310_v30 = vld [vmem:[#allocation4 + $0x25] sm:$0xff] }
 0x302   :  { %v2527_v26 = vpack.c.bf16 %v2487_v20, %v2487_v20  ;;  %v4265_v2 = vpop.permute.xlu1 %4264  ;;  %v2526_v60 = vpack.c.bf16 %v2478_v25, %v2478_v25  ;;  %v2499_v31 = vsel %vm1772_vm1, %v2309_v22, %v4271_v11  ;;  %v2500_v49 = vsel %vm1772_vm1, %v2310_v30, %v4272_v10  ;;  %v4414_v62 = vld [vmem:[%s6349_s5 + $0x108] sm:$0xff]   ;;  %v2302_v25 = vld [vmem:[#allocation4 + $0x30] sm:$0xff] }
 0x303   :  { %2891 = vmatmul.mubr.bf16.gmra.mxu1 %v2521_v33  ;;  %v4267_v36 = vunpack.i.h.bf16 %v4265_v2  ;;  %v4266_v59 = vunpack.i.l.bf16 %v4265_v2  ;;  %v4280_v41 = vpop.permute.xlu0 %4279  ;;  %v2514_v50 = vpack.c.bf16 %v2500_v49, %v2499_v31  ;;  %v2313_v2 = vld [vmem:[#allocation4 + $0x3d] sm:$0xff] }
 0x304   :  { %4034 = vmatpush3.bf16.msra.mxu1 %v4409_v44  ;;  %2898 = vmatprep.mubr.bf16.mxu1 %v2527_v26  ;;  %v4282_v1 = vunpack.i.h.bf16 %v4280_v41  ;;  %v4281_v47 = vunpack.i.l.bf16 %v4280_v41  ;;  %v2301_v26 = vld [vmem:[#allocation4 + $0x28] sm:$0xff] }
 0x305   :  { %4035 = vmatprep.subr.bf16.mxu1 %v4410_v23  ;;  %v2489_v55 = vsel %vm1772_vm1, %v2298_v34, %v4267_v36  ;;  %v2488_v5 = vsel %vm1772_vm1, %v2297_v43, %v4266_v59  ;;  %v2315_v43 = vld [vmem:[#allocation4 + $0x4d] sm:$0xff]  ;;  %v2303_v34 = vld [vmem:[#allocation4 + $0x38] sm:$0xff] }
 0x306   :  { %v4275_v56 = vpop.permute.xlu1 %4274  ;;  %v2508_v54 = vpack.c.bf16 %v2489_v55, %v2488_v5  ;;  %v2501_v3 = vsel %vm1772_vm1, %v2311_v40, %v4281_v47  ;;  %v2502_v44 = vsel %vm1772_vm1, %v2312_v35, %v4282_v1  ;;  %v2304_v55 = vld [vmem:[#allocation4 + $0x40] sm:$0xff] }
 0x307   :  { %v4277_v21 = vunpack.i.h.bf16 %v4275_v56  ;;  %v4276_v29 = vunpack.i.l.bf16 %v4275_v56  ;;  %v4290_v33 = vpop.permute.xlu0 %4289  ;;  %v2519_v13 = vpack.c.bf16 %v2502_v44, %v2501_v3 }
 0x308   :  { %4036 = vmatpush3.bf16.msra.mxu1 %v4411_v24  ;;  %v4292_v19 = vunpack.i.h.bf16 %v4290_v33  ;;  %v4291_v20 = vunpack.i.l.bf16 %v4290_v33  ;;  %v4415_v24 = vld [vmem:[%s6349_s5 + $0x100] sm:$0xff]  }
 0x309   :  { %4179 = vmatprep.subr.bf16.mxu1 %v4424_v15  ;;  %v2491_v0 = vsel %vm1772_vm1, %v2300_v4, %v4277_v21  ;;  %v2490_v39 = vsel %vm1772_vm1, %v2299_v61, %v4276_v29 }
 0x30a   :  { %v4285_v17 = vpop.permute.xlu1 %4284  ;;  %v2513_v23 = vpack.c.bf16 %v2491_v0, %v2490_v39  ;;  %v2503_v45 = vsel %vm1772_vm1, %v2313_v2, %v4291_v20 }
 0x30b   :  { %2899 = vmatmul.mubr.bf16.gmra.mxu1 %v2526_v60  ;;  %v4287_v57 = vunpack.i.h.bf16 %v4285_v17  ;;  %v4286_v38 = vunpack.i.l.bf16 %v4285_v17  ;;  %v2504_v60 = vsel %vm1772_vm1, %v2314_v14, %v4292_v19  ;;  %v4300_v36 = vpop.permute.xlu0 %4299 }
 0x30c   :  { %2938 = vmatprep.mubr.bf16.mxu1 %v2509_v58  ;;  %v4301_v58 = vunpack.i.l.bf16 %v4300_v36  ;;  %v2524_v30 = vpack.c.bf16 %v2504_v60, %v2503_v45  ;;  %v4302_v41 = vunpack.i.h.bf16 %v4300_v36 }
 0x30d   :  { %v2493_v18 = vsel %vm1772_vm1, %v2302_v25, %v4287_v57  ;;  %v2492_v12 = vsel %vm1772_vm1, %v2301_v26, %v4286_v38 }
 0x30e   :  { %v4295_v8 = vpop.permute.xlu1 %4294  ;;  %v2518_v59 = vpack.c.bf16 %v2493_v18, %v2492_v12  ;;  %v2505_v5 = vsel %vm1772_vm1, %v2315_v43, %v4301_v58  ;;  %v3333_v43 = vld [vmem:[%s6353_s9 + $0x70] sm:$0xff] }
 0x30f   :  { %v4297_v10 = vunpack.i.h.bf16 %v4295_v8  ;;  %v4296_v11 = vunpack.i.l.bf16 %v4295_v8  ;;  %v2529_v31 = vpack.c.bf16 %v2505_v5, %v2505_v5 }
 0x311   :  { %v2495_v22 = vsel %vm1772_vm1, %v2304_v55, %v4297_v10  ;;  %v2494_v56 = vsel %vm1772_vm1, %v2303_v34, %v4296_v11  ;;  %v3350_v10 = vld [vmem:[%s6353_s9 + $0xf8] sm:$0xff]  ;;  %v3348_v55 = vld [vmem:[%s6353_s9 + $0xe8] sm:$0xff] }
 0x312   :  { %v2523_v49 = vpack.c.bf16 %v2495_v22, %v2494_v56  ;;  %v3334_v11 = vld [vmem:[%s6353_s9 + $0x78] sm:$0xff]  ;;  %4076 = vmatprep.subr.mxu0 %v3350_v10  ;;  %v3332_v22 = vld [vmem:[%s6353_s9 + $0x68] sm:$0xff] }
 0x313   :  { %2939 = vmatmul.mubr.bf16.vlgmr.msra.gmra.mxu1 %v2508_v54  ;;  %4077 = vmatpush3.msra.mxu0 %v3334_v11 }
 0x314   :  { %2946 = vmatprep.mubr.bf16.mxu1 %v2514_v50  ;;  %4180 = vmatpush3.bf16.msra.mxu1 %v4412_v51  ;;  %v2305_v51 = vld [vmem:[#allocation4 + $0x48] sm:$0xff] }
 0x315   :  { %4181 = vmatprep.subr.bf16.mxu1 %v4424_v15  ;;  %v2496_v54 = vsel %vm1772_vm1, %v2305_v51, %v4302_v41  ;;  %v3346_v51 = vld [vmem:[%s6353_s9 + $0xd8] sm:$0xff] }
 0x316   :  { %v2528_v21 = vpack.c.bf16 %v2496_v54, %v2496_v54 }
 0x318   :  { %4182 = vmatpush3.bf16.msra.mxu1 %v4413_v9 }
 0x319   :  { %4183 = vmatprep.subr.bf16.mxu1 %v4424_v15 }
 0x31b   :  { %2947 = vmatmul.mubr.bf16.gmra.mxu1 %v2513_v23 }
 0x31c   :  { %2954 = vmatprep.mubr.bf16.mxu1 %v2519_v13  ;;  %4184 = vmatpush3.bf16.msra.mxu1 %v4414_v62 }
 0x31d   :  { %4185 = vmatprep.subr.bf16.mxu1 %v4424_v15 }
 0x320   :  { %4186 = vmatpush3.bf16.msra.mxu1 %v4415_v24 }
 0x323   :  { %2955 = vmatmul.mubr.bf16.gmra.mxu1 %v2518_v59 }
 0x324   :  { %2962 = vmatprep.mubr.bf16.mxu1 %v2524_v30  ;;  %v3349_v30 = vld [vmem:[%s6353_s9 + $0xf0] sm:$0xff] }
 0x325   :  { %4078 = vmatprep.subr.mxu0 %v3349_v30  ;;  %v3340_v30 = vld [vmem:[%s6353_s9 + $0xa8] sm:$0xff] }
 0x326   :  { %4079 = vmatpush3.msra.mxu0 %v3333_v43 }
 0x327   :  { %4080 = vmatprep.subr.mxu0 %v3348_v55 }
 0x328   :  { %4081 = vmatpush3.msra.mxu0 %v3332_v22 }
 0x32b   :  { %2963 = vmatmul.mubr.bf16.gmra.mxu1 %v2523_v49  ;;  %v3331_v49 = vld [vmem:[%s6353_s9 + $0x60] sm:$0xff] }
 0x32c   :  { %2970 = vmatprep.mubr.bf16.mxu1 %v2529_v31  ;;  %v3347_v31 = vld [vmem:[%s6353_s9 + $0xe0] sm:$0xff] }
 0x32d   :  { %4082 = vmatprep.subr.mxu0 %v3347_v31 }
 0x32e   :  { %4083 = vmatpush3.msra.mxu0 %v3331_v49  ;;  %v3339_v49 = vld [vmem:[%s6353_s9 + $0xa0] sm:$0xff] }
 0x32f   :  { %4084 = vmatprep.subr.mxu0 %v3346_v51  ;;  %v3323_v51 = vld [vmem:[%s6353_s9 + $0x20] sm:$0xff] }
 0x330   :  { %4085 = vmatpush3.msra.mxu0 %v3330_v52 }
 0x333   :  { %2971 = vmatmul.mubr.bf16.gmra.mxu1 %v2528_v21 }
 0x334   :  { %4187 = vmatprep.mubr.msk.bf16.mxu1 %vm4426_vm0, %v4424_v15 }
 0x33b   :  { %4188 = vmatmul.mubr.msk.bf16.vlgmr.msra.gmra.mxu1 %vm1772_vm1, %v2510_v46 }
 0x33c   :  { %4191 = vmatprep.mubr.msk.bf16.mxu1 %vm4426_vm0, %v4424_v15 }
 0x343   :  { %4192 = vmatmul.mubr.msk.bf16.gmra.mxu1 %vm1772_vm1, %v2515_v42 }
 0x344   :  { %4195 = vmatprep.mubr.msk.bf16.mxu1 %vm4426_vm0, %v4424_v15 }
 0x34b   :  { %4196 = vmatmul.mubr.msk.bf16.gmra.mxu1 %vm1772_vm1, %v2520_v6 }
 0x34c   :  { %4199 = vmatprep.mubr.msk.bf16.mxu1 %vm4426_vm0, %v4424_v15 }
 0x353   :  { %4200 = vmatmul.mubr.msk.bf16.gmra.mxu1 %vm1772_vm1, %v2525_v48 }
 0x354   :  { %4203 = vmatprep.mubr.msk.bf16.mxu1 %vm4426_vm0, %v4424_v15 }
 0x35b   :  { %4204 = vmatmul.mubr.msk.bf16.gmra.mxu1 %vm1772_vm1, %v2530_v27 }
 0x3aa   :  { %v3991_v63 = vpop.f32.mrf.mxu1 }
 0x3ac   :  { %v3992_v53 = vpop.f32.mrf.mxu1 }
 0x3ad   :  { %v6102_v46 = vadd.f32 %v3992_v53, %v3991_v63  ;;  %v3345_v63 = vld [vmem:[%s6353_s9 + $0xd0] sm:$0xff] }
 0x3ae   :  { %v3994_v42 = vpop.f32.mrf.mxu1  ;;  %4086 = vmatprep.subr.mxu0 %v3345_v63 }
 0x3b0   :  { %v3995_v7 = vpop.f32.mrf.mxu1 }
 0x3b1   :  { %v6104_v28 = vadd.f32 %v3995_v7, %v3994_v42  ;;  %v3329_v42 = vld [vmem:[%s6353_s9 + $0x50] sm:$0xff]  ;;  %v3062_v7 = vpop.permute.xlu1 %3061 }
 0x3b2   :  { %4087 = vmatpush3.msra.mxu0 %v3329_v42 }
 0x3b3   :  { %v3997_v6 = vpop.f32.mrf.mxu1 }
 0x3b5   :  { %v3998_v29 = vpop.f32.mrf.mxu1 }
 0x3b6   :  { %v6106_v37 = vadd.f32 %v3998_v29, %v3997_v6  ;;  %v3344_v6 = vld [vmem:[%s6353_s9 + $0xc8] sm:$0xff] }
 0x3b7   :  { %v4000_v16 = vpop.f32.mrf.mxu1  ;;  %4088 = vmatprep.subr.mxu0 %v3344_v6  ;;  %v3322_v6 = vld [vmem:[%s6353_s9 + $0x18] sm:$0xff] }
 0x3b9   :  { %v4001_v48 = vpop.f32.mrf.mxu1 }
 0x3ba   :  { %v6108_v50 = vadd.f32 %v4001_v48, %v4000_v16 }
 0x3bb   :  { %v4003_v15 = vpop.f32.mrf.mxu1 }
 0x3bd   :  { %v4004_v1 = vpop.f32.mrf.mxu1 }
 0x3be   :  { %v6110_v47 = vadd.f32 %v4004_v1, %v4003_v15  ;;  %v3328_v15 = vld [vmem:[%s6353_s9 + $0x48] sm:$0xff] }
 0x3bf   :  { %v4006_v9 = vpop.f32.mrf.mxu1  ;;  %4089 = vmatpush3.msra.mxu0 %v3328_v15 }
 0x3c1   :  { %v4007_v61 = vpop.f32.mrf.mxu1 }
 0x3c2   :  { %v6112_v4 = vadd.f32 %v4007_v61, %v4006_v9  ;;  %v3343_v9 = vld [vmem:[%s6353_s9 + $0xc0] sm:$0xff] }
 0x3c3   :  { %v4009_v0 = vpop.f32.mrf.mxu1  ;;  %4090 = vmatprep.subr.mxu0 %v3343_v9 }
 0x3c5   :  { %v4010_v39 = vpop.f32.mrf.mxu1 }
 0x3c6   :  { %v6114_v40 = vadd.f32 %v4010_v39, %v4009_v0  ;;  %v3327_v0 = vld [vmem:[%s6353_s9 + $0x40] sm:$0xff]  ;;  %v3067_v39 = vpop.permute.xlu0 %3066 }
 0x3c7   :  { %v4012_v35 = vpop.f32.mrf.mxu1  ;;  %4091 = vmatpush3.msra.mxu0 %v3327_v0 }
 0x3c9   :  { %v4013_v17 = vpop.f32.mrf.mxu1 }
 0x3ca   :  { %v6116_v3 = vadd.f32 %v4013_v17, %v4012_v35  ;;  %v3342_v17 = vld [vmem:[%s6353_s9 + $0xb8] sm:$0xff] }
 0x3cb   :  { %v4015_v44 = vpop.f32.mrf.mxu1  ;;  %4092 = vmatprep.subr.mxu0 %v3342_v17 }
 0x3cd   :  { %v4016_v33 = vpop.f32.mrf.mxu1 }
 0x3ce   :  { %v6118_v62 = vadd.f32 %v4016_v33, %v4015_v44 }
 0x3cf   :  { %v4018_v23 = vpop.f32.mrf.mxu1 }
 0x3d1   :  { %v4019_v57 = vpop.f32.mrf.mxu1 }
 0x3d2   :  { %v3326_v57 = vld [vmem:[%s6353_s9 + $0x38] sm:$0xff] }
 0x3d3   :  { %v4037_v38 = vpop.f32.mrf.mxu1  ;;  %4093 = vmatpush3.msra.mxu0 %v3326_v57 }
 0x3d5   :  { %v4038_v13 = vpop.f32.mrf.mxu1 }
 0x3d6   :  { %v4039_v5 = vadd.f32 %v4038_v13, %v4037_v38  ;;  %v3341_v13 = vld [vmem:[%s6353_s9 + $0xb0] sm:$0xff] }
 0x3d7   :  { %v4040_v19 = vpop.f32.mrf.mxu1  ;;  %4094 = vmatprep.subr.mxu0 %v3341_v13 }
 0x3d8   :  { %v2941_v21 = vadd.f32 %v4039_v5, %v6102_v46 }
 0x3d9   :  { %v4041_v20 = vpop.f32.mrf.mxu1 }
 0x3da   :  { %v4042_v54 = vadd.f32 %v4041_v20, %v4040_v19 }
 0x3db   :  { %v4043_v26 = vpop.f32.mrf.mxu1 }
 0x3dc   :  { %v2944_v48 = vadd.f32 %v4042_v54, %v6104_v28  ;;  %v3077_v54 = vpop.permute.xlu0 %3076 }
 0x3dd   :  { %v4044_v24 = vpop.f32.mrf.mxu1 }
 0x3de   :  { %v4045_v29 = vadd.f32 %v4044_v24, %v4043_v26 }
 0x3df   :  { %v4046_v25 = vpop.f32.mrf.mxu1 }
 0x3e0   :  { %v2949_v23 = vadd.f32 %v4045_v29, %v6106_v37  ;;  %v3325_v37 = vld [vmem:[%s6353_s9 + $0x30] sm:$0xff] }
 0x3e1   :  { %v4047_v18 = vpop.f32.mrf.mxu1  ;;  %4095 = vmatpush3.msra.mxu0 %v3325_v37 }
 0x3e2   :  { %v4048_v28 = vadd.f32 %v4047_v18, %v4046_v25  ;;  %v3072_v25 = vpop.permute.xlu1 %3071  ;;  %4096 = vmatprep.subr.mxu0 %v3340_v30 }
 0x3e3   :  { %v6120_v12 = vpop.f32.mrf.mxu1 }
 0x3e4   :  { %v2952_v11 = vadd.f32 %v4048_v28, %v6108_v50 }
 0x3e5   :  { %v6122_v2 = vpop.f32.mrf.mxu1 }
 0x3e6   :  { %v4051_v43 = vadd.f32 %v6122_v2, %v6120_v12 }
 0x3e7   :  { %v6124_v14 = vpop.f32.mrf.mxu1 }
 0x3e9   :  { %v6126_v8 = vpop.f32.mrf.mxu1 }
 0x3ea   :  { %v4054_v63 = vadd.f32 %v6126_v8, %v6124_v14 }
 0x3eb   :  { %v6128_v45 = vpop.f32.mrf.mxu1 }
 0x3ed   :  { %v6130_v60 = vpop.f32.mrf.mxu1 }
 0x3ee   :  { %v4057_v28 = vadd.f32 %v6130_v60, %v6128_v45 }
 0x3ef   :  { %v6132_v36 = vpop.f32.mrf.mxu1 }
 0x3f1   :  { %v6134_v59 = vpop.f32.mrf.mxu1 }
 0x3f2   :  { %v4060_v37 = vadd.f32 %v6134_v59, %v6132_v36 }
 0x3f3   :  { %v6136_v58 = vpop.f32.mrf.mxu1 }
 0x3f5   :  { %v6150_v34 = vpop.f32.mrf.mxu1 }
 0x3f6   :  { %v4063_v36 = vadd.f32 %v6150_v34, %v6136_v58 }
 0x3f7   :  { %v4064_v56 = vpop.f32.mrf.mxu1 }
 0x3f8   :  { %v3324_v56 = vld [vmem:[%s6353_s9 + $0x28] sm:$0xff]  ;;  %v2973_v58 = vadd.f32 %v4063_v36, %v6118_v62 }
 0x3f9   :  { %v4065_v41 = vpop.f32.mrf.mxu1  ;;  %4097 = vmatpush3.msra.mxu0 %v3324_v56 }
 0x3fa   :  { %4098 = vmatprep.subr.mxu0 %v3339_v49 }
 0x3fb   :  { %v3012_v27 = vpop.f32.mrf.mxu1  ;;  %4099 = vmatpush3.msra.mxu0 %v3323_v51 }
 0x3fc   :  { %v6174_v53 = vadd.f32 %v3012_v27, %v2941_v21  ;;  %v3338_v27 = vld [vmem:[%s6353_s9 + $0x98] sm:$0xff] }
 0x3fd   :  { %v4189_v46 = vpop.f32.mrf.mxu1  ;;  %4100 = vmatprep.subr.mxu0 %v3338_v27 }
 0x3fe   :  { %v3104_v16 = vmul.f32 %v3062_v7, %v6174_v53  ;;  %v2957_v46 = vadd.f32 %v4051_v43, %v6110_v47  ;;  %v3321_v47 = vld [vmem:[%s6353_s9 + $0x10] sm:$0xff]  ;;  %4101 = vmatpush3.msra.mxu0 %v3322_v6 }
 0x3ff   :  { %v3015_v1 = vpop.f32.mrf.mxu1 }
 0x400   :  { %v6190_v61 = vadd.f32 %v3015_v1, %v2944_v48  ;;  %v3137_v44 = vmul.f32 %v3104_v16, %v6174_v53  ;;  %v3113_v19 = vsel %vm1772_vm1, %v3104_v16, 0.0  ;;  %v3337_v48 = vld [vmem:[%s6353_s9 + $0x90] sm:$0xff]  ;;  %v3082_v1 = vpop.permute.xlu1 %3081 }
 0x401   :  { %v4190_v35 = vpop.f32.mrf.mxu1  ;;  %4102 = vmatprep.subr.mxu0 %v3337_v48 }
 0x402   :  { %v3105_v33 = vmul.f32 %v3067_v39, %v6190_v61  ;;  %v3146_v55 = vsel %vm1772_vm1, %v3137_v44, 0.0  ;;  %v3336_v39 = vld [vmem:[%s6353_s9 + $0x88] sm:$0xff]  ;;  %v2960_v44 = vadd.f32 %v4054_v63, %v6112_v4  ;;  %4103 = vmatpush3.msra.mxu0 %v3321_v47  ;;  %v3319_v4 = vld [vmem:[%s6353_s9] sm:$0xff] }
 0x403   :  { %v3020_v38 = vpop.f32.mrf.mxu1  ;;  %4104 = vmatprep.subr.mxu0 %v3336_v39 }
 0x404   :  { %v3114_v20 = vsel %vm1772_vm1, %v3105_v33, 0.0  ;;  %v3138_v26 = vmul.f32 %v3105_v33, %v6190_v61  ;;  %v6210_v24 = vadd.f32 %v3020_v38, %v2949_v23  ;;  %v3320_v33 = vld [vmem:[%s6353_s9 + $0x8] sm:$0xff]  ;;  %v3335_v38 = vld [vmem:[%s6353_s9 + $0x80] sm:$0xff] }
 0x405   :  { %v3115_v18 = vadd.f32 %v3114_v20, %v3113_v19  ;;  %v4193_v10 = vpop.f32.mrf.mxu1  ;;  %v3087_v19 = vpop.permute.xlu0 %3086  ;;  %4105 = vmatpush3.msra.mxu0 %v3320_v33 }
 0x406   :  { %v3147_v5 = vsel %vm1772_vm1, %v3138_v26, 0.0  ;;  %v3106_v22 = vmul.f32 %v3072_v25, %v6210_v24  ;;  %v2965_v10 = vadd.f32 %v4057_v28, %v6114_v40  ;;  %4106 = vmatprep.subr.mxu0 %v3335_v38 }
 0x407   :  { %v3148_v50 = vadd.f32 %v3147_v5, %v3146_v55  ;;  %v3023_v31 = vpop.f32.mrf.mxu1  ;;  %4107 = vmatpush3.msra.mxu0 %v3319_v4 }
 0x408   :  { %v3116_v12 = vsel %vm1772_vm1, %v3106_v22, 0.0  ;;  %v3139_v2 = vmul.f32 %v3106_v22, %v6210_v24  ;;  %v6232_v41 = vadd.f32 %v3023_v31, %v2952_v11  ;;  %v3092_v22 = vpop.permute.xlu1 %3091  ;;  %v2968_v31 = vadd.f32 %v4060_v37, %v6116_v3 }
 0x409   :  { %v3117_v21 = vadd.f32 %v3116_v12, %v3115_v18  ;;  %v4194_v52 = vpop.f32.mrf.mxu1 }
 0x40a   :  { %v3149_v42 = vsel %vm1772_vm1, %v3139_v2, 0.0  ;;  %v3107_v7 = vmul.f32 %v3077_v54, %v6232_v41 }
 0x40b   :  { %v3150_v29 = vadd.f32 %v3149_v42, %v3148_v50  ;;  %v3028_v16 = vpop.f32.mrf.mxu1 }
 0x40c   :  { %v3118_v14 = vsel %vm1772_vm1, %v3107_v7, 0.0  ;;  %v3140_v8 = vmul.f32 %v3107_v7, %v6232_v41  ;;  %v6253_v15 = vadd.f32 %v3028_v16, %v2957_v46 }
 0x40d   :  { %v3119_v9 = vadd.f32 %v3118_v14, %v3117_v21  ;;  %v4197_v0 = vpop.f32.mrf.mxu1  ;;  %v3097_v21 = vpop.permute.xlu0 %3096 }
 0x40e   :  { %v3151_v35 = vsel %vm1772_vm1, %v3140_v8, 0.0  ;;  %v3108_v17 = vmul.f32 %v3082_v1, %v6253_v15 }
 0x40f   :  { %v3152_v23 = vadd.f32 %v3151_v35, %v3150_v29  ;;  %v3031_v57 = vpop.f32.mrf.mxu1  ;;  %v3102_v29 = vpop.permute.xlu1 %3101 }
 0x410   :  { %v3120_v45 = vsel %vm1772_vm1, %v3108_v17, 0.0  ;;  %v3141_v60 = vmul.f32 %v3108_v17, %v6253_v15  ;;  %v6274_v13 = vadd.f32 %v3031_v57, %v2960_v44 }
 0x411   :  { %v3121_v20 = vadd.f32 %v3120_v45, %v3119_v9  ;;  %v4198_v26 = vpop.f32.mrf.mxu1 }
 0x412   :  { %v3153_v25 = vsel %vm1772_vm1, %v3141_v60, 0.0  ;;  %v3109_v18 = vmul.f32 %v3087_v19, %v6274_v13 }
 0x413   :  { %v3154_v11 = vadd.f32 %v3153_v25, %v3152_v23  ;;  %v3036_v30 = vpop.f32.mrf.mxu1 }
 0x414   :  { %v3122_v43 = vsel %vm1772_vm1, %v3109_v18, 0.0  ;;  %v3142_v55 = vmul.f32 %v3109_v18, %v6274_v13  ;;  %v6286_v5 = vadd.f32 %v3036_v30, %v2965_v10 }
 0x415   :  { %v3123_v56 = vadd.f32 %v3122_v43, %v3121_v20  ;;  %v4201_v50 = vpop.f32.mrf.mxu1  ;;  %v3173_v43 = vld [vmem:[%s6354_s6] sm:$0x1] }
 0x416   :  { %v3155_v59 = vsel %vm1772_vm1, %v3142_v55, 0.0  ;;  %v3110_v40 = vmul.f32 %v3092_v22, %v6286_v5 }
 0x417   :  { %v3156_v49 = vadd.f32 %v3155_v59, %v3154_v11  ;;  %v3039_v12 = vpop.f32.mrf.mxu1 }
 0x418   :  { %v3124_v2 = vsel %vm1772_vm1, %v3110_v40, 0.0  ;;  %v3143_v51 = vmul.f32 %v3110_v40, %v6286_v5  ;;  %v3040_v54 = vadd.f32 %v3039_v12, %v2968_v31 }
 0x419   :  { %v3125_v52 = vadd.f32 %v3124_v2, %v3123_v56  ;;  %v4202_v27 = vpop.f32.mrf.mxu1  ;;  %v3177_v56 = vld [vmem:[%s6355_s7] sm:$0x1] }
 0x41a   :  { %v3157_v63 = vsel %vm1772_vm1, %v3143_v51, 0.0  ;;  %v3111_v42 = vmul.f32 %v3097_v21, %v3040_v54 }
 0x41b   :  { %v3158_v34 = vadd.f32 %v3157_v63, %v3156_v49  ;;  %v3044_v7 = vpop.f32.mrf.mxu1 }
 0x41c   :  { %v3126_v46 = vsel %vm1772_vm1, %v3111_v42, 0.0  ;;  %v3144_v3 = vmul.f32 %v3111_v42, %v3040_v54  ;;  %v3045_v6 = vadd.f32 %v3044_v7, %v2973_v58 }
 0x41d   :  { %v3127_v16 = vadd.f32 %v3126_v46, %v3125_v52  ;;  %v4205_v48 = vpop.f32.mrf.mxu1 }
 0x41e   :  { %v3159_v14 = vsel %vm1772_vm1, %v3144_v3, 0.0  ;;  %v3112_v8 = vmul.f32 %v3102_v29, %v3045_v6 }
 0x41f   :  { %v3160_v47 = vadd.f32 %v3159_v14, %v3158_v34  ;;  %v3047_v1 = vpop.f32.mrf.mxu1 }
 0x420   :  { %v3128_v9 = vsel %vm1772_vm1, %v3112_v8, 0.0  ;;  %v3145_v0 = vmul.f32 %v3112_v8, %v3045_v6 }
 0x421   :  { %v3129_v39 = vadd.f32 %v3128_v9, %v3127_v16  ;;  %v4206_v28 = vpop.f32.mrf.mxu1 }
 0x422   :  { %v3161_v62 = vsel %vm1772_vm1, %v3145_v0, 0.0 }
 0x423   :  { %v3130_v35 = vrot.slane %v3129_v39, 4  ;;  %v3162_v17 = vadd.f32 %v3161_v62, %v3160_v47 }
 0x425   :  { %v3131_v44 = vadd.f32 %v3130_v35, %v3129_v39  ;;  %v3163_v33 = vrot.slane %v3162_v17, 4 }
 0x427   :  { %v3132_v23 = vrot.slane %v3131_v44, 2  ;;  %v3164_v57 = vadd.f32 %v3163_v33, %v3162_v17 }
 0x429   :  { %v3133_v38 = vadd.f32 %v3132_v23, %v3131_v44  ;;  %v3165_v45 = vrot.slane %v3164_v57, 2 }
 0x42b   :  { %v3134_v60 = vrot.slane %v3133_v38, 1  ;;  %v3166_v4 = vadd.f32 %v3165_v45, %v3164_v57 }
 0x42d   :  { %v3135_v19 = vadd.f32 %v3134_v60, %v3133_v38  ;;  %v3167_v20 = vrot.slane %v3166_v4, 1 }
 0x42f   :  { %v3136_v26 = vmul.f32 0.03125, %v3135_v19  ;;  %v3168_v37 = vadd.f32 %v3167_v20, %v3166_v4 }
 0x431   :  { %v3169_v25 = vmul.f32 0.03125, %v3168_v37  ;;  %v3170_v18 = vmul.f32 %v3136_v26, %v3136_v26 }
 0x433   :  { %v3171_v10 = vsub.f32 %v3169_v25, %v3170_v18 }
 0x435   :  { %v3172_v11 = vmax.f32 %v3171_v10, 0.0 }
 0x437   :  { %v3174_v30 = vadd.f32 1e-05, %v3172_v11 }
 0x439   :  { %4418 = vrsqrt.f32 %v3174_v30 }
 0x446   :  { %v4419_v55 = vpop.eup %4418 }
 0x447   :  { %v3176_v22 = vmul.f32 %v4419_v55, %v3173_v43 }
 0x449   :  { %v3178_v50 = vmul.f32 %v3176_v22, %v3136_v26  ;;  %v3184_v36 = vrot.slane %v3176_v22, %v5726_v32 }
 0x44b   :  { %v3179_v59 = vsub.f32 %v3177_v56, %v3178_v50  ;;  %v3186_v40 = vmul.f32 %v3184_v36, %v6174_v53  ;;  %v3187_v31 = vmul.f32 %v3184_v36, %v6190_v61  ;;  %v3188_v49 = vmul.f32 %v3184_v36, %v6210_v24 }
 0x44c   :  { %v3189_v12 = vmul.f32 %v3184_v36, %v6232_v41  ;;  %v3190_v2 = vmul.f32 %v3184_v36, %v6253_v15  ;;  %v3191_v51 = vmul.f32 %v3184_v36, %v6274_v13  ;;  %v3192_v21 = vmul.f32 %v3184_v36, %v6286_v5 }
 0x44d   :  { %v3193_v52 = vmul.f32 %v3184_v36, %v3040_v54  ;;  %v3194_v27 = vmul.f32 %v3184_v36, %v3045_v6  ;;  %v3199_v63 = vrot.slane %v3179_v59, %v5726_v32 }
 0x44f   :  { %v3201_v42 = vadd.f32 %v3199_v63, %v3186_v40  ;;  %v3202_v58 = vadd.f32 %v3199_v63, %v3187_v31  ;;  %v3203_v34 = vadd.f32 %v3199_v63, %v3188_v49  ;;  %v3204_v53 = vadd.f32 %v3199_v63, %v3189_v12 }
 0x450   :  { %v3205_v7 = vadd.f32 %v3199_v63, %v3190_v2  ;;  %v3206_v61 = vadd.f32 %v3199_v63, %v3191_v51  ;;  %v3207_v46 = vadd.f32 %v3199_v63, %v3192_v21  ;;  %v3208_v24 = vadd.f32 %v3199_v63, %v3193_v52 }
 0x451   :  { %v3209_v3 = vadd.f32 %v3199_v63, %v3194_v27  ;;  %v3210_v41 = vmax.f32 %v3201_v42, 0.0  ;;  %v3211_v29 = vmax.f32 %v3202_v58, 0.0  ;;  %v3212_v15 = vmax.f32 %v3203_v34, 0.0 }
 0x452   :  { %v3213_v16 = vmax.f32 %v3204_v53, 0.0  ;;  %v3214_v13 = vmax.f32 %v3205_v7, 0.0  ;;  %v3215_v48 = vmax.f32 %v3206_v61, 0.0  ;;  %v3216_v5 = vmax.f32 %v3207_v46, 0.0 }
 0x453   :  { %v3217_v54 = vmax.f32 %v3208_v24, 0.0  ;;  %v3218_v6 = vmax.f32 %v3209_v3, 0.0  ;;  %3219 = vst.msk [vmem:[#allocation5] sm:$0xff] %vm1772_vm1, %v3210_v41  ;;  %3220 = vst.msk [vmem:[#allocation5 + $0x8] sm:$0xff] %vm1772_vm1, %v3211_v29  ;;  %v18_v46 = vstv %s6356_s12  ;;  %v3574_v3 = vld [vmem:[%s6357_s10] ss:$0 sm:$0xff] }
 0x454   :  { %3221 = vst.msk [vmem:[#allocation5 + $0x10] sm:$0xff] %vm1772_vm1, %v3212_v15  ;;  %3222 = vst.msk [vmem:[#allocation5 + $0x18] sm:$0xff] %vm1772_vm1, %v3213_v16  ;;  %v3575_v16 = vld [vmem:[%s6358_s11] ss:$0 sm:$0xff] }
 0x455   :  { %3223 = vst.msk [vmem:[#allocation5 + $0x20] sm:$0xff] %vm1772_vm1, %v3214_v13  ;;  %3224 = vst.msk [vmem:[#allocation5 + $0x28] sm:$0xff] %vm1772_vm1, %v3215_v48 }
 0x456   :  { %3225 = vst.msk [vmem:[#allocation5 + $0x30] sm:$0xff] %vm1772_vm1, %v3216_v5  ;;  %3226 = vst.msk [vmem:[#allocation5 + $0x38] sm:$0xff] %vm1772_vm1, %v3217_v54 }
 0x457   :  { %3227 = vst.msk [vmem:[#allocation5 + $0x40] sm:$0xff] %vm1772_vm1, %v3218_v6  ;;  %19 = vst [vmem:[#allocation7] sm:$0x1] %v18_v46 }
 0x45a   :  { %v3229_v14 = vld [vmem:[#allocation5 + $0x8] sm:$0xff]  ;;  %v3228_v25 = vld [vmem:[#allocation5] sm:$0xff] }
 0x45b   :  { %v3230_v8 = vld [vmem:[#allocation5 + $0x10] sm:$0xff]  ;;  %v3237_v18 = vld [vmem:[#allocation5 + $0x1] sm:$0xff] }
 0x45c   :  { %v3238_v47 = vld [vmem:[#allocation5 + $0x9] sm:$0xff]  ;;  %v3239_v28 = vld [vmem:[#allocation5 + $0x11] sm:$0xff]  ;;  %v3246_v11 = vmax.f32 %v3228_v25, %v3237_v18 }
 0x45d   :  { %v3233_v0 = vld [vmem:[#allocation5 + $0x28] sm:$0xff]  ;;  %v3235_v39 = vld [vmem:[#allocation5 + $0x38] sm:$0xff]  ;;  %v3247_v17 = vmax.f32 %v3229_v14, %v3238_v47  ;;  %v3248_v44 = vmax.f32 %v3230_v8, %v3239_v28  ;;  %v3234_v55 = vld [vmem:[#allocation5 + $0x30] sm:$0xff] }
 0x45e   :  { %v3244_v32 = vld [vmem:[#allocation5 + $0x39] sm:$0xff]  ;;  %v3242_v35 = vld [vmem:[#allocation5 + $0x29] sm:$0xff]  ;;  %v3243_v36 = vld [vmem:[#allocation5 + $0x31] sm:$0xff] }
 0x45f   :  { %v3262_v1 = vld [vmem:[#allocation5 + $0x3e] sm:$0xff]  ;;  %v3253_v33 = vmax.f32 %v3235_v39, %v3244_v32  ;;  %v3256_v23 = vld [vmem:[#allocation5 + $0xe] sm:$0xff]  ;;  %v3257_v57 = vld [vmem:[#allocation5 + $0x16] sm:$0xff]  ;;  %v3251_v38 = vmax.f32 %v3233_v0, %v3242_v35  ;;  %v3252_v49 = vmax.f32 %v3234_v55, %v3243_v36 }
 0x460   :  { %v3271_v9 = vld [vmem:[#allocation5 + $0x3f] sm:$0xff]  ;;  %v3260_v45 = vld [vmem:[#allocation5 + $0x2e] sm:$0xff]  ;;  %v3266_v4 = vld [vmem:[#allocation5 + $0x17] sm:$0xff] }
 0x461   :  { %v3280_v62 = vmax.f32 %v3262_v1, %v3271_v9  ;;  %v3265_v60 = vld [vmem:[#allocation5 + $0xf] sm:$0xff]  ;;  %v3275_v26 = vmax.f32 %v3257_v57, %v3266_v4  ;;  %v3255_v30 = vld [vmem:[#allocation5 + $0x6] sm:$0xff]  ;;  %v3270_v40 = vld [vmem:[#allocation5 + $0x37] sm:$0xff] }
 0x462   :  { %v3269_v19 = vld [vmem:[#allocation5 + $0x2f] sm:$0xff]  ;;  %v3274_v20 = vmax.f32 %v3256_v23, %v3265_v60  ;;  %v3264_v43 = vld [vmem:[#allocation5 + $0x7] sm:$0xff] }
 0x463   :  { %v3289_v37 = vmax.f32 %v3253_v33, %v3280_v62  ;;  %v3278_v10 = vmax.f32 %v3260_v45, %v3269_v19  ;;  %v3284_v56 = vmax.f32 %v3248_v44, %v3275_v26  ;;  %v3273_v50 = vmax.f32 %v3255_v30, %v3264_v43  ;;  %v3261_v59 = vld [vmem:[#allocation5 + $0x36] sm:$0xff]  ;;  %v3576_v54 = vld [vmem:[#allocation7] ss:$0 sm:$0xff] }
 0x464   :  { %v3283_v22 = vmax.f32 %v3247_v17, %v3274_v20  ;;  %v3279_v12 = vmax.f32 %v3261_v59, %v3270_v40 }
 0x465   :  { %3298 = vst.msk [vmem:[#allocation6 + $0x38] sm:$0xff] %vm1772_vm1, %v3289_v37  ;;  %v3287_v31 = vmax.f32 %v3251_v38, %v3278_v10  ;;  %3293 = vst.msk [vmem:[#allocation6 + $0x10] sm:$0xff] %vm1772_vm1, %v3284_v56  ;;  %v3282_v2 = vmax.f32 %v3246_v11, %v3273_v50 }
 0x466   :  { %3292 = vst.msk [vmem:[#allocation6 + $0x8] sm:$0xff] %vm1772_vm1, %v3283_v22  ;;  %v3288_v51 = vmax.f32 %v3252_v49, %v3279_v12 }
 0x467   :  { %3296 = vst.msk [vmem:[#allocation6 + $0x28] sm:$0xff] %vm1772_vm1, %v3287_v31  ;;  %3291 = vst.msk [vmem:[#allocation6] sm:$0xff] %vm1772_vm1, %v3282_v2 }
 0x468   :  { %3297 = vst.msk [vmem:[#allocation6 + $0x30] sm:$0xff] %vm1772_vm1, %v3288_v51 }
 0x46c   :  { %v3308_v21 = vld [vmem:[#allocation6 + $0x15] ss:$36 sm:$0x3] }
 0x46e   :  { %v3304_v52 = vld [vmem:[#allocation6 + $0x9] ss:$36 sm:$0x3]  ;;  %v3302_v34 = vld [vmem:[#allocation6 + $0x7] ss:$36 sm:$0x3] }
 0x46f   :  { %v4303_v27 = vpack.i.bf16 %v3304_v52, %v3308_v21  ;;  %v3306_v53 = vld [vmem:[#allocation6 + $0x13] ss:$36 sm:$0x3] }
 0x471   :  { %4304 = vrot.lane.b32.xlu0 %v4303_v27, %s4427_s3 }
 0x4e3   :  { %v4305_v63 = vpop.permute.xlu0 %4304 }
 0x4e4   :  { %v4307_v42 = vunpack.i.h.bf16 %v4305_v63  ;;  %v4306_v58 = vunpack.i.l.bf16 %v4305_v63 }
 0x4e6   :  { %v3317_v7 = vsel %vm1772_vm1, %v3302_v34, %v4307_v42  ;;  %v3318_v61 = vsel %vm1772_vm1, %v3306_v53, %v4306_v58 }
 0x4e7   :  { %3422 = vmatprep.mubr.f32.mxu0 %v3318_v61 }
 0x4e8   :  { %3423 = vmatmul.mubr.f32.vlgmr.msra.gmra.mxu0 %v3317_v7 }
 0x5a8   :  { %v4108_v24 = vpop.f32.mrf.mxu0 }
 0x5aa   :  { %v4109_v41 = vpop.f32.mrf.mxu0 }
 0x5ab   :  { %v4110_v29 = vadd.f32 %v4109_v41, %v4108_v24 }
 0x5ad   :  { %v3425_v15 = vadd.f32 %v4110_v29, %v3574_v3 }
 0x5af   :  { %v3428_v13 = vmax.f32 %v3425_v15, 0.0 }
 0x5b1   :  { %v3436_v48 = vmul.f32 %v3575_v16, %v3428_v13 }
 0x5b3   :  { %v3438_v5 = vsel %vm3437_vm3, %v3436_v48, 0.0 }
 0x5b4   :  { %3439 = vadd.xlane.f32.xlu1 %v3438_v5 }
 0x63d   :  { %v3440_v6 = vpop.xlane.xlu1 %3439 }
 0x63e   :  { %v3448_v32 = vadd.f32 %v3576_v54, %v3440_v6 }
 0x640   :  { %v3577_v14 = vmul.f32 -1.442695, %v3448_v32 }
 0x642   :  { %4420 = vpow2.f32 %v3577_v14 }
 0x64f   :  { %v4421_v8 = vpop.eup %4420 }
 0x650   :  { %v3452_v47 = vadd.f32 1.0, %v4421_v8 }
 0x652   :  { %4422 = vrcp.f32 %v3452_v47 }
 0x65f   :  { %v4423_v1 = vpop.eup %4422 }
 0x660   :  { %3456 = vst.msk [vmem:[%s6359_s13] sm:$0x3] %vm3455_vm4, %v4423_v1 }

</bundles_post_ra>
